<compile_context>
chip_gen: v7x
topology: tpu7x:2x2x1
jax: 0.10.0
libtpu: 0.0.40
codegen_flags: <defaults>
</compile_context>

<pallas_src>
import math
from functools import partial

import numpy as np
import jax
import jax.numpy as jnp
from jax.experimental import pallas as pl
from jax.experimental.pallas import tpu as pltpu

_LANE = 128
_WIDE = 5 * _LANE                 # K of the fused conv / fc1 matmuls
_TB_MAX = 128                     # batch-tile ceiling (VMEM-safe on v7x 64 MiB)
_VMEM_LIMIT = 64 * 1024 * 1024    # scoped VMEM cap (<= physical on every chip)

_WEIGHT_ORDER = ("w1w", "b1l", "w2w", "b2l", "wf1", "bf1", "wf2", "bf2",
                 "wl1", "bl1", "wl2", "bl2", "wl3", "bl3")


def _round_up(v, m):
    return ((v + m - 1) // m) * m


# ------------------------------- fused kernel ------------------------------- #

def _fedcon_kernel(x_ref, w1_ref, b1_ref, w2_ref, b2_ref,
                   wf1_ref, bf1_ref, wf2_ref, bf2_ref,
                   wl1_ref, bl1_ref, wl2_ref, bl2_ref, wl3_ref, bl3_ref,
                   y_ref, xp_ref,
                   xw_ref, pw_ref, hw_ref, s1_ref, p1_ref, s2_ref):
    f32 = jnp.float32
    bf16 = jnp.bfloat16
    tb = x_ref.shape[0]

    # Rows of the wide-LHS staging buffers that are never overwritten only feed
    # conv output rows that get sliced away; zero them once anyway.
    @pl.when(pl.program_id(0) == 0)
    def _init():
        xw_ref[:, 28:32, :] = jnp.zeros((tb, 4, _WIDE), bf16)
        pw_ref[:, 10:16, :] = jnp.zeros((tb, 6, _WIDE), bf16)

    # ---- conv1 (3->6, 5x5, valid) as ONE wide-K (K=640) MXU matmul ----
    # Wide LHS row (b, i): lane block ki holds input row i+ki of image b
    # (lane = w*3 + c, zero-padded 96 -> 128).  Output lanes encode
    # (j%2)*128 + (j//2)*8 + cout so the W-pool is a lane-half max.
    for ki in range(5):
        xw_ref[:, 0:28, ki * _LANE:(ki + 1) * _LANE] = (
            x_ref[:, ki:ki + 28, :].astype(bf16))
    c1 = jnp.dot(xw_ref[...].reshape(tb * 32, _WIDE), w1_ref[...],
                 preferred_element_type=f32)                       # [tb*32, 256]
    a1 = jnp.maximum(c1.reshape(tb, 32, 256)[:, :28, :] + b1_ref[...], 0.0)
    # 2x2 max-pool, W direction (even/odd output columns in separate lane halves).
    s1_ref[...] = jnp.maximum(a1[:, :, 0:_LANE], a1[:, :, _LANE:2 * _LANE])
    # 2x2 max-pool, H direction.
    for ip in range(14):
        p1_ref[:, ip, :] = jnp.maximum(s1_ref[:, 2 * ip, :],
                                       s1_ref[:, 2 * ip + 1, :])

    # ---- conv2 (6->16, 5x5, valid) as ONE wide-K (K=640) matmul ----
    for ki in range(5):
        pw_ref[:, 0:10, ki * _LANE:(ki + 1) * _LANE] = (
            p1_ref[:, ki:ki + 10, :].astype(bf16))
    c2 = jnp.dot(pw_ref[...].reshape(tb * 16, _WIDE), w2_ref[...],
                 preferred_element_type=f32)                       # [tb*16, 256]
    a2 = jnp.maximum(c2.reshape(tb, 16, 256)[:, :10, :] + b2_ref[...], 0.0)
    s2_ref[...] = jnp.maximum(a2[:, :, 0:_LANE], a2[:, :, _LANE:2 * _LANE])

    # ---- fc1 (400 -> 120) as ONE wide-K (K=640) matmul; the H-pool rows of
    # conv2 feed the 5 lane blocks of the wide LHS directly. ----
    for hp in range(5):
        hw_ref[:, hp * _LANE:(hp + 1) * _LANE] = jnp.maximum(
            s2_ref[:, 2 * hp, :], s2_ref[:, 2 * hp + 1, :]).astype(bf16)
    h = jnp.maximum(jnp.dot(hw_ref[...], wf1_ref[...],
                            preferred_element_type=f32) + bf1_ref[...], 0.0)
    # fc2 -> l1 -> l2 (projection) -> l3 (logits), all bf16 MXU / f32 accumulate.
    h = jnp.maximum(jnp.dot(h.astype(bf16), wf2_ref[...],
                            preferred_element_type=f32) + bf2_ref[...], 0.0)
    z = jnp.maximum(jnp.dot(h.astype(bf16), wl1_ref[...],
                            preferred_element_type=f32) + bl1_ref[...], 0.0)
    xp = jnp.dot(z.astype(bf16), wl2_ref[...],
                 preferred_element_type=f32) + bl2_ref[...]
    y = jnp.dot(xp.astype(bf16), wl3_ref[...],
                preferred_element_type=f32) + bl3_ref[...]
    xp_ref[...] = xp
    y_ref[...] = y


def _full_spec(shape):
    n = len(shape)
    return pl.BlockSpec(shape, lambda i, _n=n: (0,) * _n)


@partial(jax.jit, static_argnums=(2, 3))
def model_fedcon_forward(kweights, x_nchw, out_dim, n_classes):
    """kweights: dict from prepare_params(); x_nchw: [B, 3, 32, 32]."""
    B = x_nchw.shape[0]
    tb = min(_TB_MAX, _round_up(B, 8))          # big tiles for big batches
    pad_b = _round_up(B, tb)

    # NCHW -> NHWC -> [B, 32, W*C] with the fused (W,C) lane dim padded 96 -> 128.
    x = jnp.transpose(x_nchw, (0, 2, 3, 1)).reshape(B, 32, 96).astype(jnp.float32)
    x = jnp.pad(x, ((0, pad_b - B), (0, 0), (0, _LANE - 96)))

    weights = [kweights[k] for k in _WEIGHT_ORDER]
    d_pad = kweights["wl2"].shape[1]

    y_pad, xp_pad = pl.pallas_call(
        _fedcon_kernel,
        out_shape=(jax.ShapeDtypeStruct((pad_b, _LANE), jnp.float32),
                   jax.ShapeDtypeStruct((pad_b, d_pad), jnp.float32)),
        grid=(pad_b // tb,),
        in_specs=[pl.BlockSpec((tb, 32, _LANE), lambda i: (i, 0, 0))]
                 + [_full_spec(w.shape) for w in weights],
        out_specs=(pl.BlockSpec((tb, _LANE), lambda i: (i, 0)),
                   pl.BlockSpec((tb, d_pad), lambda i: (i, 0))),
        scratch_shapes=[pltpu.VMEM((tb, 32, _WIDE), jnp.bfloat16),   # conv1 wide LHS
                        pltpu.VMEM((tb, 16, _WIDE), jnp.bfloat16),   # conv2 wide LHS
                        pltpu.VMEM((tb, _WIDE), jnp.bfloat16),       # fc1 wide LHS
                        pltpu.VMEM((tb, 28, _LANE), jnp.float32),    # conv1 after W-pool
                        pltpu.VMEM((tb, 14, _LANE), jnp.float32),    # pool1
                        pltpu.VMEM((tb, 10, _LANE), jnp.float32)],   # conv2 after W-pool
        compiler_params=pltpu.CompilerParams(
            dimension_semantics=("parallel",),
            vmem_limit_bytes=_VMEM_LIMIT),
    )(x, *weights)

    y = y_pad[:B, :n_classes]
    proj = xp_pad[:B, :out_dim]
    if B == 1:                       # matches h.squeeze() semantics of the module
        return y[0], proj[0]
    return y, proj


# ----------------------- init (PyTorch layout) + packing ----------------------- #

def _uniform(key, shape, bound):
    return jax.random.uniform(key, shape, jnp.float32, -bound, bound)


def init_params(key, out_dim=256, n_classes=10):
    """Parameters in the original PyTorch layouts / init distribution."""
    ks = jax.random.split(key, 14)
    p = {}

    def lin(kw, kb, fan_in, fan_out):
        bound = 1.0 / math.sqrt(fan_in)
        return _uniform(kw, (fan_out, fan_in), bound), _uniform(kb, (fan_out,), bound)

    b1 = 1.0 / math.sqrt(3 * 5 * 5)
    p["conv1_w"] = _uniform(ks[0], (6, 3, 5, 5), b1)
    p["conv1_b"] = _uniform(ks[1], (6,), b1)
    b2 = 1.0 / math.sqrt(6 * 5 * 5)
    p["conv2_w"] = _uniform(ks[2], (16, 6, 5, 5), b2)
    p["conv2_b"] = _uniform(ks[3], (16,), b2)
    p["fc1_w"], p["fc1_b"] = lin(ks[4], ks[5], 16 * 5 * 5, 120)
    p["fc2_w"], p["fc2_b"] = lin(ks[6], ks[7], 120, 84)
    p["l1_w"], p["l1_b"] = lin(ks[8], ks[9], 84, 84)
    p["l2_w"], p["l2_b"] = lin(ks[10], ks[11], 84, out_dim)
    p["l3_w"], p["l3_b"] = lin(ks[12], ks[13], out_dim, n_classes)
    return p


def prepare_params(params, out_dim=256, n_classes=10):
    """One-time packing into the fused kernel's wide-K / padded bf16 layouts."""
    assert n_classes <= _LANE
    f32 = np.float32
    w1 = np.asarray(params["conv1_w"], f32)     # [6,3,5,5]
    b1 = np.asarray(params["conv1_b"], f32)
    w2 = np.asarray(params["conv2_w"], f32)     # [16,6,5,5]
    b2 = np.asarray(params["conv2_b"], f32)
    fc1_w = np.asarray(params["fc1_w"], f32)    # [120,400]

    # conv1 wide-K Toeplitz: K-row = ki*128 + (w*3+ci)  (w<32, ci<3, pad to 128);
    # output lane = (j%2)*128 + (j//2)*8 + cout  (j<28 output column).
    w1t = np.zeros((5, _LANE, 256), f32)
    for ki in range(5):
        for kj in range(5):
            for j in range(28):
                wpos = j + kj
                col = (j % 2) * _LANE + (j // 2) * 8
                for ci in range(3):
                    w1t[ki, wpos * 3 + ci, col:col + 6] = w1[:, ci, ki, kj]
    w1w = w1t.reshape(_WIDE, 256)
    b1l = np.zeros((1, 1, 256), f32)
    for j in range(28):
        col = (j % 2) * _LANE + (j // 2) * 8
        b1l[0, 0, col:col + 6] = b1

    # conv2 wide-K: K-row = ki*128 + (jp*8+ci) (jp<14, ci<6);
    # output lane = (j2%2)*128 + (j2//2)*16 + cout (j2<10).
    w2t = np.zeros((5, _LANE, 256), f32)
    for ki in range(5):
        for kj in range(5):
            for j2 in range(10):
                wpos = j2 + kj
                col = (j2 % 2) * _LANE + (j2 // 2) * 16
                for ci in range(6):
                    w2t[ki, wpos * 8 + ci, col:col + 16] = w2[:, ci, ki, kj]
    w2w = w2t.reshape(_WIDE, 256)
    b2l = np.zeros((1, 1, 256), f32)
    for j2 in range(10):
        col = (j2 % 2) * _LANE + (j2 // 2) * 16
        b2l[0, 0, col:col + 16] = b2

    # fc1 wide-K: fold the PyTorch NCHW flatten (index = c*25 + h*5 + w) into one
    # [640,128] matrix acting on lanes hp*128 + (wp*16 + c).
    wf1 = np.zeros((5, _LANE, _LANE), f32)
    for hp in range(5):
        for wp in range(5):
            for c in range(16):
                wf1[hp, wp * 16 + c, :120] = fc1_w[:, c * 25 + hp * 5 + wp]
    wf1w = wf1.reshape(_WIDE, _LANE)
    bf1 = np.zeros((1, _LANE), f32)
    bf1[0, :120] = np.asarray(params["fc1_b"], f32)

    def pad_linear(wt, bt, in_pad, out_pad):
        wm = np.asarray(wt, f32)            # PyTorch [out, in]
        o, i = wm.shape
        m = np.zeros((in_pad, out_pad), f32)
        m[:i, :o] = wm.T
        bv = np.zeros((1, out_pad), f32)
        bv[0, :o] = np.asarray(bt, f32)
        return m, bv

    d_pad = _round_up(out_dim, _LANE)
    wf2, bf2 = pad_linear(params["fc2_w"], params["fc2_b"], 128, 128)
    wl1, bl1 = pad_linear(params["l1_w"], params["l1_b"], 128, 128)
    wl2, bl2 = pad_linear(params["l2_w"], params["l2_b"], 128, d_pad)
    wl3, bl3 = pad_linear(params["l3_w"], params["l3_b"], d_pad, 128)

    bf16 = jnp.bfloat16
    packed = dict(
        w1w=jnp.asarray(w1w, bf16), b1l=jnp.asarray(b1l),
        w2w=jnp.asarray(w2w, bf16), b2l=jnp.asarray(b2l),
        wf1=jnp.asarray(wf1w, bf16), bf1=jnp.asarray(bf1),
        wf2=jnp.asarray(wf2, bf16), bf2=jnp.asarray(bf2),
        wl1=jnp.asarray(wl1, bf16), bl1=jnp.asarray(bl1),
        wl2=jnp.asarray(wl2, bf16), bl2=jnp.asarray(bl2),
        wl3=jnp.asarray(wl3, bf16), bl3=jnp.asarray(bl3))
    return packed


# --------------------------- pure-numpy reference ----------------------------- #

def _reference_forward(params, x_nchw):
    x = np.asarray(x_nchw, np.float32)

    def conv(a, w, b):                     # a [B,Ci,H,W], w [Co,Ci,5,5]
        B, Ci, H, W = a.shape
        Ho, Wo = H - 4, W - 4
        out = np.zeros((B, w.shape[0], Ho, Wo), np.float32)
        for ki in range(5):
            for kj in range(5):
                out += np.einsum("bchw,oc->bohw",
                                 a[:, :, ki:ki + Ho, kj:kj + Wo], w[:, :, ki, kj])
        return out + np.asarray(b, np.float32)[None, :, None, None]

    def pool(a):
        B, C, H, W = a.shape
        return a.reshape(B, C, H // 2, 2, W // 2, 2).max(axis=(3, 5))

    g = lambda k: np.asarray(params[k], np.float32)
    a = pool(np.maximum(conv(x, g("conv1_w"), g("conv1_b")), 0.0))
    a = pool(np.maximum(conv(a, g("conv2_w"), g("conv2_b")), 0.0))
    flat = a.reshape(a.shape[0], -1)
    h = np.maximum(flat @ g("fc1_w").T + g("fc1_b"), 0.0)
    h = np.maximum(h @ g("fc2_w").T + g("fc2_b"), 0.0)
    z = np.maximum(h @ g("l1_w").T + g("l1_b"), 0.0)
    xp = z @ g("l2_w").T + g("l2_b")
    y = xp @ g("l3_w").T + g("l3_b")
    return y, xp


# ----------------------------------- main ------------------------------------ #

if __name__ == "__main__":
    out_dim, n_classes = 256, 10
    key = jax.random.PRNGKey(0)
    pkey, xkey = jax.random.split(key)

    torch_params = init_params(pkey, out_dim=out_dim, n_classes=n_classes)
    kweights = prepare_params(torch_params, out_dim=out_dim, n_classes=n_classes)

    # The module's two conv+pool stages require 3x32x32 inputs (16*5*5 flatten).
    x = jax.random.normal(xkey, (2, 3, 32, 32), jnp.float32)

    y, proj = model_fedcon_forward(kweights, x, out_dim, n_classes)
    jax.block_until_ready((y, proj))
    assert y.shape == (2, n_classes), y.shape
    assert proj.shape == (2, out_dim), proj.shape

    y_ref, proj_ref = _reference_forward(torch_params, x)
    np.testing.assert_allclose(np.asarray(y), y_ref, rtol=5e-2, atol=3e-2)
    np.testing.assert_allclose(np.asarray(proj), proj_ref, rtol=5e-2, atol=3e-2)
    print("KERNEL_OK")
</pallas_src>

<mosaic_0001>
module attributes {stable_mosaic.version = 11 : i64} {
  func.func @_fedcon_kernel(%arg0: i32, %arg1: memref<8x32x128xf32, #tpu.memory_space<vmem>>, %arg2: memref<640x256xbf16, #tpu.memory_space<vmem>>, %arg3: memref<1x1x256xf32, #tpu.memory_space<vmem>>, %arg4: memref<640x256xbf16, #tpu.memory_space<vmem>>, %arg5: memref<1x1x256xf32, #tpu.memory_space<vmem>>, %arg6: memref<640x128xbf16, #tpu.memory_space<vmem>>, %arg7: memref<1x128xf32, #tpu.memory_space<vmem>>, %arg8: memref<128x128xbf16, #tpu.memory_space<vmem>>, %arg9: memref<1x128xf32, #tpu.memory_space<vmem>>, %arg10: memref<128x128xbf16, #tpu.memory_space<vmem>>, %arg11: memref<1x128xf32, #tpu.memory_space<vmem>>, %arg12: memref<128x256xbf16, #tpu.memory_space<vmem>>, %arg13: memref<1x256xf32, #tpu.memory_space<vmem>>, %arg14: memref<256x128xbf16, #tpu.memory_space<vmem>>, %arg15: memref<1x128xf32, #tpu.memory_space<vmem>>, %arg16: memref<8x128xf32, #tpu.memory_space<vmem>>, %arg17: memref<8x256xf32, #tpu.memory_space<vmem>>, %arg18: memref<8x32x640xbf16, #tpu.memory_space<vmem>>, %arg19: memref<8x16x640xbf16, #tpu.memory_space<vmem>>, %arg20: memref<8x640xbf16, #tpu.memory_space<vmem>>, %arg21: memref<8x28x128xf32, #tpu.memory_space<vmem>>, %arg22: memref<8x14x128xf32, #tpu.memory_space<vmem>>, %arg23: memref<8x10x128xf32, #tpu.memory_space<vmem>>) attributes {dimension_semantics = [#tpu.dimension_semantics<parallel>], iteration_bounds = array<i64: 1>, scalar_prefetch = 0 : i64, scratch_operands = 6 : i64, tpu.core_type = #tpu.core_type<tc>, window_params = [{transform_indices = @transform_0, window_bounds = array<i64: 8, 32, 128>}, {pipeline_mode = #tpu.pipeline_mode<synchronous>, transform_indices = @transform_1, window_bounds = array<i64: 640, 256>}, {pipeline_mode = #tpu.pipeline_mode<synchronous>, transform_indices = @transform_2, window_bounds = array<i64: 1, 1, 256>}, {pipeline_mode = #tpu.pipeline_mode<synchronous>, transform_indices = @transform_3, window_bounds = array<i64: 640, 256>}, {pipeline_mode = #tpu.pipeline_mode<synchronous>, transform_indices = @transform_4, window_bounds = array<i64: 1, 1, 256>}, {pipeline_mode = #tpu.pipeline_mode<synchronous>, transform_indices = @transform_5, window_bounds = array<i64: 640, 128>}, {pipeline_mode = #tpu.pipeline_mode<synchronous>, transform_indices = @transform_6, window_bounds = array<i64: 1, 128>}, {pipeline_mode = #tpu.pipeline_mode<synchronous>, transform_indices = @transform_7, window_bounds = array<i64: 128, 128>}, {pipeline_mode = #tpu.pipeline_mode<synchronous>, transform_indices = @transform_8, window_bounds = array<i64: 1, 128>}, {pipeline_mode = #tpu.pipeline_mode<synchronous>, transform_indices = @transform_9, window_bounds = array<i64: 128, 128>}, {pipeline_mode = #tpu.pipeline_mode<synchronous>, transform_indices = @transform_10, window_bounds = array<i64: 1, 128>}, {pipeline_mode = #tpu.pipeline_mode<synchronous>, transform_indices = @transform_11, window_bounds = array<i64: 128, 256>}, {pipeline_mode = #tpu.pipeline_mode<synchronous>, transform_indices = @transform_12, window_bounds = array<i64: 1, 256>}, {pipeline_mode = #tpu.pipeline_mode<synchronous>, transform_indices = @transform_13, window_bounds = array<i64: 256, 128>}, {pipeline_mode = #tpu.pipeline_mode<synchronous>, transform_indices = @transform_14, window_bounds = array<i64: 1, 128>}, {transform_indices = @transform_15, window_bounds = array<i64: 8, 128>}, {transform_indices = @transform_16, window_bounds = array<i64: 8, 256>}]} {
    %c0_i32 = arith.constant 0 : i32
    %0 = arith.cmpi eq, %arg0, %c0_i32 : i32
    %1 = arith.extui %0 : i1 to i32
    %c0_i32_0 = arith.constant 0 : i32
    %2 = arith.cmpi ne, %1, %c0_i32_0 : i32
    scf.if %2 {
      %cst_254 = arith.constant 0.000000e+00 : bf16
      %248 = vector.broadcast %cst_254 : bf16 to vector<8x4x640xbf16>
      %c0_255 = arith.constant 0 : index
      %c28 = arith.constant 28 : index
      %c0_256 = arith.constant 0 : index
      %249 = vector.load %arg18[%c0_255, %c28, %c0_256] : memref<8x32x640xbf16, #tpu.memory_space<vmem>>, vector<8x4x640xbf16>
      tpu.vector_store %arg18[%c0_255, %c28, %c0_256], %248 {strides = array<i32>} : memref<8x32x640xbf16, #tpu.memory_space<vmem>>, vector<8x4x640xbf16>,
      %cst_257 = arith.constant 0.000000e+00 : bf16
      %250 = vector.broadcast %cst_257 : bf16 to vector<8x6x640xbf16>
      %c0_258 = arith.constant 0 : index
      %c10_259 = arith.constant 10 : index
      %c0_260 = arith.constant 0 : index
      %251 = vector.load %arg19[%c0_258, %c10_259, %c0_260] : memref<8x16x640xbf16, #tpu.memory_space<vmem>>, vector<8x6x640xbf16>
      tpu.vector_store %arg19[%c0_258, %c10_259, %c0_260], %250 {strides = array<i32>} : memref<8x16x640xbf16, #tpu.memory_space<vmem>>, vector<8x6x640xbf16>,
    } else {
    }
    %c0 = arith.constant 0 : index
    %c0_1 = arith.constant 0 : index
    %c0_2 = arith.constant 0 : index
    %3 = vector.load %arg1[%c0, %c0_1, %c0_2] : memref<8x32x128xf32, #tpu.memory_space<vmem>>, vector<8x28x128xf32>
    %4 = arith.truncf %3 : vector<8x28x128xf32> to vector<8x28x128xbf16>
    %c0_3 = arith.constant 0 : index
    %c0_4 = arith.constant 0 : index
    %c0_5 = arith.constant 0 : index
    %5 = vector.load %arg18[%c0_3, %c0_4, %c0_5] : memref<8x32x640xbf16, #tpu.memory_space<vmem>>, vector<8x28x128xbf16>
    tpu.vector_store %arg18[%c0_3, %c0_4, %c0_5], %4 {strides = array<i32>} : memref<8x32x640xbf16, #tpu.memory_space<vmem>>, vector<8x28x128xbf16>,
    %c0_6 = arith.constant 0 : index
    %c1 = arith.constant 1 : index
    %c0_7 = arith.constant 0 : index
    %6 = vector.load %arg1[%c0_6, %c1, %c0_7] : memref<8x32x128xf32, #tpu.memory_space<vmem>>, vector<8x28x128xf32>
    %7 = arith.truncf %6 : vector<8x28x128xf32> to vector<8x28x128xbf16>
    %c0_8 = arith.constant 0 : index
    %c0_9 = arith.constant 0 : index
    %c128 = arith.constant 128 : index
    %8 = vector.load %arg18[%c0_8, %c0_9, %c128] : memref<8x32x640xbf16, #tpu.memory_space<vmem>>, vector<8x28x128xbf16>
    tpu.vector_store %arg18[%c0_8, %c0_9, %c128], %7 {strides = array<i32>} : memref<8x32x640xbf16, #tpu.memory_space<vmem>>, vector<8x28x128xbf16>,
    %c0_10 = arith.constant 0 : index
    %c2 = arith.constant 2 : index
    %c0_11 = arith.constant 0 : index
    %9 = vector.load %arg1[%c0_10, %c2, %c0_11] : memref<8x32x128xf32, #tpu.memory_space<vmem>>, vector<8x28x128xf32>
    %10 = arith.truncf %9 : vector<8x28x128xf32> to vector<8x28x128xbf16>
    %c0_12 = arith.constant 0 : index
    %c0_13 = arith.constant 0 : index
    %c256 = arith.constant 256 : index
    %11 = vector.load %arg18[%c0_12, %c0_13, %c256] : memref<8x32x640xbf16, #tpu.memory_space<vmem>>, vector<8x28x128xbf16>
    tpu.vector_store %arg18[%c0_12, %c0_13, %c256], %10 {strides = array<i32>} : memref<8x32x640xbf16, #tpu.memory_space<vmem>>, vector<8x28x128xbf16>,
    %c0_14 = arith.constant 0 : index
    %c3 = arith.constant 3 : index
    %c0_15 = arith.constant 0 : index
    %12 = vector.load %arg1[%c0_14, %c3, %c0_15] : memref<8x32x128xf32, #tpu.memory_space<vmem>>, vector<8x28x128xf32>
    %13 = arith.truncf %12 : vector<8x28x128xf32> to vector<8x28x128xbf16>
    %c0_16 = arith.constant 0 : index
    %c0_17 = arith.constant 0 : index
    %c384 = arith.constant 384 : index
    %14 = vector.load %arg18[%c0_16, %c0_17, %c384] : memref<8x32x640xbf16, #tpu.memory_space<vmem>>, vector<8x28x128xbf16>
    tpu.vector_store %arg18[%c0_16, %c0_17, %c384], %13 {strides = array<i32>} : memref<8x32x640xbf16, #tpu.memory_space<vmem>>, vector<8x28x128xbf16>,
    %c0_18 = arith.constant 0 : index
    %c4 = arith.constant 4 : index
    %c0_19 = arith.constant 0 : index
    %15 = vector.load %arg1[%c0_18, %c4, %c0_19] : memref<8x32x128xf32, #tpu.memory_space<vmem>>, vector<8x28x128xf32>
    %16 = arith.truncf %15 : vector<8x28x128xf32> to vector<8x28x128xbf16>
    %c0_20 = arith.constant 0 : index
    %c0_21 = arith.constant 0 : index
    %c512 = arith.constant 512 : index
    %17 = vector.load %arg18[%c0_20, %c0_21, %c512] : memref<8x32x640xbf16, #tpu.memory_space<vmem>>, vector<8x28x128xbf16>
    tpu.vector_store %arg18[%c0_20, %c0_21, %c512], %16 {strides = array<i32>} : memref<8x32x640xbf16, #tpu.memory_space<vmem>>, vector<8x28x128xbf16>,
    %c0_22 = arith.constant 0 : index
    %c0_23 = arith.constant 0 : index
    %c0_24 = arith.constant 0 : index
    %18 = vector.load %arg18[%c0_22, %c0_23, %c0_24] : memref<8x32x640xbf16, #tpu.memory_space<vmem>>, vector<8x32x640xbf16>
    %19 = vector.shape_cast %18 : vector<8x32x640xbf16> to vector<256x640xbf16>
    %c0_25 = arith.constant 0 : index
    %c0_26 = arith.constant 0 : index
    %20 = vector.load %arg2[%c0_25, %c0_26] : memref<640x256xbf16, #tpu.memory_space<vmem>>, vector<640x256xbf16>
    %cst = arith.constant dense<0.000000e+00> : vector<256x256xf32>
    %21 = tpu.matmul %19, %20, %cst {dimension_numbers = #tpu.dot_dimension_numbers<[1], [0], [0], [1], [0, 0, 1, 1], [], []>} : vector<256x640xbf16>, vector<640x256xbf16>, vector<256x256xf32> -> vector<256x256xf32>
    %22 = vector.shape_cast %21 : vector<256x256xf32> to vector<8x32x256xf32>
    %23 = vector.extract_strided_slice %22 {offsets = [0, 0, 0], sizes = [8, 28, 256], strides = [1, 1, 1]} : vector<8x32x256xf32> to vector<8x28x256xf32>
    %c0_27 = arith.constant 0 : index
    %c0_28 = arith.constant 0 : index
    %c0_29 = arith.constant 0 : index
    %24 = vector.load %arg3[%c0_27, %c0_28, %c0_29] : memref<1x1x256xf32, #tpu.memory_space<vmem>>, vector<1x1x256xf32>
    %25 = vector.broadcast %24 : vector<1x1x256xf32> to vector<8x28x256xf32>
    %26 = arith.addf %23, %25 : vector<8x28x256xf32>
    %cst_30 = arith.constant 0.000000e+00 : f32
    %27 = vector.broadcast %cst_30 : f32 to vector<8x28x256xf32>
    %28 = arith.maximumf %26, %27 : vector<8x28x256xf32>
    %29 = vector.extract_strided_slice %28 {offsets = [0, 0, 0], sizes = [8, 28, 128], strides = [1, 1, 1]} : vector<8x28x256xf32> to vector<8x28x128xf32>
    %30 = vector.extract_strided_slice %28 {offsets = [0, 0, 128], sizes = [8, 28, 128], strides = [1, 1, 1]} : vector<8x28x256xf32> to vector<8x28x128xf32>
    %31 = arith.maximumf %29, %30 : vector<8x28x128xf32>
    %c0_31 = arith.constant 0 : index
    %c0_32 = arith.constant 0 : index
    %c0_33 = arith.constant 0 : index
    %32 = vector.load %arg21[%c0_31, %c0_32, %c0_33] : memref<8x28x128xf32, #tpu.memory_space<vmem>>, vector<8x28x128xf32>
    tpu.vector_store %arg21[%c0_31, %c0_32, %c0_33], %31 {strides = array<i32>} : memref<8x28x128xf32, #tpu.memory_space<vmem>>, vector<8x28x128xf32>,
    %c0_34 = arith.constant 0 : index
    %c0_35 = arith.constant 0 : index
    %c0_36 = arith.constant 0 : index
    %33 = vector.load %arg21[%c0_34, %c0_35, %c0_36] : memref<8x28x128xf32, #tpu.memory_space<vmem>>, vector<8x1x128xf32>
    %34 = vector.shape_cast %33 : vector<8x1x128xf32> to vector<8x128xf32>
    %c0_37 = arith.constant 0 : index
    %c1_38 = arith.constant 1 : index
    %c0_39 = arith.constant 0 : index
    %35 = vector.load %arg21[%c0_37, %c1_38, %c0_39] : memref<8x28x128xf32, #tpu.memory_space<vmem>>, vector<8x1x128xf32>
    %36 = vector.shape_cast %35 : vector<8x1x128xf32> to vector<8x128xf32>
    %37 = arith.maximumf %34, %36 : vector<8x128xf32>
    %c0_40 = arith.constant 0 : index
    %c0_41 = arith.constant 0 : index
    %c0_42 = arith.constant 0 : index
    %38 = vector.load %arg22[%c0_40, %c0_41, %c0_42] : memref<8x14x128xf32, #tpu.memory_space<vmem>>, vector<8x1x128xf32>
    %39 = vector.shape_cast %38 : vector<8x1x128xf32> to vector<8x128xf32>
    %40 = vector.shape_cast %37 : vector<8x128xf32> to vector<8x1x128xf32>
    tpu.vector_store %arg22[%c0_40, %c0_41, %c0_42], %40 {strides = array<i32>} : memref<8x14x128xf32, #tpu.memory_space<vmem>>, vector<8x1x128xf32>,
    %c0_43 = arith.constant 0 : index
    %c2_44 = arith.constant 2 : index
    %c0_45 = arith.constant 0 : index
    %41 = vector.load %arg21[%c0_43, %c2_44, %c0_45] : memref<8x28x128xf32, #tpu.memory_space<vmem>>, vector<8x1x128xf32>
    %42 = vector.shape_cast %41 : vector<8x1x128xf32> to vector<8x128xf32>
    %c0_46 = arith.constant 0 : index
    %c3_47 = arith.constant 3 : index
    %c0_48 = arith.constant 0 : index
    %43 = vector.load %arg21[%c0_46, %c3_47, %c0_48] : memref<8x28x128xf32, #tpu.memory_space<vmem>>, vector<8x1x128xf32>
    %44 = vector.shape_cast %43 : vector<8x1x128xf32> to vector<8x128xf32>
    %45 = arith.maximumf %42, %44 : vector<8x128xf32>
    %c0_49 = arith.constant 0 : index
    %c1_50 = arith.constant 1 : index
    %c0_51 = arith.constant 0 : index
    %46 = vector.load %arg22[%c0_49, %c1_50, %c0_51] : memref<8x14x128xf32, #tpu.memory_space<vmem>>, vector<8x1x128xf32>
    %47 = vector.shape_cast %46 : vector<8x1x128xf32> to vector<8x128xf32>
    %48 = vector.shape_cast %45 : vector<8x128xf32> to vector<8x1x128xf32>
    tpu.vector_store %arg22[%c0_49, %c1_50, %c0_51], %48 {strides = array<i32>} : memref<8x14x128xf32, #tpu.memory_space<vmem>>, vector<8x1x128xf32>,
    %c0_52 = arith.constant 0 : index
    %c4_53 = arith.constant 4 : index
    %c0_54 = arith.constant 0 : index
    %49 = vector.load %arg21[%c0_52, %c4_53, %c0_54] : memref<8x28x128xf32, #tpu.memory_space<vmem>>, vector<8x1x128xf32>
    %50 = vector.shape_cast %49 : vector<8x1x128xf32> to vector<8x128xf32>
    %c0_55 = arith.constant 0 : index
    %c5 = arith.constant 5 : index
    %c0_56 = arith.constant 0 : index
    %51 = vector.load %arg21[%c0_55, %c5, %c0_56] : memref<8x28x128xf32, #tpu.memory_space<vmem>>, vector<8x1x128xf32>
    %52 = vector.shape_cast %51 : vector<8x1x128xf32> to vector<8x128xf32>
    %53 = arith.maximumf %50, %52 : vector<8x128xf32>
    %c0_57 = arith.constant 0 : index
    %c2_58 = arith.constant 2 : index
    %c0_59 = arith.constant 0 : index
    %54 = vector.load %arg22[%c0_57, %c2_58, %c0_59] : memref<8x14x128xf32, #tpu.memory_space<vmem>>, vector<8x1x128xf32>
    %55 = vector.shape_cast %54 : vector<8x1x128xf32> to vector<8x128xf32>
    %56 = vector.shape_cast %53 : vector<8x128xf32> to vector<8x1x128xf32>
    tpu.vector_store %arg22[%c0_57, %c2_58, %c0_59], %56 {strides = array<i32>} : memref<8x14x128xf32, #tpu.memory_space<vmem>>, vector<8x1x128xf32>,
    %c0_60 = arith.constant 0 : index
    %c6 = arith.constant 6 : index
    %c0_61 = arith.constant 0 : index
    %57 = vector.load %arg21[%c0_60, %c6, %c0_61] : memref<8x28x128xf32, #tpu.memory_space<vmem>>, vector<8x1x128xf32>
    %58 = vector.shape_cast %57 : vector<8x1x128xf32> to vector<8x128xf32>
    %c0_62 = arith.constant 0 : index
    %c7 = arith.constant 7 : index
    %c0_63 = arith.constant 0 : index
    %59 = vector.load %arg21[%c0_62, %c7, %c0_63] : memref<8x28x128xf32, #tpu.memory_space<vmem>>, vector<8x1x128xf32>
    %60 = vector.shape_cast %59 : vector<8x1x128xf32> to vector<8x128xf32>
    %61 = arith.maximumf %58, %60 : vector<8x128xf32>
    %c0_64 = arith.constant 0 : index
    %c3_65 = arith.constant 3 : index
    %c0_66 = arith.constant 0 : index
    %62 = vector.load %arg22[%c0_64, %c3_65, %c0_66] : memref<8x14x128xf32, #tpu.memory_space<vmem>>, vector<8x1x128xf32>
    %63 = vector.shape_cast %62 : vector<8x1x128xf32> to vector<8x128xf32>
    %64 = vector.shape_cast %61 : vector<8x128xf32> to vector<8x1x128xf32>
    tpu.vector_store %arg22[%c0_64, %c3_65, %c0_66], %64 {strides = array<i32>} : memref<8x14x128xf32, #tpu.memory_space<vmem>>, vector<8x1x128xf32>,
    %c0_67 = arith.constant 0 : index
    %c8 = arith.constant 8 : index
    %c0_68 = arith.constant 0 : index
    %65 = vector.load %arg21[%c0_67, %c8, %c0_68] : memref<8x28x128xf32, #tpu.memory_space<vmem>>, vector<8x1x128xf32>
    %66 = vector.shape_cast %65 : vector<8x1x128xf32> to vector<8x128xf32>
    %c0_69 = arith.constant 0 : index
    %c9 = arith.constant 9 : index
    %c0_70 = arith.constant 0 : index
    %67 = vector.load %arg21[%c0_69, %c9, %c0_70] : memref<8x28x128xf32, #tpu.memory_space<vmem>>, vector<8x1x128xf32>
    %68 = vector.shape_cast %67 : vector<8x1x128xf32> to vector<8x128xf32>
    %69 = arith.maximumf %66, %68 : vector<8x128xf32>
    %c0_71 = arith.constant 0 : index
    %c4_72 = arith.constant 4 : index
    %c0_73 = arith.constant 0 : index
    %70 = vector.load %arg22[%c0_71, %c4_72, %c0_73] : memref<8x14x128xf32, #tpu.memory_space<vmem>>, vector<8x1x128xf32>
    %71 = vector.shape_cast %70 : vector<8x1x128xf32> to vector<8x128xf32>
    %72 = vector.shape_cast %69 : vector<8x128xf32> to vector<8x1x128xf32>
    tpu.vector_store %arg22[%c0_71, %c4_72, %c0_73], %72 {strides = array<i32>} : memref<8x14x128xf32, #tpu.memory_space<vmem>>, vector<8x1x128xf32>,
    %c0_74 = arith.constant 0 : index
    %c10 = arith.constant 10 : index
    %c0_75 = arith.constant 0 : index
    %73 = vector.load %arg21[%c0_74, %c10, %c0_75] : memref<8x28x128xf32, #tpu.memory_space<vmem>>, vector<8x1x128xf32>
    %74 = vector.shape_cast %73 : vector<8x1x128xf32> to vector<8x128xf32>
    %c0_76 = arith.constant 0 : index
    %c11 = arith.constant 11 : index
    %c0_77 = arith.constant 0 : index
    %75 = vector.load %arg21[%c0_76, %c11, %c0_77] : memref<8x28x128xf32, #tpu.memory_space<vmem>>, vector<8x1x128xf32>
    %76 = vector.shape_cast %75 : vector<8x1x128xf32> to vector<8x128xf32>
    %77 = arith.maximumf %74, %76 : vector<8x128xf32>
    %c0_78 = arith.constant 0 : index
    %c5_79 = arith.constant 5 : index
    %c0_80 = arith.constant 0 : index
    %78 = vector.load %arg22[%c0_78, %c5_79, %c0_80] : memref<8x14x128xf32, #tpu.memory_space<vmem>>, vector<8x1x128xf32>
    %79 = vector.shape_cast %78 : vector<8x1x128xf32> to vector<8x128xf32>
    %80 = vector.shape_cast %77 : vector<8x128xf32> to vector<8x1x128xf32>
    tpu.vector_store %arg22[%c0_78, %c5_79, %c0_80], %80 {strides = array<i32>} : memref<8x14x128xf32, #tpu.memory_space<vmem>>, vector<8x1x128xf32>,
    %c0_81 = arith.constant 0 : index
    %c12 = arith.constant 12 : index
    %c0_82 = arith.constant 0 : index
    %81 = vector.load %arg21[%c0_81, %c12, %c0_82] : memref<8x28x128xf32, #tpu.memory_space<vmem>>, vector<8x1x128xf32>
    %82 = vector.shape_cast %81 : vector<8x1x128xf32> to vector<8x128xf32>
    %c0_83 = arith.constant 0 : index
    %c13 = arith.constant 13 : index
    %c0_84 = arith.constant 0 : index
    %83 = vector.load %arg21[%c0_83, %c13, %c0_84] : memref<8x28x128xf32, #tpu.memory_space<vmem>>, vector<8x1x128xf32>
    %84 = vector.shape_cast %83 : vector<8x1x128xf32> to vector<8x128xf32>
    %85 = arith.maximumf %82, %84 : vector<8x128xf32>
    %c0_85 = arith.constant 0 : index
    %c6_86 = arith.constant 6 : index
    %c0_87 = arith.constant 0 : index
    %86 = vector.load %arg22[%c0_85, %c6_86, %c0_87] : memref<8x14x128xf32, #tpu.memory_space<vmem>>, vector<8x1x128xf32>
    %87 = vector.shape_cast %86 : vector<8x1x128xf32> to vector<8x128xf32>
    %88 = vector.shape_cast %85 : vector<8x128xf32> to vector<8x1x128xf32>
    tpu.vector_store %arg22[%c0_85, %c6_86, %c0_87], %88 {strides = array<i32>} : memref<8x14x128xf32, #tpu.memory_space<vmem>>, vector<8x1x128xf32>,
    %c0_88 = arith.constant 0 : index
    %c14 = arith.constant 14 : index
    %c0_89 = arith.constant 0 : index
    %89 = vector.load %arg21[%c0_88, %c14, %c0_89] : memref<8x28x128xf32, #tpu.memory_space<vmem>>, vector<8x1x128xf32>
    %90 = vector.shape_cast %89 : vector<8x1x128xf32> to vector<8x128xf32>
    %c0_90 = arith.constant 0 : index
    %c15 = arith.constant 15 : index
    %c0_91 = arith.constant 0 : index
    %91 = vector.load %arg21[%c0_90, %c15, %c0_91] : memref<8x28x128xf32, #tpu.memory_space<vmem>>, vector<8x1x128xf32>
    %92 = vector.shape_cast %91 : vector<8x1x128xf32> to vector<8x128xf32>
    %93 = arith.maximumf %90, %92 : vector<8x128xf32>
    %c0_92 = arith.constant 0 : index
    %c7_93 = arith.constant 7 : index
    %c0_94 = arith.constant 0 : index
    %94 = vector.load %arg22[%c0_92, %c7_93, %c0_94] : memref<8x14x128xf32, #tpu.memory_space<vmem>>, vector<8x1x128xf32>
    %95 = vector.shape_cast %94 : vector<8x1x128xf32> to vector<8x128xf32>
    %96 = vector.shape_cast %93 : vector<8x128xf32> to vector<8x1x128xf32>
    tpu.vector_store %arg22[%c0_92, %c7_93, %c0_94], %96 {strides = array<i32>} : memref<8x14x128xf32, #tpu.memory_space<vmem>>, vector<8x1x128xf32>,
    %c0_95 = arith.constant 0 : index
    %c16 = arith.constant 16 : index
    %c0_96 = arith.constant 0 : index
    %97 = vector.load %arg21[%c0_95, %c16, %c0_96] : memref<8x28x128xf32, #tpu.memory_space<vmem>>, vector<8x1x128xf32>
    %98 = vector.shape_cast %97 : vector<8x1x128xf32> to vector<8x128xf32>
    %c0_97 = arith.constant 0 : index
    %c17 = arith.constant 17 : index
    %c0_98 = arith.constant 0 : index
    %99 = vector.load %arg21[%c0_97, %c17, %c0_98] : memref<8x28x128xf32, #tpu.memory_space<vmem>>, vector<8x1x128xf32>
    %100 = vector.shape_cast %99 : vector<8x1x128xf32> to vector<8x128xf32>
    %101 = arith.maximumf %98, %100 : vector<8x128xf32>
    %c0_99 = arith.constant 0 : index
    %c8_100 = arith.constant 8 : index
    %c0_101 = arith.constant 0 : index
    %102 = vector.load %arg22[%c0_99, %c8_100, %c0_101] : memref<8x14x128xf32, #tpu.memory_space<vmem>>, vector<8x1x128xf32>
    %103 = vector.shape_cast %102 : vector<8x1x128xf32> to vector<8x128xf32>
    %104 = vector.shape_cast %101 : vector<8x128xf32> to vector<8x1x128xf32>
    tpu.vector_store %arg22[%c0_99, %c8_100, %c0_101], %104 {strides = array<i32>} : memref<8x14x128xf32, #tpu.memory_space<vmem>>, vector<8x1x128xf32>,
    %c0_102 = arith.constant 0 : index
    %c18 = arith.constant 18 : index
    %c0_103 = arith.constant 0 : index
    %105 = vector.load %arg21[%c0_102, %c18, %c0_103] : memref<8x28x128xf32, #tpu.memory_space<vmem>>, vector<8x1x128xf32>
    %106 = vector.shape_cast %105 : vector<8x1x128xf32> to vector<8x128xf32>
    %c0_104 = arith.constant 0 : index
    %c19 = arith.constant 19 : index
    %c0_105 = arith.constant 0 : index
    %107 = vector.load %arg21[%c0_104, %c19, %c0_105] : memref<8x28x128xf32, #tpu.memory_space<vmem>>, vector<8x1x128xf32>
    %108 = vector.shape_cast %107 : vector<8x1x128xf32> to vector<8x128xf32>
    %109 = arith.maximumf %106, %108 : vector<8x128xf32>
    %c0_106 = arith.constant 0 : index
    %c9_107 = arith.constant 9 : index
    %c0_108 = arith.constant 0 : index
    %110 = vector.load %arg22[%c0_106, %c9_107, %c0_108] : memref<8x14x128xf32, #tpu.memory_space<vmem>>, vector<8x1x128xf32>
    %111 = vector.shape_cast %110 : vector<8x1x128xf32> to vector<8x128xf32>
    %112 = vector.shape_cast %109 : vector<8x128xf32> to vector<8x1x128xf32>
    tpu.vector_store %arg22[%c0_106, %c9_107, %c0_108], %112 {strides = array<i32>} : memref<8x14x128xf32, #tpu.memory_space<vmem>>, vector<8x1x128xf32>,
    %c0_109 = arith.constant 0 : index
    %c20 = arith.constant 20 : index
    %c0_110 = arith.constant 0 : index
    %113 = vector.load %arg21[%c0_109, %c20, %c0_110] : memref<8x28x128xf32, #tpu.memory_space<vmem>>, vector<8x1x128xf32>
    %114 = vector.shape_cast %113 : vector<8x1x128xf32> to vector<8x128xf32>
    %c0_111 = arith.constant 0 : index
    %c21 = arith.constant 21 : index
    %c0_112 = arith.constant 0 : index
    %115 = vector.load %arg21[%c0_111, %c21, %c0_112] : memref<8x28x128xf32, #tpu.memory_space<vmem>>, vector<8x1x128xf32>
    %116 = vector.shape_cast %115 : vector<8x1x128xf32> to vector<8x128xf32>
    %117 = arith.maximumf %114, %116 : vector<8x128xf32>
    %c0_113 = arith.constant 0 : index
    %c10_114 = arith.constant 10 : index
    %c0_115 = arith.constant 0 : index
    %118 = vector.load %arg22[%c0_113, %c10_114, %c0_115] : memref<8x14x128xf32, #tpu.memory_space<vmem>>, vector<8x1x128xf32>
    %119 = vector.shape_cast %118 : vector<8x1x128xf32> to vector<8x128xf32>
    %120 = vector.shape_cast %117 : vector<8x128xf32> to vector<8x1x128xf32>
    tpu.vector_store %arg22[%c0_113, %c10_114, %c0_115], %120 {strides = array<i32>} : memref<8x14x128xf32, #tpu.memory_space<vmem>>, vector<8x1x128xf32>,
    %c0_116 = arith.constant 0 : index
    %c22 = arith.constant 22 : index
    %c0_117 = arith.constant 0 : index
    %121 = vector.load %arg21[%c0_116, %c22, %c0_117] : memref<8x28x128xf32, #tpu.memory_space<vmem>>, vector<8x1x128xf32>
    %122 = vector.shape_cast %121 : vector<8x1x128xf32> to vector<8x128xf32>
    %c0_118 = arith.constant 0 : index
    %c23 = arith.constant 23 : index
    %c0_119 = arith.constant 0 : index
    %123 = vector.load %arg21[%c0_118, %c23, %c0_119] : memref<8x28x128xf32, #tpu.memory_space<vmem>>, vector<8x1x128xf32>
    %124 = vector.shape_cast %123 : vector<8x1x128xf32> to vector<8x128xf32>
    %125 = arith.maximumf %122, %124 : vector<8x128xf32>
    %c0_120 = arith.constant 0 : index
    %c11_121 = arith.constant 11 : index
    %c0_122 = arith.constant 0 : index
    %126 = vector.load %arg22[%c0_120, %c11_121, %c0_122] : memref<8x14x128xf32, #tpu.memory_space<vmem>>, vector<8x1x128xf32>
    %127 = vector.shape_cast %126 : vector<8x1x128xf32> to vector<8x128xf32>
    %128 = vector.shape_cast %125 : vector<8x128xf32> to vector<8x1x128xf32>
    tpu.vector_store %arg22[%c0_120, %c11_121, %c0_122], %128 {strides = array<i32>} : memref<8x14x128xf32, #tpu.memory_space<vmem>>, vector<8x1x128xf32>,
    %c0_123 = arith.constant 0 : index
    %c24 = arith.constant 24 : index
    %c0_124 = arith.constant 0 : index
    %129 = vector.load %arg21[%c0_123, %c24, %c0_124] : memref<8x28x128xf32, #tpu.memory_space<vmem>>, vector<8x1x128xf32>
    %130 = vector.shape_cast %129 : vector<8x1x128xf32> to vector<8x128xf32>
    %c0_125 = arith.constant 0 : index
    %c25 = arith.constant 25 : index
    %c0_126 = arith.constant 0 : index
    %131 = vector.load %arg21[%c0_125, %c25, %c0_126] : memref<8x28x128xf32, #tpu.memory_space<vmem>>, vector<8x1x128xf32>
    %132 = vector.shape_cast %131 : vector<8x1x128xf32> to vector<8x128xf32>
    %133 = arith.maximumf %130, %132 : vector<8x128xf32>
    %c0_127 = arith.constant 0 : index
    %c12_128 = arith.constant 12 : index
    %c0_129 = arith.constant 0 : index
    %134 = vector.load %arg22[%c0_127, %c12_128, %c0_129] : memref<8x14x128xf32, #tpu.memory_space<vmem>>, vector<8x1x128xf32>
    %135 = vector.shape_cast %134 : vector<8x1x128xf32> to vector<8x128xf32>
    %136 = vector.shape_cast %133 : vector<8x128xf32> to vector<8x1x128xf32>
    tpu.vector_store %arg22[%c0_127, %c12_128, %c0_129], %136 {strides = array<i32>} : memref<8x14x128xf32, #tpu.memory_space<vmem>>, vector<8x1x128xf32>,
    %c0_130 = arith.constant 0 : index
    %c26 = arith.constant 26 : index
    %c0_131 = arith.constant 0 : index
    %137 = vector.load %arg21[%c0_130, %c26, %c0_131] : memref<8x28x128xf32, #tpu.memory_space<vmem>>, vector<8x1x128xf32>
    %138 = vector.shape_cast %137 : vector<8x1x128xf32> to vector<8x128xf32>
    %c0_132 = arith.constant 0 : index
    %c27 = arith.constant 27 : index
    %c0_133 = arith.constant 0 : index
    %139 = vector.load %arg21[%c0_132, %c27, %c0_133] : memref<8x28x128xf32, #tpu.memory_space<vmem>>, vector<8x1x128xf32>
    %140 = vector.shape_cast %139 : vector<8x1x128xf32> to vector<8x128xf32>
    %141 = arith.maximumf %138, %140 : vector<8x128xf32>
    %c0_134 = arith.constant 0 : index
    %c13_135 = arith.constant 13 : index
    %c0_136 = arith.constant 0 : index
    %142 = vector.load %arg22[%c0_134, %c13_135, %c0_136] : memref<8x14x128xf32, #tpu.memory_space<vmem>>, vector<8x1x128xf32>
    %143 = vector.shape_cast %142 : vector<8x1x128xf32> to vector<8x128xf32>
    %144 = vector.shape_cast %141 : vector<8x128xf32> to vector<8x1x128xf32>
    tpu.vector_store %arg22[%c0_134, %c13_135, %c0_136], %144 {strides = array<i32>} : memref<8x14x128xf32, #tpu.memory_space<vmem>>, vector<8x1x128xf32>,
    %c0_137 = arith.constant 0 : index
    %c0_138 = arith.constant 0 : index
    %c0_139 = arith.constant 0 : index
    %145 = vector.load %arg22[%c0_137, %c0_138, %c0_139] : memref<8x14x128xf32, #tpu.memory_space<vmem>>, vector<8x10x128xf32>
    %146 = arith.truncf %145 : vector<8x10x128xf32> to vector<8x10x128xbf16>
    %c0_140 = arith.constant 0 : index
    %c0_141 = arith.constant 0 : index
    %c0_142 = arith.constant 0 : index
    %147 = vector.load %arg19[%c0_140, %c0_141, %c0_142] : memref<8x16x640xbf16, #tpu.memory_space<vmem>>, vector<8x10x128xbf16>
    tpu.vector_store %arg19[%c0_140, %c0_141, %c0_142], %146 {strides = array<i32>} : memref<8x16x640xbf16, #tpu.memory_space<vmem>>, vector<8x10x128xbf16>,
    %c0_143 = arith.constant 0 : index
    %c1_144 = arith.constant 1 : index
    %c0_145 = arith.constant 0 : index
    %148 = vector.load %arg22[%c0_143, %c1_144, %c0_145] : memref<8x14x128xf32, #tpu.memory_space<vmem>>, vector<8x10x128xf32>
    %149 = arith.truncf %148 : vector<8x10x128xf32> to vector<8x10x128xbf16>
    %c0_146 = arith.constant 0 : index
    %c0_147 = arith.constant 0 : index
    %c128_148 = arith.constant 128 : index
    %150 = vector.load %arg19[%c0_146, %c0_147, %c128_148] : memref<8x16x640xbf16, #tpu.memory_space<vmem>>, vector<8x10x128xbf16>
    tpu.vector_store %arg19[%c0_146, %c0_147, %c128_148], %149 {strides = array<i32>} : memref<8x16x640xbf16, #tpu.memory_space<vmem>>, vector<8x10x128xbf16>,
    %c0_149 = arith.constant 0 : index
    %c2_150 = arith.constant 2 : index
    %c0_151 = arith.constant 0 : index
    %151 = vector.load %arg22[%c0_149, %c2_150, %c0_151] : memref<8x14x128xf32, #tpu.memory_space<vmem>>, vector<8x10x128xf32>
    %152 = arith.truncf %151 : vector<8x10x128xf32> to vector<8x10x128xbf16>
    %c0_152 = arith.constant 0 : index
    %c0_153 = arith.constant 0 : index
    %c256_154 = arith.constant 256 : index
    %153 = vector.load %arg19[%c0_152, %c0_153, %c256_154] : memref<8x16x640xbf16, #tpu.memory_space<vmem>>, vector<8x10x128xbf16>
    tpu.vector_store %arg19[%c0_152, %c0_153, %c256_154], %152 {strides = array<i32>} : memref<8x16x640xbf16, #tpu.memory_space<vmem>>, vector<8x10x128xbf16>,
    %c0_155 = arith.constant 0 : index
    %c3_156 = arith.constant 3 : index
    %c0_157 = arith.constant 0 : index
    %154 = vector.load %arg22[%c0_155, %c3_156, %c0_157] : memref<8x14x128xf32, #tpu.memory_space<vmem>>, vector<8x10x128xf32>
    %155 = arith.truncf %154 : vector<8x10x128xf32> to vector<8x10x128xbf16>
    %c0_158 = arith.constant 0 : index
    %c0_159 = arith.constant 0 : index
    %c384_160 = arith.constant 384 : index
    %156 = vector.load %arg19[%c0_158, %c0_159, %c384_160] : memref<8x16x640xbf16, #tpu.memory_space<vmem>>, vector<8x10x128xbf16>
    tpu.vector_store %arg19[%c0_158, %c0_159, %c384_160], %155 {strides = array<i32>} : memref<8x16x640xbf16, #tpu.memory_space<vmem>>, vector<8x10x128xbf16>,
    %c0_161 = arith.constant 0 : index
    %c4_162 = arith.constant 4 : index
    %c0_163 = arith.constant 0 : index
    %157 = vector.load %arg22[%c0_161, %c4_162, %c0_163] : memref<8x14x128xf32, #tpu.memory_space<vmem>>, vector<8x10x128xf32>
    %158 = arith.truncf %157 : vector<8x10x128xf32> to vector<8x10x128xbf16>
    %c0_164 = arith.constant 0 : index
    %c0_165 = arith.constant 0 : index
    %c512_166 = arith.constant 512 : index
    %159 = vector.load %arg19[%c0_164, %c0_165, %c512_166] : memref<8x16x640xbf16, #tpu.memory_space<vmem>>, vector<8x10x128xbf16>
    tpu.vector_store %arg19[%c0_164, %c0_165, %c512_166], %158 {strides = array<i32>} : memref<8x16x640xbf16, #tpu.memory_space<vmem>>, vector<8x10x128xbf16>,
    %c0_167 = arith.constant 0 : index
    %c0_168 = arith.constant 0 : index
    %c0_169 = arith.constant 0 : index
    %160 = vector.load %arg19[%c0_167, %c0_168, %c0_169] : memref<8x16x640xbf16, #tpu.memory_space<vmem>>, vector<8x16x640xbf16>
    %161 = vector.shape_cast %160 : vector<8x16x640xbf16> to vector<128x640xbf16>
    %c0_170 = arith.constant 0 : index
    %c0_171 = arith.constant 0 : index
    %162 = vector.load %arg4[%c0_170, %c0_171] : memref<640x256xbf16, #tpu.memory_space<vmem>>, vector<640x256xbf16>
    %cst_172 = arith.constant dense<0.000000e+00> : vector<128x256xf32>
    %163 = tpu.matmul %161, %162, %cst_172 {dimension_numbers = #tpu.dot_dimension_numbers<[1], [0], [0], [1], [0, 0, 1, 1], [], []>} : vector<128x640xbf16>, vector<640x256xbf16>, vector<128x256xf32> -> vector<128x256xf32>
    %164 = vector.shape_cast %163 : vector<128x256xf32> to vector<8x16x256xf32>
    %165 = vector.extract_strided_slice %164 {offsets = [0, 0, 0], sizes = [8, 10, 256], strides = [1, 1, 1]} : vector<8x16x256xf32> to vector<8x10x256xf32>
    %c0_173 = arith.constant 0 : index
    %c0_174 = arith.constant 0 : index
    %c0_175 = arith.constant 0 : index
    %166 = vector.load %arg5[%c0_173, %c0_174, %c0_175] : memref<1x1x256xf32, #tpu.memory_space<vmem>>, vector<1x1x256xf32>
    %167 = vector.broadcast %166 : vector<1x1x256xf32> to vector<8x10x256xf32>
    %168 = arith.addf %165, %167 : vector<8x10x256xf32>
    %cst_176 = arith.constant 0.000000e+00 : f32
    %169 = vector.broadcast %cst_176 : f32 to vector<8x10x256xf32>
    %170 = arith.maximumf %168, %169 : vector<8x10x256xf32>
    %171 = vector.extract_strided_slice %170 {offsets = [0, 0, 0], sizes = [8, 10, 128], strides = [1, 1, 1]} : vector<8x10x256xf32> to vector<8x10x128xf32>
    %172 = vector.extract_strided_slice %170 {offsets = [0, 0, 128], sizes = [8, 10, 128], strides = [1, 1, 1]} : vector<8x10x256xf32> to vector<8x10x128xf32>
    %173 = arith.maximumf %171, %172 : vector<8x10x128xf32>
    %c0_177 = arith.constant 0 : index
    %c0_178 = arith.constant 0 : index
    %c0_179 = arith.constant 0 : index
    %174 = vector.load %arg23[%c0_177, %c0_178, %c0_179] : memref<8x10x128xf32, #tpu.memory_space<vmem>>, vector<8x10x128xf32>
    tpu.vector_store %arg23[%c0_177, %c0_178, %c0_179], %173 {strides = array<i32>} : memref<8x10x128xf32, #tpu.memory_space<vmem>>, vector<8x10x128xf32>,
    %c0_180 = arith.constant 0 : index
    %c0_181 = arith.constant 0 : index
    %c0_182 = arith.constant 0 : index
    %175 = vector.load %arg23[%c0_180, %c0_181, %c0_182] : memref<8x10x128xf32, #tpu.memory_space<vmem>>, vector<8x1x128xf32>
    %176 = vector.shape_cast %175 : vector<8x1x128xf32> to vector<8x128xf32>
    %c0_183 = arith.constant 0 : index
    %c1_184 = arith.constant 1 : index
    %c0_185 = arith.constant 0 : index
    %177 = vector.load %arg23[%c0_183, %c1_184, %c0_185] : memref<8x10x128xf32, #tpu.memory_space<vmem>>, vector<8x1x128xf32>
    %178 = vector.shape_cast %177 : vector<8x1x128xf32> to vector<8x128xf32>
    %179 = arith.maximumf %176, %178 : vector<8x128xf32>
    %180 = arith.truncf %179 : vector<8x128xf32> to vector<8x128xbf16>
    %c0_186 = arith.constant 0 : index
    %c0_187 = arith.constant 0 : index
    %181 = vector.load %arg20[%c0_186, %c0_187] : memref<8x640xbf16, #tpu.memory_space<vmem>>, vector<8x128xbf16>
    tpu.vector_store %arg20[%c0_186, %c0_187], %180 {strides = array<i32>} : memref<8x640xbf16, #tpu.memory_space<vmem>>, vector<8x128xbf16>,
    %c0_188 = arith.constant 0 : index
    %c2_189 = arith.constant 2 : index
    %c0_190 = arith.constant 0 : index
    %182 = vector.load %arg23[%c0_188, %c2_189, %c0_190] : memref<8x10x128xf32, #tpu.memory_space<vmem>>, vector<8x1x128xf32>
    %183 = vector.shape_cast %182 : vector<8x1x128xf32> to vector<8x128xf32>
    %c0_191 = arith.constant 0 : index
    %c3_192 = arith.constant 3 : index
    %c0_193 = arith.constant 0 : index
    %184 = vector.load %arg23[%c0_191, %c3_192, %c0_193] : memref<8x10x128xf32, #tpu.memory_space<vmem>>, vector<8x1x128xf32>
    %185 = vector.shape_cast %184 : vector<8x1x128xf32> to vector<8x128xf32>
    %186 = arith.maximumf %183, %185 : vector<8x128xf32>
    %187 = arith.truncf %186 : vector<8x128xf32> to vector<8x128xbf16>
    %c0_194 = arith.constant 0 : index
    %c128_195 = arith.constant 128 : index
    %188 = vector.load %arg20[%c0_194, %c128_195] : memref<8x640xbf16, #tpu.memory_space<vmem>>, vector<8x128xbf16>
    tpu.vector_store %arg20[%c0_194, %c128_195], %187 {strides = array<i32>} : memref<8x640xbf16, #tpu.memory_space<vmem>>, vector<8x128xbf16>,
    %c0_196 = arith.constant 0 : index
    %c4_197 = arith.constant 4 : index
    %c0_198 = arith.constant 0 : index
    %189 = vector.load %arg23[%c0_196, %c4_197, %c0_198] : memref<8x10x128xf32, #tpu.memory_space<vmem>>, vector<8x1x128xf32>
    %190 = vector.shape_cast %189 : vector<8x1x128xf32> to vector<8x128xf32>
    %c0_199 = arith.constant 0 : index
    %c5_200 = arith.constant 5 : index
    %c0_201 = arith.constant 0 : index
    %191 = vector.load %arg23[%c0_199, %c5_200, %c0_201] : memref<8x10x128xf32, #tpu.memory_space<vmem>>, vector<8x1x128xf32>
    %192 = vector.shape_cast %191 : vector<8x1x128xf32> to vector<8x128xf32>
    %193 = arith.maximumf %190, %192 : vector<8x128xf32>
    %194 = arith.truncf %193 : vector<8x128xf32> to vector<8x128xbf16>
    %c0_202 = arith.constant 0 : index
    %c256_203 = arith.constant 256 : index
    %195 = vector.load %arg20[%c0_202, %c256_203] : memref<8x640xbf16, #tpu.memory_space<vmem>>, vector<8x128xbf16>
    tpu.vector_store %arg20[%c0_202, %c256_203], %194 {strides = array<i32>} : memref<8x640xbf16, #tpu.memory_space<vmem>>, vector<8x128xbf16>,
    %c0_204 = arith.constant 0 : index
    %c6_205 = arith.constant 6 : index
    %c0_206 = arith.constant 0 : index
    %196 = vector.load %arg23[%c0_204, %c6_205, %c0_206] : memref<8x10x128xf32, #tpu.memory_space<vmem>>, vector<8x1x128xf32>
    %197 = vector.shape_cast %196 : vector<8x1x128xf32> to vector<8x128xf32>
    %c0_207 = arith.constant 0 : index
    %c7_208 = arith.constant 7 : index
    %c0_209 = arith.constant 0 : index
    %198 = vector.load %arg23[%c0_207, %c7_208, %c0_209] : memref<8x10x128xf32, #tpu.memory_space<vmem>>, vector<8x1x128xf32>
    %199 = vector.shape_cast %198 : vector<8x1x128xf32> to vector<8x128xf32>
    %200 = arith.maximumf %197, %199 : vector<8x128xf32>
    %201 = arith.truncf %200 : vector<8x128xf32> to vector<8x128xbf16>
    %c0_210 = arith.constant 0 : index
    %c384_211 = arith.constant 384 : index
    %202 = vector.load %arg20[%c0_210, %c384_211] : memref<8x640xbf16, #tpu.memory_space<vmem>>, vector<8x128xbf16>
    tpu.vector_store %arg20[%c0_210, %c384_211], %201 {strides = array<i32>} : memref<8x640xbf16, #tpu.memory_space<vmem>>, vector<8x128xbf16>,
    %c0_212 = arith.constant 0 : index
    %c8_213 = arith.constant 8 : index
    %c0_214 = arith.constant 0 : index
    %203 = vector.load %arg23[%c0_212, %c8_213, %c0_214] : memref<8x10x128xf32, #tpu.memory_space<vmem>>, vector<8x1x128xf32>
    %204 = vector.shape_cast %203 : vector<8x1x128xf32> to vector<8x128xf32>
    %c0_215 = arith.constant 0 : index
    %c9_216 = arith.constant 9 : index
    %c0_217 = arith.constant 0 : index
    %205 = vector.load %arg23[%c0_215, %c9_216, %c0_217] : memref<8x10x128xf32, #tpu.memory_space<vmem>>, vector<8x1x128xf32>
    %206 = vector.shape_cast %205 : vector<8x1x128xf32> to vector<8x128xf32>
    %207 = arith.maximumf %204, %206 : vector<8x128xf32>
    %208 = arith.truncf %207 : vector<8x128xf32> to vector<8x128xbf16>
    %c0_218 = arith.constant 0 : index
    %c512_219 = arith.constant 512 : index
    %209 = vector.load %arg20[%c0_218, %c512_219] : memref<8x640xbf16, #tpu.memory_space<vmem>>, vector<8x128xbf16>
    tpu.vector_store %arg20[%c0_218, %c512_219], %208 {strides = array<i32>} : memref<8x640xbf16, #tpu.memory_space<vmem>>, vector<8x128xbf16>,
    %c0_220 = arith.constant 0 : index
    %c0_221 = arith.constant 0 : index
    %210 = vector.load %arg20[%c0_220, %c0_221] : memref<8x640xbf16, #tpu.memory_space<vmem>>, vector<8x640xbf16>
    %c0_222 = arith.constant 0 : index
    %c0_223 = arith.constant 0 : index
    %211 = vector.load %arg6[%c0_222, %c0_223] : memref<640x128xbf16, #tpu.memory_space<vmem>>, vector<640x128xbf16>
    %cst_224 = arith.constant dense<0.000000e+00> : vector<8x128xf32>
    %212 = tpu.matmul %210, %211, %cst_224 {dimension_numbers = #tpu.dot_dimension_numbers<[1], [0], [0], [1], [0, 0, 1, 1], [], []>} : vector<8x640xbf16>, vector<640x128xbf16>, vector<8x128xf32> -> vector<8x128xf32>
    %c0_225 = arith.constant 0 : index
    %c0_226 = arith.constant 0 : index
    %213 = vector.load %arg7[%c0_225, %c0_226] : memref<1x128xf32, #tpu.memory_space<vmem>>, vector<1x128xf32>
    %214 = vector.broadcast %213 : vector<1x128xf32> to vector<8x128xf32>
    %215 = arith.addf %212, %214 : vector<8x128xf32>
    %cst_227 = arith.constant 0.000000e+00 : f32
    %216 = vector.broadcast %cst_227 : f32 to vector<8x128xf32>
    %217 = arith.maximumf %215, %216 : vector<8x128xf32>
    %218 = arith.truncf %217 : vector<8x128xf32> to vector<8x128xbf16>
    %c0_228 = arith.constant 0 : index
    %c0_229 = arith.constant 0 : index
    %219 = vector.load %arg8[%c0_228, %c0_229] : memref<128x128xbf16, #tpu.memory_space<vmem>>, vector<128x128xbf16>
    %cst_230 = arith.constant dense<0.000000e+00> : vector<8x128xf32>
    %220 = tpu.matmul %218, %219, %cst_230 {dimension_numbers = #tpu.dot_dimension_numbers<[1], [0], [0], [1], [0, 0, 1, 1], [], []>} : vector<8x128xbf16>, vector<128x128xbf16>, vector<8x128xf32> -> vector<8x128xf32>
    %c0_231 = arith.constant 0 : index
    %c0_232 = arith.constant 0 : index
    %221 = vector.load %arg9[%c0_231, %c0_232] : memref<1x128xf32, #tpu.memory_space<vmem>>, vector<1x128xf32>
    %222 = vector.broadcast %221 : vector<1x128xf32> to vector<8x128xf32>
    %223 = arith.addf %220, %222 : vector<8x128xf32>
    %cst_233 = arith.constant 0.000000e+00 : f32
    %224 = vector.broadcast %cst_233 : f32 to vector<8x128xf32>
    %225 = arith.maximumf %223, %224 : vector<8x128xf32>
    %226 = arith.truncf %225 : vector<8x128xf32> to vector<8x128xbf16>
    %c0_234 = arith.constant 0 : index
    %c0_235 = arith.constant 0 : index
    %227 = vector.load %arg10[%c0_234, %c0_235] : memref<128x128xbf16, #tpu.memory_space<vmem>>, vector<128x128xbf16>
    %cst_236 = arith.constant dense<0.000000e+00> : vector<8x128xf32>
    %228 = tpu.matmul %226, %227, %cst_236 {dimension_numbers = #tpu.dot_dimension_numbers<[1], [0], [0], [1], [0, 0, 1, 1], [], []>} : vector<8x128xbf16>, vector<128x128xbf16>, vector<8x128xf32> -> vector<8x128xf32>
    %c0_237 = arith.constant 0 : index
    %c0_238 = arith.constant 0 : index
    %229 = vector.load %arg11[%c0_237, %c0_238] : memref<1x128xf32, #tpu.memory_space<vmem>>, vector<1x128xf32>
    %230 = vector.broadcast %229 : vector<1x128xf32> to vector<8x128xf32>
    %231 = arith.addf %228, %230 : vector<8x128xf32>
    %cst_239 = arith.constant 0.000000e+00 : f32
    %232 = vector.broadcast %cst_239 : f32 to vector<8x128xf32>
    %233 = arith.maximumf %231, %232 : vector<8x128xf32>
    %234 = arith.truncf %233 : vector<8x128xf32> to vector<8x128xbf16>
    %c0_240 = arith.constant 0 : index
    %c0_241 = arith.constant 0 : index
    %235 = vector.load %arg12[%c0_240, %c0_241] : memref<128x256xbf16, #tpu.memory_space<vmem>>, vector<128x256xbf16>
    %cst_242 = arith.constant dense<0.000000e+00> : vector<8x256xf32>
    %236 = tpu.matmul %234, %235, %cst_242 {dimension_numbers = #tpu.dot_dimension_numbers<[1], [0], [0], [1], [0, 0, 1, 1], [], []>} : vector<8x128xbf16>, vector<128x256xbf16>, vector<8x256xf32> -> vector<8x256xf32>
    %c0_243 = arith.constant 0 : index
    %c0_244 = arith.constant 0 : index
    %237 = vector.load %arg13[%c0_243, %c0_244] : memref<1x256xf32, #tpu.memory_space<vmem>>, vector<1x256xf32>
    %238 = vector.broadcast %237 : vector<1x256xf32> to vector<8x256xf32>
    %239 = arith.addf %236, %238 : vector<8x256xf32>
    %240 = arith.truncf %239 : vector<8x256xf32> to vector<8x256xbf16>
    %c0_245 = arith.constant 0 : index
    %c0_246 = arith.constant 0 : index
    %241 = vector.load %arg14[%c0_245, %c0_246] : memref<256x128xbf16, #tpu.memory_space<vmem>>, vector<256x128xbf16>
    %cst_247 = arith.constant dense<0.000000e+00> : vector<8x128xf32>
    %242 = tpu.matmul %240, %241, %cst_247 {dimension_numbers = #tpu.dot_dimension_numbers<[1], [0], [0], [1], [0, 0, 1, 1], [], []>} : vector<8x256xbf16>, vector<256x128xbf16>, vector<8x128xf32> -> vector<8x128xf32>
    %c0_248 = arith.constant 0 : index
    %c0_249 = arith.constant 0 : index
    %243 = vector.load %arg15[%c0_248, %c0_249] : memref<1x128xf32, #tpu.memory_space<vmem>>, vector<1x128xf32>
    %244 = vector.broadcast %243 : vector<1x128xf32> to vector<8x128xf32>
    %245 = arith.addf %242, %244 : vector<8x128xf32>
    %c0_250 = arith.constant 0 : index
    %c0_251 = arith.constant 0 : index
    %246 = vector.load %arg17[%c0_250, %c0_251] : memref<8x256xf32, #tpu.memory_space<vmem>>, vector<8x256xf32>
    tpu.vector_store %arg17[%c0_250, %c0_251], %239 {strides = array<i32>} : memref<8x256xf32, #tpu.memory_space<vmem>>, vector<8x256xf32>,
    %c0_252 = arith.constant 0 : index
    %c0_253 = arith.constant 0 : index
    %247 = vector.load %arg16[%c0_252, %c0_253] : memref<8x128xf32, #tpu.memory_space<vmem>>, vector<8x128xf32>
    tpu.vector_store %arg16[%c0_252, %c0_253], %245 {strides = array<i32>} : memref<8x128xf32, #tpu.memory_space<vmem>>, vector<8x128xf32>,
    return
  }
  func.func @transform_0(%arg0: i32) -> (i32, i32, i32) {
    %c0_i32 = arith.constant 0 : i32
    %c0_i32_0 = arith.constant 0 : i32
    %c0_i32_1 = arith.constant 0 : i32
    return %arg0, %c0_i32, %c0_i32_0 : i32, i32, i32
  }
  func.func @transform_1(%arg0: i32) -> (i32, i32) {
    %c0_i32 = arith.constant 0 : i32
    %c0_i32_0 = arith.constant 0 : i32
    %c0_i32_1 = arith.constant 0 : i32
    return %c0_i32, %c0_i32_0 : i32, i32
  }
  func.func @transform_2(%arg0: i32) -> (i32, i32, i32) {
    %c0_i32 = arith.constant 0 : i32
    %c0_i32_0 = arith.constant 0 : i32
    %c0_i32_1 = arith.constant 0 : i32
    %c0_i32_2 = arith.constant 0 : i32
    return %c0_i32, %c0_i32_0, %c0_i32_1 : i32, i32, i32
  }
  func.func @transform_3(%arg0: i32) -> (i32, i32) {
    %c0_i32 = arith.constant 0 : i32
    %c0_i32_0 = arith.constant 0 : i32
    %c0_i32_1 = arith.constant 0 : i32
    return %c0_i32, %c0_i32_0 : i32, i32
  }
  func.func @transform_4(%arg0: i32) -> (i32, i32, i32) {
    %c0_i32 = arith.constant 0 : i32
    %c0_i32_0 = arith.constant 0 : i32
    %c0_i32_1 = arith.constant 0 : i32
    %c0_i32_2 = arith.constant 0 : i32
    return %c0_i32, %c0_i32_0, %c0_i32_1 : i32, i32, i32
  }
  func.func @transform_5(%arg0: i32) -> (i32, i32) {
    %c0_i32 = arith.constant 0 : i32
    %c0_i32_0 = arith.constant 0 : i32
    %c0_i32_1 = arith.constant 0 : i32
    return %c0_i32, %c0_i32_0 : i32, i32
  }
  func.func @transform_6(%arg0: i32) -> (i32, i32) {
    %c0_i32 = arith.constant 0 : i32
    %c0_i32_0 = arith.constant 0 : i32
    %c0_i32_1 = arith.constant 0 : i32
    return %c0_i32, %c0_i32_0 : i32, i32
  }
  func.func @transform_7(%arg0: i32) -> (i32, i32) {
    %c0_i32 = arith.constant 0 : i32
    %c0_i32_0 = arith.constant 0 : i32
    %c0_i32_1 = arith.constant 0 : i32
    return %c0_i32, %c0_i32_0 : i32, i32
  }
  func.func @transform_8(%arg0: i32) -> (i32, i32) {
    %c0_i32 = arith.constant 0 : i32
    %c0_i32_0 = arith.constant 0 : i32
    %c0_i32_1 = arith.constant 0 : i32
    return %c0_i32, %c0_i32_0 : i32, i32
  }
  func.func @transform_9(%arg0: i32) -> (i32, i32) {
    %c0_i32 = arith.constant 0 : i32
    %c0_i32_0 = arith.constant 0 : i32
    %c0_i32_1 = arith.constant 0 : i32
    return %c0_i32, %c0_i32_0 : i32, i32
  }
  func.func @transform_10(%arg0: i32) -> (i32, i32) {
    %c0_i32 = arith.constant 0 : i32
    %c0_i32_0 = arith.constant 0 : i32
    %c0_i32_1 = arith.constant 0 : i32
    return %c0_i32, %c0_i32_0 : i32, i32
  }
  func.func @transform_11(%arg0: i32) -> (i32, i32) {
    %c0_i32 = arith.constant 0 : i32
    %c0_i32_0 = arith.constant 0 : i32
    %c0_i32_1 = arith.constant 0 : i32
    return %c0_i32, %c0_i32_0 : i32, i32
  }
  func.func @transform_12(%arg0: i32) -> (i32, i32) {
    %c0_i32 = arith.constant 0 : i32
    %c0_i32_0 = arith.constant 0 : i32
    %c0_i32_1 = arith.constant 0 : i32
    return %c0_i32, %c0_i32_0 : i32, i32
  }
  func.func @transform_13(%arg0: i32) -> (i32, i32) {
    %c0_i32 = arith.constant 0 : i32
    %c0_i32_0 = arith.constant 0 : i32
    %c0_i32_1 = arith.constant 0 : i32
    return %c0_i32, %c0_i32_0 : i32, i32
  }
  func.func @transform_14(%arg0: i32) -> (i32, i32) {
    %c0_i32 = arith.constant 0 : i32
    %c0_i32_0 = arith.constant 0 : i32
    %c0_i32_1 = arith.constant 0 : i32
    return %c0_i32, %c0_i32_0 : i32, i32
  }
  func.func @transform_15(%arg0: i32) -> (i32, i32) {
    %c0_i32 = arith.constant 0 : i32
    %c0_i32_0 = arith.constant 0 : i32
    return %arg0, %c0_i32 : i32, i32
  }
  func.func @transform_16(%arg0: i32) -> (i32, i32) {
    %c0_i32 = arith.constant 0 : i32
    %c0_i32_0 = arith.constant 0 : i32
    return %arg0, %c0_i32 : i32, i32
  }
}

</mosaic_0001>

<bundles_post_ra>
// kernel: model_fedcon_forward.1
= control target key start
LH: loop header
LB: loop body
LE: loop exit
PB: predicated region body
PF: predicated region fallthrough
CT: control target
= control target key end

     0   :  { %s7514_s0 = inlined_call_operand.hbm [shape: f32[8,32,128], index: 0, kind: input, shape index: {}]   ;;  %s7515_s1 = inlined_call_operand.hbm [shape: bf16[640,256], index: 1, kind: input, shape index: {}]   ;;  %s7516_s2 = inlined_call_operand.hbm [shape: f32[1,1,256], index: 2, kind: input, shape index: {}]   ;;  %s7517_s3 = inlined_call_operand.hbm [shape: bf16[640,256], index: 3, kind: input, shape index: {}]   ;;  %s7518_s4 = inlined_call_operand.hbm [shape: f32[1,1,256], index: 4, kind: input, shape index: {}]   ;;  %s7519_s5 = inlined_call_operand.hbm [shape: bf16[640,128], index: 5, kind: input, shape index: {}]   ;;  %s7520_s6 = inlined_call_operand.hbm [shape: f32[1,128], index: 6, kind: input, shape index: {}]   ;;  %s7521_s7 = inlined_call_operand.hbm [shape: bf16[128,128], index: 7, kind: input, shape index: {}]   ;;  %s7522_s8 = inlined_call_operand.hbm [shape: f32[1,128], index: 8, kind: input, shape index: {}]   ;;  %s7523_s9 = inlined_call_operand.hbm [shape: bf16[128,128], index: 9, kind: input, shape index: {}]   ;;  %s7524_s10 = inlined_call_operand.hbm [shape: f32[1,128], index: 10, kind: input, shape index: {}]   ;;  %s7525_s11 = inlined_call_operand.hbm [shape: bf16[128,256], index: 11, kind: input, shape index: {}]   ;;  %s7526_s12 = inlined_call_operand.hbm [shape: f32[1,256], index: 12, kind: input, shape index: {}]   ;;  %s7527_s13 = inlined_call_operand.hbm [shape: bf16[256,128], index: 13, kind: input, shape index: {}]   ;;  %s7528_s14 = inlined_call_operand.hbm [shape: f32[1,128], index: 14, kind: input, shape index: {}]   ;;  %s7529_s15 = inlined_call_operand.hbm [shape: f32[8,128], index: 15, kind: output, shape index: {0}]   ;;  %s7530_s16 = inlined_call_operand.hbm [shape: f32[8,256], index: 16, kind: output, shape index: {1}]  }
   0x1   :  { %7536 = sst [smem:[#allocation45_spill]] %s7514_s0 }
   0x2   :  { %22 = vsyncpa [#allocation9], 0 }
   0x3   :  { %23 = vsyncpa [#allocation12], 0 }
   0x4   :  { %24 = vsyncpa [#allocation15], 0 }
   0x5   :  { %25 = vsyncpa [#allocation18], 0 }
   0x6   :  { %26 = vsyncpa [#allocation21], 0 }
   0x7   :  { %27 = vsyncpa [#allocation24], 0 }
   0x8   :  { %28 = vsyncpa [#allocation27], 0 }
   0x9   :  { %29 = vsyncpa [#allocation30], 0 }
   0xa   :  { %30 = vsyncpa [#allocation10], 0 }
   0xb   :  { %31 = vsyncpa [#allocation34], 0  ;;  %s6480_s21 = smov [#allocation11]   ;;  %s6481_s23 = smov [#allocation14]  }
   0xc   :  { %s49_s22 = sshll.u32 %s6480_s21, 4  ;;  %s71_s24 = sshll.u32 %s6481_s23, 4  ;;  %s50_s22 = int_to_ptr.vmem [resolvable:$true] %s49_s22  ;;  %s6589_s24 = int_to_ptr.vmem [resolvable:$true] %s71_s24 }
   0xd   :  { %s6086_s27 = scalar_lea.hbm %s7515_s1, 10240 }
   0xe   :  { %p6087_p0 = scmp.ne.s32.totalorder %s7515_s1, %s6086_s27  ;;  %p6090_p1 = scmp.lt.u32.totalorder %s6086_s27, %s7515_s1 }
  0x10   :  { %p6092_p2 = pnand %p6090_p1, %p6087_p0 }
  0x12   :  { %6095 = shalt.err (!%p6092_p2)
}
  0x13   :  { %s6096_s17 = scalar_lea.vmem %s50_s22, 10240  ;;  %p6101_p4 = scmp.lt.s32.totalorder %s50_s22, %s50_s22 }
  0x14   :  { %p6097_p3 = scmp.ne.s32.totalorder %s50_s22, %s6096_s17  ;;  %p6102_p5 = scmp.lt.s32.totalorder %s6096_s17, %s6096_s17 }
  0x16   :  { %p6103_p6 = por %p6102_p5, %p6101_p4 }
  0x18   :  { %p6104_p7 = pnand %p6103_p6, %p6097_p3 }
  0x1a   :  { %6107 = shalt.err (!%p6104_p7)
}
  0x1b   :  { %s7532_s18 = smov 128   ;;  %s6483_s19 = smov 8  }
  0x1c   :  { %55 = dma.hbm_to_vmem [thread:$0]  %s7515_s1, 10240, %s50_s22, [#allocation12], %s7532_s18, %s7532_s18, %s6483_s19  }
  0x1d   :  { %s6108_s26 = scalar_lea.hbm %s7517_s3, 10240 }
  0x1e   :  { %p6109_p8 = scmp.ne.s32.totalorder %s7517_s3, %s6108_s26  ;;  %p6112_p9 = scmp.lt.u32.totalorder %s6108_s26, %s7517_s3 }
  0x20   :  { %p6114_p10 = pnand %p6112_p9, %p6109_p8 }
  0x22   :  { %6117 = shalt.err (!%p6114_p10)
}
  0x23   :  { %s6118_s0 = scalar_lea.vmem %s6589_s24, 10240  ;;  %p6123_p12 = scmp.lt.s32.totalorder %s6589_s24, %s6589_s24 }
  0x24   :  { %p6119_p11 = scmp.ne.s32.totalorder %s6589_s24, %s6118_s0  ;;  %p6124_p13 = scmp.lt.s32.totalorder %s6118_s0, %s6118_s0 }
  0x26   :  { %p6125_p0 = por %p6124_p13, %p6123_p12 }
  0x28   :  { %p6126_p1 = pnand %p6125_p0, %p6119_p11 }
  0x2a   :  { %6129 = shalt.err (!%p6126_p1)
}
  0x2b   :  { %77 = dma.hbm_to_vmem [thread:$0]  %s7517_s3, 10240, %s6589_s24, [#allocation15], %s7532_s18, %s7532_s18, %s6483_s19  }
  0x2c   :  { %s6484_s17 = smov [#allocation17]   ;;  %s6130_s25 = scalar_lea.hbm %s7519_s5, 5120 }
  0x2d   :  { %s93_s20 = sshll.u32 %s6484_s17, 4  ;;  %p6131_p2 = scmp.ne.s32.totalorder %s7519_s5, %s6130_s25  ;;  %s94_s20 = int_to_ptr.vmem [resolvable:$true] %s93_s20 }
  0x2e   :  { %p6134_p3 = scmp.lt.u32.totalorder %s6130_s25, %s7519_s5 }
  0x30   :  { %p6136_p4 = pnand %p6134_p3, %p6131_p2 }
  0x32   :  { %6139 = shalt.err (!%p6136_p4)
}
  0x33   :  { %s6140_s30 = scalar_lea.vmem %s94_s20, 5120  ;;  %p6145_p6 = scmp.lt.s32.totalorder %s94_s20, %s94_s20 }
  0x34   :  { %p6141_p5 = scmp.ne.s32.totalorder %s94_s20, %s6140_s30  ;;  %p6146_p7 = scmp.lt.s32.totalorder %s6140_s30, %s6140_s30 }
  0x36   :  { %p6147_p8 = por %p6146_p7, %p6145_p6 }
  0x38   :  { %p6148_p9 = pnand %p6147_p8, %p6141_p5 }
  0x3a   :  { %6151 = shalt.err (!%p6148_p9)
}
  0x3b   :  { %s6485_s3 = smov 64   ;;  %s6486_s24 = smov 4  }
  0x3c   :  { %99 = dma.hbm_to_vmem [thread:$0]  %s7519_s5, 5120, %s94_s20, [#allocation18], %s6485_s3, %s6485_s3, %s6486_s24  }
  0x3d   :  { %s6487_s22 = smov [#allocation20]   ;;  %s6488_s21 = smov [#allocation23]  }
  0x3e   :  { %s115_s17 = sshll.u32 %s6487_s22, 4  ;;  %s137_s23 = sshll.u32 %s6488_s21, 4  ;;  %s116_s17 = int_to_ptr.vmem [resolvable:$true] %s115_s17  ;;  %s138_s23 = int_to_ptr.vmem [resolvable:$true] %s137_s23 }
  0x3f   :  { %s6152_s27 = scalar_lea.hbm %s7521_s7, 1024 }
  0x40   :  { %p6153_p10 = scmp.ne.s32.totalorder %s7521_s7, %s6152_s27  ;;  %p6156_p11 = scmp.lt.u32.totalorder %s6152_s27, %s7521_s7 }
  0x42   :  { %p6158_p12 = pnand %p6156_p11, %p6153_p10 }
  0x44   :  { %6161 = shalt.err (!%p6158_p12)
}
  0x45   :  { %s6162_s5 = scalar_lea.vmem %s116_s17, 1024  ;;  %p6167_p0 = scmp.lt.s32.totalorder %s116_s17, %s116_s17 }
  0x46   :  { %p6163_p13 = scmp.ne.s32.totalorder %s116_s17, %s6162_s5  ;;  %p6168_p1 = scmp.lt.s32.totalorder %s6162_s5, %s6162_s5 }
  0x48   :  { %p6169_p2 = por %p6168_p1, %p6167_p0 }
  0x4a   :  { %p6170_p3 = pnand %p6169_p2, %p6163_p13 }
  0x4c   :  { %6173 = shalt.err (!%p6170_p3)
}
  0x4d   :  { %121 = dma.hbm_to_vmem [thread:$0]  %s7521_s7, 1024, %s116_s17, [#allocation21], %s6485_s3, %s6485_s3, %s6486_s24  }
  0x4e   :  { %s6174_s22 = scalar_lea.hbm %s7523_s9, 1024 }
  0x4f   :  { %p6175_p4 = scmp.ne.s32.totalorder %s7523_s9, %s6174_s22  ;;  %p6178_p5 = scmp.lt.u32.totalorder %s6174_s22, %s7523_s9 }
  0x51   :  { %p6180_p6 = pnand %p6178_p5, %p6175_p4 }
  0x53   :  { %6183 = shalt.err (!%p6180_p6)
}
  0x54   :  { %s6184_s28 = scalar_lea.vmem %s138_s23, 1024  ;;  %p6189_p8 = scmp.lt.s32.totalorder %s138_s23, %s138_s23 }
  0x55   :  { %p6185_p7 = scmp.ne.s32.totalorder %s138_s23, %s6184_s28  ;;  %p6190_p9 = scmp.lt.s32.totalorder %s6184_s28, %s6184_s28 }
  0x57   :  { %p6191_p10 = por %p6190_p9, %p6189_p8 }
  0x59   :  { %p6192_p11 = pnand %p6191_p10, %p6185_p7 }
  0x5b   :  { %6195 = shalt.err (!%p6192_p11)
}
  0x5c   :  { %143 = dma.hbm_to_vmem [thread:$0]  %s7523_s9, 1024, %s138_s23, [#allocation24], %s6485_s3, %s6485_s3, %s6486_s24  }
  0x5d   :  { %s6489_s29 = smov [#allocation26]   ;;  %s6490_s5 = smov [#allocation29]  }
  0x5e   :  { %s159_s30 = sshll.u32 %s6489_s29, 4  ;;  %s181_s20 = sshll.u32 %s6490_s5, 4  ;;  %s160_s30 = int_to_ptr.vmem [resolvable:$true] %s159_s30  ;;  %s182_s20 = int_to_ptr.vmem [resolvable:$true] %s181_s20 }
  0x5f   :  { %s6196_s18 = scalar_lea.hbm %s7525_s11, 2048 }
  0x60   :  { %p6197_p12 = scmp.ne.s32.totalorder %s7525_s11, %s6196_s18  ;;  %p6200_p13 = scmp.lt.u32.totalorder %s6196_s18, %s7525_s11 }
  0x62   :  { %p6202_p0 = pnand %p6200_p13, %p6197_p12 }
  0x64   :  { %6205 = shalt.err (!%p6202_p0)
}
  0x65   :  { %s6206_s9 = scalar_lea.vmem %s160_s30, 2048  ;;  %p6211_p2 = scmp.lt.s32.totalorder %s160_s30, %s160_s30 }
  0x66   :  { %p6207_p1 = scmp.ne.s32.totalorder %s160_s30, %s6206_s9  ;;  %p6212_p3 = scmp.lt.s32.totalorder %s6206_s9, %s6206_s9 }
  0x68   :  { %p6213_p4 = por %p6212_p3, %p6211_p2 }
  0x6a   :  { %p6214_p5 = pnand %p6213_p4, %p6207_p1 }
  0x6c   :  { %6217 = shalt.err (!%p6214_p5)
}
  0x6d   :  { %s7537_s23 = smov 128   ;;  %s6218_s29 = scalar_lea.hbm %s7527_s13, 2048 }
  0x6e   :  { %165 = dma.hbm_to_vmem [thread:$0]  %s7525_s11, 2048, %s160_s30, [#allocation27], %s7537_s23, %s7537_s23, %s6483_s19  }
  0x6f   :  { %p6219_p6 = scmp.ne.s32.totalorder %s7527_s13, %s6218_s29  ;;  %p6222_p7 = scmp.lt.u32.totalorder %s6218_s29, %s7527_s13 }
  0x71   :  { %p6224_p8 = pnand %p6222_p7, %p6219_p6 }
  0x73   :  { %6227 = shalt.err (!%p6224_p8)
}
  0x74   :  { %s6228_s22 = scalar_lea.vmem %s182_s20, 2048  ;;  %p6233_p10 = scmp.lt.s32.totalorder %s182_s20, %s182_s20 }
  0x75   :  { %p6229_p9 = scmp.ne.s32.totalorder %s182_s20, %s6228_s22  ;;  %p6234_p11 = scmp.lt.s32.totalorder %s6228_s22, %s6228_s22 }
  0x77   :  { %p6235_p12 = por %p6234_p11, %p6233_p10 }
  0x79   :  { %p6236_p13 = pnand %p6235_p12, %p6229_p9 }
  0x7b   :  { %6239 = shalt.err (!%p6236_p13)
}
  0x7c   :  { %187 = dma.hbm_to_vmem [thread:$0]  %s7527_s13, 2048, %s182_s20, [#allocation30], %s6485_s3, %s6485_s3, %s6486_s24  }
  0x7d   :  { %s6491_s21 = smov [#allocation8]   ;;  %s6492_s26 = smov [#allocation13]  }
  0x7e   :  { %s37_s25 = sshll.u32 %s6491_s21, 4  ;;  %s62_s9 = sshll.u32 %s6492_s26, 4  ;;  %s38_s25 = int_to_ptr.vmem [resolvable:$true] %s37_s25  ;;  %s63_s9 = int_to_ptr.vmem [resolvable:$true] %s62_s9 }
  0x7f   :  { %s7538_s7 = sld [smem:[#allocation45_spill]] }
  0x85   :  { %s6240_s17 = scalar_lea.hbm %s7538_s7, 4096 }
  0x86   :  { %p6241_p0 = scmp.ne.s32.totalorder %s7538_s7, %s6240_s17  ;;  %p6244_p1 = scmp.lt.u32.totalorder %s6240_s17, %s7538_s7 }
  0x88   :  { %p6246_p2 = pnand %p6244_p1, %p6241_p0 }
  0x8a   :  { %6249 = shalt.err (!%p6246_p2)
}
  0x8b   :  { %s6250_s13 = scalar_lea.vmem %s38_s25, 4096  ;;  %p6255_p4 = scmp.lt.s32.totalorder %s38_s25, %s38_s25 }
  0x8c   :  { %p6251_p3 = scmp.ne.s32.totalorder %s38_s25, %s6250_s13  ;;  %p6256_p5 = scmp.lt.s32.totalorder %s6250_s13, %s6250_s13 }
  0x8e   :  { %p6257_p6 = por %p6256_p5, %p6255_p4 }
  0x90   :  { %p6258_p7 = pnand %p6257_p6, %p6251_p3 }
  0x92   :  { %6261 = shalt.err (!%p6258_p7)
}
  0x93   :  { %43 = dma.hbm_to_vmem [thread:$0]  %s7538_s7, 4096, %s38_s25, [#allocation9], %s7537_s23, %s7537_s23, %s6483_s19  }
  0x94   :  { %s6262_s22 = scalar_lea.hbm %s7516_s2, 32 }
  0x95   :  { %p6263_p8 = scmp.ne.s32.totalorder %s7516_s2, %s6262_s22  ;;  %p6266_p9 = scmp.lt.u32.totalorder %s6262_s22, %s7516_s2 }
  0x97   :  { %p6268_p10 = pnand %p6266_p9, %p6263_p8 }
  0x99   :  { %6271 = shalt.err (!%p6268_p10)
}
  0x9a   :  { %s6272_s27 = scalar_lea.vmem %s63_s9, 32  ;;  %p6277_p12 = scmp.lt.s32.totalorder %s63_s9, %s63_s9 }
  0x9b   :  { %p6273_p11 = scmp.ne.s32.totalorder %s63_s9, %s6272_s27  ;;  %p6278_p13 = scmp.lt.s32.totalorder %s6272_s27, %s6272_s27 }
  0x9d   :  { %p6279_p0 = por %p6278_p13, %p6277_p12 }
  0x9f   :  { %p6280_p1 = pnand %p6279_p0, %p6273_p11 }
  0xa1   :  { %6283 = shalt.err (!%p6280_p1)
}
  0xa2   :  { %65 = dma.hbm_to_vmem [thread:$0]  %s7516_s2, 32, %s63_s9, [#allocation12]  }
  0xa3   :  { %s6493_s25 = smov [#allocation16]   ;;  %s6494_s7 = smov [#allocation19]  }
  0xa4   :  { %s84_s28 = sshll.u32 %s6493_s25, 4  ;;  %s106_s17 = sshll.u32 %s6494_s7, 4  ;;  %s85_s28 = int_to_ptr.vmem [resolvable:$true] %s84_s28  ;;  %s107_s17 = int_to_ptr.vmem [resolvable:$true] %s106_s17 }
  0xa5   :  { %s6284_s0 = scalar_lea.hbm %s7518_s4, 32 }
  0xa6   :  { %p6285_p2 = scmp.ne.s32.totalorder %s7518_s4, %s6284_s0  ;;  %p6288_p3 = scmp.lt.u32.totalorder %s6284_s0, %s7518_s4 }
  0xa8   :  { %p6290_p4 = pnand %p6288_p3, %p6285_p2 }
  0xaa   :  { %6293 = shalt.err (!%p6290_p4)
}
  0xab   :  { %s6294_s2 = scalar_lea.vmem %s85_s28, 32  ;;  %p6299_p6 = scmp.lt.s32.totalorder %s85_s28, %s85_s28 }
  0xac   :  { %p6295_p5 = scmp.ne.s32.totalorder %s85_s28, %s6294_s2  ;;  %p6300_p7 = scmp.lt.s32.totalorder %s6294_s2, %s6294_s2 }
  0xae   :  { %p6301_p8 = por %p6300_p7, %p6299_p6 }
  0xb0   :  { %p6302_p9 = pnand %p6301_p8, %p6295_p5 }
  0xb2   :  { %6305 = shalt.err (!%p6302_p9)
}
  0xb3   :  { %87 = dma.hbm_to_vmem [thread:$0]  %s7518_s4, 32, %s85_s28, [#allocation15]  }
  0xb4   :  { %s6306_s11 = scalar_lea.hbm %s7520_s6, 16 }
  0xb5   :  { %p6307_p10 = scmp.ne.s32.totalorder %s7520_s6, %s6306_s11  ;;  %p6310_p11 = scmp.lt.u32.totalorder %s6306_s11, %s7520_s6 }
  0xb7   :  { %p6312_p12 = pnand %p6310_p11, %p6307_p10 }
  0xb9   :  { %6315 = shalt.err (!%p6312_p12)
}
  0xba   :  { %s6316_s19 = scalar_lea.vmem %s107_s17, 16  ;;  %s6320_s23 = scalar_lea.vmem %s107_s17, 32 }
  0xbb   :  { %p6317_p13 = scmp.ne.s32.totalorder %s107_s17, %s6316_s19  ;;  %p6321_p0 = scmp.lt.s32.totalorder %s107_s17, %s107_s17 }
  0xbc   :  { %p6322_p1 = scmp.lt.s32.totalorder %s6320_s23, %s6316_s19 }
  0xbe   :  { %p6323_p2 = por %p6322_p1, %p6321_p0 }
  0xc0   :  { %p6324_p3 = pnand %p6323_p2, %p6317_p13 }
  0xc2   :  { %6327 = shalt.err (!%p6324_p3)
}
  0xc3   :  { %109 = dma.hbm_to_vmem [thread:$0]  %s7520_s6, 16, %s107_s17, [#allocation18]  }
  0xc4   :  { %s6495_s28 = smov [#allocation22]   ;;  %s6496_s29 = smov [#allocation25]  }
  0xc5   :  { %s128_s7 = sshll.u32 %s6495_s28, 4  ;;  %s150_s5 = sshll.u32 %s6496_s29, 4  ;;  %s129_s7 = int_to_ptr.vmem [resolvable:$true] %s128_s7  ;;  %s151_s5 = int_to_ptr.vmem [resolvable:$true] %s150_s5 }
  0xc6   :  { %s6328_s13 = scalar_lea.hbm %s7522_s8, 16 }
  0xc7   :  { %p6329_p4 = scmp.ne.s32.totalorder %s7522_s8, %s6328_s13  ;;  %p6332_p5 = scmp.lt.u32.totalorder %s6328_s13, %s7522_s8 }
  0xc9   :  { %p6334_p6 = pnand %p6332_p5, %p6329_p4 }
  0xcb   :  { %6337 = shalt.err (!%p6334_p6)
}
  0xcc   :  { %s6338_s6 = scalar_lea.vmem %s129_s7, 16  ;;  %s6342_s17 = scalar_lea.vmem %s129_s7, 32 }
  0xcd   :  { %p6339_p7 = scmp.ne.s32.totalorder %s129_s7, %s6338_s6  ;;  %p6343_p8 = scmp.lt.s32.totalorder %s129_s7, %s129_s7 }
  0xce   :  { %p6344_p9 = scmp.lt.s32.totalorder %s6342_s17, %s6338_s6 }
  0xd0   :  { %p6345_p10 = por %p6344_p9, %p6343_p8 }
  0xd2   :  { %p6346_p11 = pnand %p6345_p10, %p6339_p7 }
  0xd4   :  { %6349 = shalt.err (!%p6346_p11)
}
  0xd5   :  { %131 = dma.hbm_to_vmem [thread:$0]  %s7522_s8, 16, %s129_s7, [#allocation21]  }
  0xd6   :  { %s6350_s30 = scalar_lea.hbm %s7524_s10, 16 }
  0xd7   :  { %p6351_p12 = scmp.ne.s32.totalorder %s7524_s10, %s6350_s30  ;;  %p6354_p13 = scmp.lt.u32.totalorder %s6350_s30, %s7524_s10 }
  0xd9   :  { %p6356_p0 = pnand %p6354_p13, %p6351_p12 }
  0xdb   :  { %6359 = shalt.err (!%p6356_p0)
}
  0xdc   :  { %s6360_s23 = scalar_lea.vmem %s151_s5, 16  ;;  %s6364_s4 = scalar_lea.vmem %s151_s5, 32 }
  0xdd   :  { %p6361_p1 = scmp.ne.s32.totalorder %s151_s5, %s6360_s23  ;;  %p6365_p2 = scmp.lt.s32.totalorder %s151_s5, %s151_s5 }
  0xde   :  { %p6366_p3 = scmp.lt.s32.totalorder %s6364_s4, %s6360_s23 }
  0xe0   :  { %p6367_p4 = por %p6366_p3, %p6365_p2 }
  0xe2   :  { %p6368_p5 = pnand %p6367_p4, %p6361_p1 }
  0xe4   :  { %6371 = shalt.err (!%p6368_p5)
}
  0xe5   :  { %153 = dma.hbm_to_vmem [thread:$0]  %s7524_s10, 16, %s151_s5, [#allocation24]  }
  0xe6   :  { %s6497_s28 = smov [#allocation28]   ;;  %s6498_s29 = smov [#allocation31]  }
  0xe7   :  { %s172_s7 = sshll.u32 %s6497_s28, 4  ;;  %s194_s0 = sshll.u32 %s6498_s29, 4  ;;  %s173_s7 = int_to_ptr.vmem [resolvable:$true] %s172_s7  ;;  %s195_s0 = int_to_ptr.vmem [resolvable:$true] %s194_s0 }
  0xe8   :  { %s6372_s3 = scalar_lea.hbm %s7526_s12, 32 }
  0xe9   :  { %p6373_p6 = scmp.ne.s32.totalorder %s7526_s12, %s6372_s3  ;;  %p6376_p7 = scmp.lt.u32.totalorder %s6372_s3, %s7526_s12 }
  0xeb   :  { %p6378_p8 = pnand %p6376_p7, %p6373_p6 }
  0xed   :  { %6381 = shalt.err (!%p6378_p8)
}
  0xee   :  { %s6382_s10 = scalar_lea.vmem %s173_s7, 32  ;;  %p6387_p10 = scmp.lt.s32.totalorder %s173_s7, %s173_s7 }
  0xef   :  { %p6383_p9 = scmp.ne.s32.totalorder %s173_s7, %s6382_s10  ;;  %p6388_p11 = scmp.lt.s32.totalorder %s6382_s10, %s6382_s10 }
  0xf1   :  { %p6389_p12 = por %p6388_p11, %p6387_p10 }
  0xf3   :  { %p6390_p13 = pnand %p6389_p12, %p6383_p9 }
  0xf5   :  { %6393 = shalt.err (!%p6390_p13)
}
  0xf6   :  { %175 = dma.hbm_to_vmem [thread:$0]  %s7526_s12, 32, %s173_s7, [#allocation27]  }
  0xf7   :  { %s6394_s22 = scalar_lea.hbm %s7528_s14, 16 }
  0xf8   :  { %p6395_p0 = scmp.ne.s32.totalorder %s7528_s14, %s6394_s22  ;;  %p6398_p1 = scmp.lt.u32.totalorder %s6394_s22, %s7528_s14 }
  0xfa   :  { %p6400_p2 = pnand %p6398_p1, %p6395_p0 }
  0xfc   :  { %6403 = shalt.err (!%p6400_p2)
}
  0xfd   :  { %s6404_s27 = scalar_lea.vmem %s195_s0, 16  ;;  %s6408_s19 = scalar_lea.vmem %s195_s0, 32 }
  0xfe   :  { %p6405_p3 = scmp.ne.s32.totalorder %s195_s0, %s6404_s27  ;;  %p6409_p4 = scmp.lt.s32.totalorder %s195_s0, %s195_s0 }
  0xff   :  { %p6410_p5 = scmp.lt.s32.totalorder %s6408_s19, %s6404_s27 }
 0x101   :  { %p6411_p6 = por %p6410_p5, %p6409_p4 }
 0x103   :  { %p6412_p7 = pnand %p6411_p6, %p6405_p3 }
 0x105   :  { %6415 = shalt.err (!%p6412_p7)
}
 0x106   :  { %197 = dma.hbm_to_vmem [thread:$0]  %s7528_s14, 16, %s195_s0, [#allocation30]  }
 0x107   :  { %6460 = dma.done.wait [#allocation9], 4096  }
 0x108   :  { %6461 = vsyncadd [#allocation9], 4294963200 }
 0x109   :  { %6462 = dma.done.wait [#allocation12], 10272  }
 0x10a   :  { %6463 = vsyncadd [#allocation12], 4294957024 }
 0x10b   :  { %6464 = dma.done.wait [#allocation15], 10272  }
 0x10c   :  { %6465 = vsyncadd [#allocation15], 4294957024 }
 0x10d   :  { %6466 = dma.done.wait [#allocation18], 5136  }
 0x10e   :  { %6467 = vsyncadd [#allocation18], 4294962160 }
 0x10f   :  { %6468 = dma.done.wait [#allocation21], 1040  }
 0x110   :  { %6469 = vsyncadd [#allocation21], 4294966256 }
 0x111   :  { %6470 = dma.done.wait [#allocation24], 1040  }
 0x112   :  { %6471 = vsyncadd [#allocation24], 4294966256 }
 0x113   :  { %6472 = dma.done.wait [#allocation27], 2080  }
 0x114   :  { %6473 = vsyncadd [#allocation27], 4294965216 }
 0x115   :  { %6474 = dma.done.wait [#allocation30], 2064  }
 0x116   :  { %6475 = vsyncadd [#allocation30], 4294965232  ;;  %v7534_v0 = vmov 0   ;;  %v5745_v1 = vld [vmem:[#allocation11 + $0x4] ss:$8 sps:$4 sm:$0xff]   ;;  %v394_v22 = vld [vmem:[#allocation8 + $0x11] sm:$0xff] }
 0x117   :  { %249 = vst [vmem:[#allocation2 + $0x30] sm:$0xc0] %v7534_v0  ;;  %248 = vst [vmem:[#allocation2 + $0x28] sm:$0xc0] %v7534_v0  ;;  %v5747_v2 = vld [vmem:[#allocation11] ss:$8 sps:$4 sm:$0xff]   ;;  %1208 = vmatprep.subr.bf16.mxu0 %v5745_v1 }
 0x118   :  { %250 = vst [vmem:[#allocation2 + $0x38] sm:$0xc0] %v7534_v0  ;;  %251 = vst [vmem:[#allocation2 + $0x40] sm:$0xc0] %v7534_v0  ;;  %v5748_v3 = vld [vmem:[#allocation11 + $0x14] ss:$8 sps:$4 sm:$0xff]   ;;  %1209 = vmatpush1.bf16.msra.mxu0 %v5747_v2 }
 0x119   :  { %252 = vst [vmem:[#allocation2 + $0x48] sm:$0xc0] %v7534_v0  ;;  %253 = vst [vmem:[#allocation2 + $0x78] sm:$0xc0] %v7534_v0  ;;  %v5750_v4 = vld [vmem:[#allocation11 + $0x10] ss:$8 sps:$4 sm:$0xff]   ;;  %1210 = vmatprep.subr.bf16.mxu0 %v5748_v3 }
 0x11a   :  { %254 = vst [vmem:[#allocation2 + $0x80] sm:$0xc0] %v7534_v0  ;;  %255 = vst [vmem:[#allocation2 + $0x88] sm:$0xc0] %v7534_v0  ;;  %v5751_v5 = vld [vmem:[#allocation11 + $0x24] ss:$8 sps:$4 sm:$0xff]  }
 0x11b   :  { %256 = vst [vmem:[#allocation2 + $0x90] sm:$0xc0] %v7534_v0  ;;  %257 = vst [vmem:[#allocation2 + $0x98] sm:$0xc0] %v7534_v0  ;;  %v5753_v6 = vld [vmem:[#allocation11 + $0x20] ss:$8 sps:$4 sm:$0xff]  }
 0x11c   :  { %258 = vst [vmem:[#allocation2 + $0xc8] sm:$0xc0] %v7534_v0  ;;  %259 = vst [vmem:[#allocation2 + $0xd0] sm:$0xc0] %v7534_v0  ;;  %1211 = vmatpush1.bf16.msra.mxu0 %v5750_v4  ;;  %v5754_v7 = vld [vmem:[#allocation11 + $0x34] ss:$8 sps:$4 sm:$0xff]  }
 0x11d   :  { %260 = vst [vmem:[#allocation2 + $0xd8] sm:$0xc0] %v7534_v0  ;;  %261 = vst [vmem:[#allocation2 + $0xe0] sm:$0xc0] %v7534_v0  ;;  %1212 = vmatprep.subr.bf16.mxu0 %v5751_v5  ;;  %v5756_v8 = vld [vmem:[#allocation11 + $0x30] ss:$8 sps:$4 sm:$0xff]  }
 0x11e   :  { %262 = vst [vmem:[#allocation2 + $0xe8] sm:$0xc0] %v7534_v0  ;;  %263 = vst [vmem:[#allocation2 + $0x118] sm:$0xc0] %v7534_v0  ;;  %v5757_v9 = vld [vmem:[#allocation11 + $0x44] ss:$8 sps:$4 sm:$0xff]  }
 0x11f   :  { %264 = vst [vmem:[#allocation2 + $0x120] sm:$0xc0] %v7534_v0  ;;  %265 = vst [vmem:[#allocation2 + $0x128] sm:$0xc0] %v7534_v0  ;;  %v5759_v10 = vld [vmem:[#allocation11 + $0x40] ss:$8 sps:$4 sm:$0xff]  }
 0x120   :  { %266 = vst [vmem:[#allocation2 + $0x130] sm:$0xc0] %v7534_v0  ;;  %267 = vst [vmem:[#allocation2 + $0x138] sm:$0xc0] %v7534_v0  ;;  %1213 = vmatpush1.bf16.msra.mxu0 %v5753_v6  ;;  %v5760_v11 = vld [vmem:[#allocation11 + $0x54] ss:$8 sps:$4 sm:$0xff]  }
 0x121   :  { %268 = vst [vmem:[#allocation2 + $0x168] sm:$0xc0] %v7534_v0  ;;  %269 = vst [vmem:[#allocation2 + $0x170] sm:$0xc0] %v7534_v0  ;;  %1214 = vmatprep.subr.bf16.mxu0 %v5754_v7  ;;  %v5762_v12 = vld [vmem:[#allocation11 + $0x50] ss:$8 sps:$4 sm:$0xff]  }
 0x122   :  { %270 = vst [vmem:[#allocation2 + $0x178] sm:$0xc0] %v7534_v0  ;;  %271 = vst [vmem:[#allocation2 + $0x180] sm:$0xc0] %v7534_v0  ;;  %v5763_v13 = vld [vmem:[#allocation11 + $0x64] ss:$8 sps:$4 sm:$0xff]  }
 0x123   :  { %272 = vst [vmem:[#allocation2 + $0x188] sm:$0xc0] %v7534_v0  ;;  %273 = vst [vmem:[#allocation2 + $0x1b8] sm:$0xc0] %v7534_v0  ;;  %v392_v14 = vld [vmem:[#allocation8 + $0x1] sm:$0xff]  ;;  %v393_v15 = vld [vmem:[#allocation8 + $0x9] sm:$0xff] }
 0x124   :  { %274 = vst [vmem:[#allocation2 + $0x1c0] sm:$0xc0] %v7534_v0  ;;  %275 = vst [vmem:[#allocation2 + $0x1c8] sm:$0xc0] %v7534_v0  ;;  %1215 = vmatpush1.bf16.msra.mxu0 %v5756_v8  ;;  %v424_v16 = vpack.c.bf16 %v393_v15, %v392_v14  ;;  %v6880_v17 = vld [vmem:[#allocation8] sm:$0xff]  ;;  %v6882_v18 = vld [vmem:[#allocation8 + $0x8] sm:$0xff] }
 0x125   :  { %276 = vst [vmem:[#allocation2 + $0x1d0] sm:$0xc0] %v7534_v0  ;;  %277 = vst [vmem:[#allocation2 + $0x1d8] sm:$0xc0] %v7534_v0  ;;  %1216 = vmatprep.subr.bf16.mxu0 %v5757_v9  ;;  %v5765_v19 = vld [vmem:[#allocation11 + $0x60] ss:$8 sps:$4 sm:$0xff]   ;;  %v360_v21 = vpack.c.bf16 %v6882_v18, %v6880_v17 }
 0x126   :  { %278 = vst [vmem:[#allocation2 + $0x208] sm:$0xc0] %v7534_v0  ;;  %279 = vst [vmem:[#allocation2 + $0x210] sm:$0xc0] %v7534_v0  ;;  %v5766_v20 = vld [vmem:[#allocation11 + $0x74] ss:$8 sps:$4 sm:$0xff]   ;;  %1240 = vmatprep.mubr.bf16.mxu0 %v424_v16 }
 0x127   :  { %280 = vst [vmem:[#allocation2 + $0x218] sm:$0xc0] %v7534_v0  ;;  %281 = vst [vmem:[#allocation2 + $0x220] sm:$0xc0] %v7534_v0  ;;  %v395_v23 = vld [vmem:[#allocation8 + $0x19] sm:$0xf] }
 0x128   :  { %282 = vst [vmem:[#allocation2 + $0x228] sm:$0xc0] %v7534_v0  ;;  %283 = vst [vmem:[#allocation2 + $0x258] sm:$0xc0] %v7534_v0  ;;  %1217 = vmatpush1.bf16.msra.mxu0 %v5759_v10  ;;  %v330_v24 = vld [vmem:[#allocation8 + $0x10] sm:$0xff]  ;;  %v425_v25 = vpack.c.bf16 %v395_v23, %v394_v22  ;;  %v6886_v29 = vld [vmem:[#allocation8 + $0x21] sm:$0xff] }
 0x129   :  { %284 = vst [vmem:[#allocation2 + $0x260] sm:$0xc0] %v7534_v0  ;;  %285 = vst [vmem:[#allocation2 + $0x268] sm:$0xc0] %v7534_v0  ;;  %1218 = vmatprep.subr.bf16.mxu0 %v5760_v11  ;;  %v331_v26 = vld [vmem:[#allocation8 + $0x18] sm:$0xf] }
 0x12a   :  { %286 = vst [vmem:[#allocation2 + $0x270] sm:$0xc0] %v7534_v0  ;;  %287 = vst [vmem:[#allocation2 + $0x278] sm:$0xc0] %v7534_v0  ;;  %v5768_v27 = vld [vmem:[#allocation11 + $0x70] ss:$8 sps:$4 sm:$0xff]   ;;  %v361_v28 = vpack.c.bf16 %v331_v26, %v330_v24 }
 0x12b   :  { %288 = vst [vmem:[#allocation3] sm:$0xe0] %v7534_v0  ;;  %289 = vst [vmem:[#allocation3 + $0x8] sm:$0xe0] %v7534_v0  ;;  %v6888_v30 = vld [vmem:[#allocation8 + $0x29] sm:$0xff]  ;;  %v6890_v31 = vld [vmem:[#allocation8 + $0x20] sm:$0xff] }
 0x12c   :  { %290 = vst [vmem:[#allocation3 + $0x10] sm:$0xe0] %v7534_v0  ;;  %291 = vst [vmem:[#allocation3 + $0x18] sm:$0xe0] %v7534_v0  ;;  %1219 = vmatpush1.bf16.msra.mxu0 %v5762_v12  ;;  %v6892_v32 = vld [vmem:[#allocation8 + $0x28] sm:$0xff]  ;;  %v426_v34 = vpack.c.bf16 %v6888_v30, %v6886_v29  ;;  %v398_v36 = vld [vmem:[#allocation8 + $0x31] sm:$0xff] }
 0x12d   :  { %292 = vst [vmem:[#allocation3 + $0x20] sm:$0xe0] %v7534_v0  ;;  %293 = vst [vmem:[#allocation3 + $0x28] sm:$0xe0] %v7534_v0  ;;  %1220 = vmatprep.subr.bf16.mxu0 %v5763_v13  ;;  %v5769_v33 = vld [vmem:[#allocation11 + $0x84] ss:$8 sps:$4 sm:$0xff]   ;;  %v362_v35 = vpack.c.bf16 %v6892_v32, %v6890_v31 }
 0x12e   :  { %294 = vst [vmem:[#allocation3 + $0x30] sm:$0xe0] %v7534_v0  ;;  %295 = vst [vmem:[#allocation3 + $0x38] sm:$0xe0] %v7534_v0  ;;  %v399_v37 = vld [vmem:[#allocation8 + $0x39] sm:$0xf] }
 0x12f   :  { %296 = vst [vmem:[#allocation3 + $0x40] sm:$0xe0] %v7534_v0  ;;  %297 = vst [vmem:[#allocation3 + $0x48] sm:$0xe0] %v7534_v0  ;;  %v427_v38 = vpack.c.bf16 %v399_v37, %v398_v36  ;;  %v334_v39 = vld [vmem:[#allocation8 + $0x30] sm:$0xff]  ;;  %v6898_v44 = vld [vmem:[#allocation8 + $0x41] sm:$0xff] }
 0x130   :  { %298 = vst [vmem:[#allocation3 + $0x50] sm:$0xe0] %v7534_v0  ;;  %299 = vst [vmem:[#allocation3 + $0x58] sm:$0xe0] %v7534_v0  ;;  %1221 = vmatpush1.bf16.msra.mxu0 %v5765_v19  ;;  %v335_v40 = vld [vmem:[#allocation8 + $0x38] sm:$0xf] }
 0x131   :  { %300 = vst [vmem:[#allocation3 + $0x60] sm:$0xe0] %v7534_v0  ;;  %301 = vst [vmem:[#allocation3 + $0x68] sm:$0xe0] %v7534_v0  ;;  %1222 = vmatprep.subr.bf16.mxu0 %v5766_v20  ;;  %v5771_v41 = vld [vmem:[#allocation11 + $0x80] ss:$8 sps:$4 sm:$0xff]   ;;  %v363_v43 = vpack.c.bf16 %v335_v40, %v334_v39 }
 0x132   :  { %302 = vst [vmem:[#allocation3 + $0x70] sm:$0xe0] %v7534_v0  ;;  %303 = vst [vmem:[#allocation3 + $0x78] sm:$0xe0] %v7534_v0  ;;  %v5772_v42 = vld [vmem:[#allocation11 + $0x94] ss:$8 sps:$4 sm:$0xff]  }
 0x133   :  { %304 = vst [vmem:[#allocation3 + $0x80] sm:$0xe0] %v7534_v0  ;;  %305 = vst [vmem:[#allocation3 + $0x88] sm:$0xe0] %v7534_v0  ;;  %v6900_v45 = vld [vmem:[#allocation8 + $0x49] sm:$0xff]  ;;  %v6902_v46 = vld [vmem:[#allocation8 + $0x40] sm:$0xff] }
 0x134   :  { %306 = vst [vmem:[#allocation3 + $0x90] sm:$0xe0] %v7534_v0  ;;  %307 = vst [vmem:[#allocation3 + $0x98] sm:$0xe0] %v7534_v0  ;;  %1223 = vmatpush1.bf16.msra.mxu0 %v5768_v27  ;;  %v428_v47 = vpack.c.bf16 %v6900_v45, %v6898_v44  ;;  %v6906_v48 = vld [vmem:[#allocation8 + $0x48] sm:$0xff]  ;;  %v402_v52 = vld [vmem:[#allocation8 + $0x51] sm:$0xff] }
 0x135   :  { %308 = vst [vmem:[#allocation3 + $0xa0] sm:$0xe0] %v7534_v0  ;;  %309 = vst [vmem:[#allocation3 + $0xa8] sm:$0xe0] %v7534_v0  ;;  %1224 = vmatprep.subr.bf16.mxu0 %v5769_v33  ;;  %v5774_v49 = vld [vmem:[#allocation11 + $0x90] ss:$8 sps:$4 sm:$0xff]   ;;  %v364_v50 = vpack.c.bf16 %v6906_v48, %v6902_v46 }
 0x136   :  { %310 = vst [vmem:[#allocation3 + $0xb0] sm:$0xe0] %v7534_v0  ;;  %311 = vst [vmem:[#allocation3 + $0xb8] sm:$0xe0] %v7534_v0  ;;  %v5775_v51 = vld [vmem:[#allocation11 + $0xa4] ss:$8 sps:$4 sm:$0xff]  }
 0x137   :  { %312 = vst [vmem:[#allocation3 + $0xc0] sm:$0xe0] %v7534_v0  ;;  %313 = vst [vmem:[#allocation3 + $0xc8] sm:$0xe0] %v7534_v0  ;;  %v403_v53 = vld [vmem:[#allocation8 + $0x59] sm:$0xf] }
 0x138   :  { %314 = vst [vmem:[#allocation3 + $0xd0] sm:$0xe0] %v7534_v0  ;;  %315 = vst [vmem:[#allocation3 + $0xd8] sm:$0xe0] %v7534_v0  ;;  %1225 = vmatpush1.bf16.msra.mxu0 %v5771_v41  ;;  %v429_v54 = vpack.c.bf16 %v403_v53, %v402_v52  ;;  %v338_v55 = vld [vmem:[#allocation8 + $0x50] sm:$0xff]  ;;  %v6910_v58 = vld [vmem:[#allocation8 + $0x61] sm:$0xff] }
 0x139   :  { %316 = vst [vmem:[#allocation3 + $0xe0] sm:$0xe0] %v7534_v0  ;;  %317 = vst [vmem:[#allocation3 + $0xe8] sm:$0xe0] %v7534_v0  ;;  %1226 = vmatprep.subr.bf16.mxu0 %v5772_v42  ;;  %v339_v56 = vld [vmem:[#allocation8 + $0x58] sm:$0xf] }
 0x13a   :  { %318 = vst [vmem:[#allocation3 + $0xf0] sm:$0xe0] %v7534_v0  ;;  %319 = vst [vmem:[#allocation3 + $0xf8] sm:$0xe0] %v7534_v0  ;;  %v365_v57 = vpack.c.bf16 %v339_v56, %v338_v55  ;;  %v6912_v59 = vld [vmem:[#allocation8 + $0x69] sm:$0xff]  ;;  %v6914_v60 = vld [vmem:[#allocation8 + $0x60] sm:$0xff] }
 0x13b   :  { %320 = vst [vmem:[#allocation3 + $0x100] sm:$0xe0] %v7534_v0  ;;  %321 = vst [vmem:[#allocation3 + $0x108] sm:$0xe0] %v7534_v0  ;;  %v5777_v61 = vld [vmem:[#allocation11 + $0xa0] ss:$8 sps:$4 sm:$0xff]   ;;  %v430_v62 = vpack.c.bf16 %v6912_v59, %v6910_v58 }
 0x13c   :  { %322 = vst [vmem:[#allocation3 + $0x110] sm:$0xe0] %v7534_v0  ;;  %323 = vst [vmem:[#allocation3 + $0x118] sm:$0xe0] %v7534_v0  ;;  %1227 = vmatpush1.bf16.msra.mxu0 %v5774_v49  ;;  %v6918_v63 = vld [vmem:[#allocation8 + $0x68] sm:$0xff]  ;;  %v406_v3 = vld [vmem:[#allocation8 + $0x71] sm:$0xff] }
 0x13d   :  { %324 = vst [vmem:[#allocation3 + $0x120] sm:$0xe0] %v7534_v0  ;;  %325 = vst [vmem:[#allocation3 + $0x128] sm:$0xe0] %v7534_v0  ;;  %1228 = vmatprep.subr.bf16.mxu0 %v5775_v51  ;;  %v5778_v1 = vld [vmem:[#allocation11 + $0xb4] ss:$8 sps:$4 sm:$0xff]   ;;  %v366_v2 = vpack.c.bf16 %v6918_v63, %v6914_v60 }
 0x13e   :  { %326 = vst [vmem:[#allocation3 + $0x130] sm:$0xe0] %v7534_v0  ;;  %327 = vst [vmem:[#allocation3 + $0x138] sm:$0xe0] %v7534_v0  ;;  %v407_v4 = vld [vmem:[#allocation8 + $0x79] sm:$0xf] }
 0x13f   :  { %441 = vst [vmem:[#allocation2 + $0x30] sm:$0x3f] %v425_v25  ;;  %377 = vst [vmem:[#allocation2 + $0x28] sm:$0x3f] %v361_v28  ;;  %v431_v5 = vpack.c.bf16 %v407_v4, %v406_v3  ;;  %v342_v6 = vld [vmem:[#allocation8 + $0x70] sm:$0xff]  ;;  %v6922_v11 = vld [vmem:[#allocation8 + $0x81] sm:$0xff] }
 0x140   :  { %443 = vst [vmem:[#allocation2 + $0x80] sm:$0x3f] %v427_v38  ;;  %379 = vst [vmem:[#allocation2 + $0x78] sm:$0x3f] %v363_v43  ;;  %v343_v7 = vld [vmem:[#allocation8 + $0x78] sm:$0xf]  ;;  %1229 = vmatpush1.bf16.msra.mxu0 %v5777_v61 }
 0x141   :  { %445 = vst [vmem:[#allocation2 + $0xd0] sm:$0x3f] %v429_v54  ;;  %381 = vst [vmem:[#allocation2 + $0xc8] sm:$0x3f] %v365_v57  ;;  %v5780_v8 = vld [vmem:[#allocation11 + $0xb0] ss:$8 sps:$4 sm:$0xff]   ;;  %v367_v10 = vpack.c.bf16 %v343_v7, %v342_v6  ;;  %1230 = vmatprep.subr.bf16.mxu0 %v5778_v1 }
 0x142   :  { %v5781_v9 = vld [vmem:[#allocation11 + $0xc4] ss:$8 sps:$4 sm:$0xff]   ;;  %447 = vst [vmem:[#allocation2 + $0x120] sm:$0x3f] %v431_v5  ;;  %v5783_v16 = vld [vmem:[#allocation11 + $0xc0] ss:$8 sps:$4 sm:$0xff]  }
 0x143   :  { %v6924_v12 = vld [vmem:[#allocation8 + $0x89] sm:$0xff]  ;;  %v6926_v13 = vld [vmem:[#allocation8 + $0x80] sm:$0xff]  ;;  %383 = vst [vmem:[#allocation2 + $0x118] sm:$0x3f] %v367_v10  ;;  %v5784_v20 = vld [vmem:[#allocation11 + $0xd4] ss:$8 sps:$4 sm:$0xff]  }
 0x144   :  { %v432_v14 = vpack.c.bf16 %v6924_v12, %v6922_v11  ;;  %v6930_v15 = vld [vmem:[#allocation8 + $0x88] sm:$0xff]  ;;  %1231 = vmatpush1.bf16.msra.mxu0 %v5780_v8  ;;  %v410_v22 = vld [vmem:[#allocation8 + $0x91] sm:$0xff]  ;;  %v411_v23 = vld [vmem:[#allocation8 + $0x99] sm:$0xf]  ;;  %vm3631_vm0 = vcmask 1041409   ;;  %vm3634_vm1 = vcmask 1042434  }
 0x145   :  { %v368_v19 = vpack.c.bf16 %v6930_v15, %v6926_v13  ;;  %1232 = vmatprep.subr.bf16.mxu0 %v5781_v9  ;;  %v433_v24 = vpack.c.bf16 %v411_v23, %v410_v22  ;;  %v346_v25 = vld [vmem:[#allocation8 + $0x90] sm:$0xff]  ;;  %v347_v26 = vld [vmem:[#allocation8 + $0x98] sm:$0xf]  ;;  %v6934_v28 = vld [vmem:[#allocation8 + $0xa1] sm:$0xff]  ;;  %vm3637_vm2 = vcmask 1043459   ;;  %vm3640_vm3 = vcmask 1044484  }
 0x146   :  { %v369_v27 = vpack.c.bf16 %v347_v26, %v346_v25  ;;  %v6936_v33 = vld [vmem:[#allocation8 + $0xa9] sm:$0xff]  ;;  %v6938_v36 = vld [vmem:[#allocation8 + $0xa0] sm:$0xff]  ;;  %v414_v42 = vld [vmem:[#allocation8 + $0xb1] sm:$0xff]  ;;  %vm3643_vm4 = vcmask 1045509   ;;  %vm3646_vm5 = vcmask 1046534   ;;  %vm3649_vm6 = vcmask 1047559  }
 0x147   :  { %449 = vst [vmem:[#allocation2 + $0x170] sm:$0x3f] %v433_v24  ;;  %v5786_v37 = vld [vmem:[#allocation11 + $0xd0] ss:$8 sps:$4 sm:$0xff]   ;;  %v434_v38 = vpack.c.bf16 %v6936_v33, %v6934_v28  ;;  %v6942_v39 = vld [vmem:[#allocation8 + $0xa8] sm:$0xff]  ;;  %v6950_v61 = vld [vmem:[#allocation8 + $0xc0] sm:$0xff] }
 0x148   :  { %1233 = vmatpush1.bf16.msra.mxu0 %v5783_v16  ;;  %385 = vst [vmem:[#allocation2 + $0x168] sm:$0x3f] %v369_v27  ;;  %v5787_v40 = vld [vmem:[#allocation11 + $0xe4] ss:$8 sps:$4 sm:$0xff]   ;;  %v370_v41 = vpack.c.bf16 %v6942_v39, %v6938_v36  ;;  %v415_v43 = vld [vmem:[#allocation8 + $0xb9] sm:$0xf] }
 0x149   :  { %1234 = vmatprep.subr.bf16.mxu0 %v5784_v20  ;;  %v435_v49 = vpack.c.bf16 %v415_v43, %v414_v42  ;;  %v350_v51 = vld [vmem:[#allocation8 + $0xb0] sm:$0xff]  ;;  %v351_v52 = vld [vmem:[#allocation8 + $0xb8] sm:$0xf]  ;;  %v5789_v53 = vld [vmem:[#allocation11 + $0xe0] ss:$8 sps:$4 sm:$0xff]   ;;  %vm6501_vm7 = vmmov 0  }
 0x14a   :  { %v5790_v54 = vld [vmem:[#allocation11 + $0xf4] ss:$8 sps:$4 sm:$0xff]   ;;  %v371_v55 = vpack.c.bf16 %v351_v52, %v350_v51  ;;  %v6946_v56 = vld [vmem:[#allocation8 + $0xc1] sm:$0xff]  ;;  %v6948_v57 = vld [vmem:[#allocation8 + $0xc9] sm:$0xff]  ;;  %s6502_s14 = smov [#allocation33]  }
 0x14b   :  { %451 = vst [vmem:[#allocation2 + $0x1c0] sm:$0x3f] %v435_v49  ;;  %v436_v1 = vpack.c.bf16 %v6948_v57, %v6946_v56  ;;  %v6954_v3 = vld [vmem:[#allocation8 + $0xc8] sm:$0xff]  ;;  %v5792_v4 = vld [vmem:[#allocation11 + $0xf0] ss:$8 sps:$4 sm:$0xff]   ;;  %v6962_v24 = vld [vmem:[#allocation8 + $0xe0] sm:$0xff] }
 0x14c   :  { %1235 = vmatpush1.bf16.msra.mxu0 %v5786_v37  ;;  %387 = vst [vmem:[#allocation2 + $0x1b8] sm:$0x3f] %v371_v55  ;;  %v372_v5 = vpack.c.bf16 %v6954_v3, %v6950_v61  ;;  %v5795_v6 = vld [vmem:[#allocation11 + $0x104] ss:$8 sps:$4 sm:$0xff]   ;;  %v418_v7 = vld [vmem:[#allocation8 + $0xd1] sm:$0xff]  ;;  %v654_v37 = vld [vmem:[#allocation2 + $0x30] sm:$0xff] }
 0x14d   :  { %1236 = vmatprep.subr.bf16.mxu0 %v5787_v40  ;;  %v419_v8 = vld [vmem:[#allocation8 + $0xd9] sm:$0xf]  ;;  %v354_v10 = vld [vmem:[#allocation8 + $0xd0] sm:$0xff]  ;;  %v6958_v22 = vld [vmem:[#allocation8 + $0xe1] sm:$0xff]  ;;  %s5019_s4 = sshll.u32 %s6502_s14, 4  ;;  %s5020_s4 = int_to_ptr.vmem [resolvable:$true] %s5019_s4 }
 0x14e   :  { %v437_v9 = vpack.c.bf16 %v419_v8, %v418_v7  ;;  %v355_v16 = vld [vmem:[#allocation8 + $0xd8] sm:$0xf]  ;;  %v6960_v23 = vld [vmem:[#allocation8 + $0xe9] sm:$0xff]  ;;  %v5798_v40 = vld [vmem:[#allocation11 + $0x114] ss:$8 sps:$4 sm:$0xff]   ;;  %s6416_s8 = scalar_lea.vmem %s5020_s4, 256  ;;  %p6421_p9 = scmp.lt.s32.totalorder %s5020_s4, %s5020_s4 }
 0x14f   :  { %v373_v20 = vpack.c.bf16 %v355_v16, %v354_v10  ;;  %v5793_v25 = vld [vmem:[#allocation11 + $0x100] ss:$8 sps:$4 sm:$0xff]   ;;  %v438_v26 = vpack.c.bf16 %v6960_v23, %v6958_v22  ;;  %v422_v43 = vld [vmem:[#allocation8 + $0xf1] sm:$0xff]  ;;  %v423_v49 = vld [vmem:[#allocation8 + $0xf9] sm:$0xf]  ;;  %p6417_p8 = scmp.ne.s32.totalorder %s5020_s4, %s6416_s8  ;;  %p6422_p10 = scmp.lt.s32.totalorder %s6416_s8, %s6416_s8 }
 0x150   :  { %1237 = vmatpush1.bf16.msra.mxu0 %v5789_v53  ;;  %453 = vst [vmem:[#allocation2 + $0x210] sm:$0x3f] %v437_v9  ;;  %v6966_v27 = vld [vmem:[#allocation8 + $0xe8] sm:$0xff]  ;;  %v439_v51 = vpack.c.bf16 %v423_v49, %v422_v43  ;;  %v358_v52 = vld [vmem:[#allocation8 + $0xf0] sm:$0xff]  ;;  %v359_v53 = vld [vmem:[#allocation8 + $0xf8] sm:$0xf] }
 0x151   :  { %1238 = vmatprep.subr.bf16.mxu0 %v5790_v54  ;;  %389 = vst [vmem:[#allocation2 + $0x208] sm:$0x3f] %v373_v20  ;;  %v374_v42 = vpack.c.bf16 %v6966_v27, %v6962_v24  ;;  %v5796_v54 = vld [vmem:[#allocation11 + $0x110] ss:$8 sps:$4 sm:$0xff]   ;;  %v5801_v55 = vld [vmem:[#allocation11 + $0x124] ss:$8 sps:$4 sm:$0xff]   ;;  %p6423_p11 = por %p6422_p10, %p6421_p9 }
 0x152   :  { %455 = vst [vmem:[#allocation2 + $0x260] sm:$0x3f] %v439_v51  ;;  %v6975_v7 = vld [vmem:[#allocation8 + $0xb] sm:$0xff]  ;;  %v6977_v8 = vld [vmem:[#allocation8 + $0x2] sm:$0xff]  ;;  %v5804_v9 = vld [vmem:[#allocation11 + $0x134] ss:$8 sps:$4 sm:$0xff]  }
 0x153   :  { %v6981_v18 = vld [vmem:[#allocation8 + $0xa] sm:$0xff]  ;;  %v653_v16 = vld [vmem:[#allocation2 + $0x28] sm:$0xff]  ;;  %v7012_v32 = vld [vmem:[#allocation8 + $0x42] sm:$0xff]  ;;  %p6424_p12 = pnand %p6423_p11, %p6417_p8 }
 0x154   :  { %1239 = vmatpush1.bf16.msra.mxu0 %v5792_v4  ;;  %v375_v4 = vpack.c.bf16 %v359_v53, %v358_v52  ;;  %v488_v10 = vpack.c.bf16 %v6981_v18, %v6977_v8  ;;  %v522_v20 = vld [vmem:[#allocation8 + $0x13] sm:$0xff]  ;;  %v6985_v51 = vld [vmem:[#allocation8 + $0x23] sm:$0xff]  ;;  %v6987_v52 = vld [vmem:[#allocation8 + $0x2b] sm:$0xff] }
 0x155   :  { %1401 = vmatprep.subr.bf16.mxu0 %v5795_v6  ;;  %v6973_v6 = vld [vmem:[#allocation8 + $0x3] sm:$0xff]  ;;  %v459_v43 = vld [vmem:[#allocation8 + $0x1a] sm:$0xf]  ;;  %v466_v45 = vld [vmem:[#allocation8 + $0x52] sm:$0xff] }
 0x156   :  { %391 = vst [vmem:[#allocation2 + $0x258] sm:$0x3f] %v375_v4  ;;  %v552_v17 = vpack.c.bf16 %v6975_v7, %v6973_v6  ;;  %v5802_v53 = vld [vmem:[#allocation11 + $0x130] ss:$8 sps:$4 sm:$0xff]   ;;  %v5813_v0 = vld [vmem:[#allocation11 + $0x164] ss:$8 sps:$4 sm:$0xff]  }
 0x157   :  { %1241 = vmatmul.mubr.bf16.vlgmr.msra.gmra.mrb[0].mxu0 %v360_v21  ;;  %v5799_v21 = vld [vmem:[#allocation11 + $0x120] ss:$8 sps:$4 sm:$0xff]   ;;  %v526_v29 = vld [vmem:[#allocation8 + $0x33] sm:$0xff]  ;;  %v527_v30 = vld [vmem:[#allocation8 + $0x3b] sm:$0xf] }
 0x158   :  { %1402 = vmatpush1.bf16.msra.mxu0 %v5793_v25  ;;  %1250 = vmatprep.mubr.bf16.mxu0 %v654_v37  ;;  %v523_v25 = vld [vmem:[#allocation8 + $0x1b] sm:$0xf]  ;;  %v6996_v4 = vld [vmem:[#allocation8 + $0x2a] sm:$0xff]  ;;  %v7030_v48 = vld [vmem:[#allocation8 + $0x62] sm:$0xff] }
 0x159   :  { %1403 = vmatprep.subr.bf16.mxu0 %v5798_v40  ;;  %v553_v37 = vpack.c.bf16 %v523_v25, %v522_v20  ;;  %v458_v40 = vld [vmem:[#allocation8 + $0x12] sm:$0xff]  ;;  %v5805_v25 = vld [vmem:[#allocation11 + $0x140] ss:$8 sps:$4 sm:$0xff]   ;;  %v475_v11 = vld [vmem:[#allocation8 + $0x9a] sm:$0xf] }
 0x15a   :  { %v489_v49 = vpack.c.bf16 %v459_v43, %v458_v40  ;;  %v5810_v40 = vld [vmem:[#allocation11 + $0x154] ss:$8 sps:$4 sm:$0xff]   ;;  %v663_v20 = vld [vmem:[#allocation2 + $0x78] sm:$0xff]  ;;  %v704_v15 = vld [vmem:[#allocation2 + $0x1c0] sm:$0xff] }
 0x15b   :  { %569 = vst [vmem:[#allocation2 + $0x40] sm:$0x3f] %v553_v37  ;;  %v664_v37 = vld [vmem:[#allocation2 + $0x80] sm:$0xff]  ;;  %v463_v43 = vld [vmem:[#allocation8 + $0x3a] sm:$0xf]  ;;  %v7048_v63 = vld [vmem:[#allocation8 + $0x82] sm:$0xff] }
 0x15c   :  { %1404 = vmatpush1.bf16.msra.mxu0 %v5796_v54  ;;  %505 = vst [vmem:[#allocation2 + $0x38] sm:$0x3f] %v489_v49  ;;  %v5811_v54 = vld [vmem:[#allocation11 + $0x160] ss:$8 sps:$4 sm:$0xff]   ;;  %v470_v59 = vld [vmem:[#allocation8 + $0x72] sm:$0xff] }
 0x15d   :  { %1405 = vmatprep.subr.bf16.mxu0 %v5801_v55  ;;  %v6994_v55 = vld [vmem:[#allocation8 + $0x22] sm:$0xff]  ;;  %v713_v56 = vld [vmem:[#allocation2 + $0x208] sm:$0xff]  ;;  %v724_v3 = vld [vmem:[#allocation2 + $0x260] sm:$0xff] }
 0x15e   :  { %v703_v28 = vld [vmem:[#allocation2 + $0x1b8] sm:$0xff]  ;;  %v714_v39 = vld [vmem:[#allocation2 + $0x210] sm:$0xff]  ;;  %v5844_v6 = vld [vmem:[#allocation11 + $0x210] ss:$8 sps:$4 sm:$0xff]  }
 0x15f   :  { %1251 = vmatmul.mubr.bf16.gmra.mrb[4].mxu0 %v653_v16  ;;  %v5807_v16 = vld [vmem:[#allocation11 + $0x144] ss:$8 sps:$4 sm:$0xff]   ;;  %v5846_v27 = vld [vmem:[#allocation11 + $0x214] ss:$8 sps:$4 sm:$0xff]  }
 0x160   :  { %1260 = vmatprep.mubr.bf16.mxu0 %v426_v34  ;;  %1406 = vmatpush1.bf16.msra.mxu0 %v5799_v21  ;;  %v555_v34 = vpack.c.bf16 %v527_v30, %v526_v29  ;;  %v462_v21 = vld [vmem:[#allocation8 + $0x32] sm:$0xff]  ;;  %v7003_v30 = vld [vmem:[#allocation8 + $0x43] sm:$0xff] }
 0x161   :  { %1407 = vmatprep.subr.bf16.mxu0 %v5804_v9  ;;  %v491_v49 = vpack.c.bf16 %v463_v43, %v462_v21  ;;  %v5808_v9 = vld [vmem:[#allocation11 + $0x150] ss:$8 sps:$4 sm:$0xff]   ;;  %v7075_v33 = vld [vmem:[#allocation8 + $0xc3] sm:$0xff] }
 0x162   :  { %571 = vst [vmem:[#allocation2 + $0x90] sm:$0x3f] %v555_v34  ;;  %v5814_v29 = vld [vmem:[#allocation11 + $0x170] ss:$8 sps:$4 sm:$0xff]   ;;  %v7093_v57 = vld [vmem:[#allocation8 + $0xe3] sm:$0xff] }
 0x163   :  { %507 = vst [vmem:[#allocation2 + $0x88] sm:$0x3f] %v491_v49  ;;  %v7005_v34 = vld [vmem:[#allocation8 + $0x4b] sm:$0xff]  ;;  %v531_v21 = vld [vmem:[#allocation8 + $0x5b] sm:$0xf] }
 0x164   :  { %1408 = vmatpush1.bf16.msra.mxu0 %v5802_v53  ;;  %v5816_v53 = vld [vmem:[#allocation11 + $0x174] ss:$8 sps:$4 sm:$0xff]   ;;  %v556_v31 = vpack.c.bf16 %v7005_v34, %v7003_v30  ;;  %v5820_v43 = vld [vmem:[#allocation11 + $0x190] ss:$8 sps:$4 sm:$0xff]   ;;  %v5825_v49 = vld [vmem:[#allocation11 + $0x1a4] ss:$8 sps:$4 sm:$0xff]  }
 0x165   :  { %1409 = vmatprep.subr.bf16.mxu0 %v5807_v16  ;;  %v5819_v16 = vld [vmem:[#allocation11 + $0x184] ss:$8 sps:$4 sm:$0xff]  }
 0x166   :  { %v723_v22 = vld [vmem:[#allocation2 + $0x258] sm:$0xff]  ;;  %v656_v24 = vld [vmem:[#allocation2 + $0x40] sm:$0xff] }
 0x167   :  { %1261 = vmatmul.mubr.bf16.gmra.mrb[8].mxu0 %v362_v35  ;;  %v7014_v35 = vld [vmem:[#allocation8 + $0x4a] sm:$0xff] }
 0x168   :  { %1270 = vmatprep.mubr.bf16.mxu0 %v664_v37  ;;  %1410 = vmatpush1.bf16.msra.mxu0 %v5805_v25  ;;  %v674_v25 = vld [vmem:[#allocation2 + $0xd0] sm:$0xff]  ;;  %v7114_v23 = vld [vmem:[#allocation8 + $0x4] sm:$0xff]  ;;  %v7128_v18 = vld [vmem:[#allocation8 + $0x2c] sm:$0xff] }
 0x169   :  { %1411 = vmatprep.subr.bf16.mxu0 %v5810_v40  ;;  %v5822_v37 = vld [vmem:[#allocation11 + $0x194] ss:$8 sps:$4 sm:$0xff]   ;;  %v5849_v7 = vld [vmem:[#allocation11 + $0x224] ss:$8 sps:$4 sm:$0xff]  }
 0x16a   :  { %v530_v40 = vld [vmem:[#allocation8 + $0x53] sm:$0xff]  ;;  %v7126_v8 = vld [vmem:[#allocation8 + $0x24] sm:$0xff] }
 0x16b   :  { %v557_v44 = vpack.c.bf16 %v531_v21, %v530_v40  ;;  %v5826_v40 = vld [vmem:[#allocation11 + $0x1b0] ss:$8 sps:$4 sm:$0xff]   ;;  %v7021_v21 = vld [vmem:[#allocation8 + $0x63] sm:$0xff] }
 0x16c   :  { %1412 = vmatpush1.bf16.msra.mxu0 %v5808_v9  ;;  %v673_v9 = vld [vmem:[#allocation2 + $0xc8] sm:$0xff]  ;;  %v7150_v34 = vld [vmem:[#allocation8 + $0x64] sm:$0xff] }
 0x16d   :  { %1413 = vmatprep.subr.bf16.mxu0 %v5813_v0  ;;  %v492_v0 = vpack.c.bf16 %v7014_v35, %v7012_v32  ;;  %573 = vst [vmem:[#allocation2 + $0xe0] sm:$0x3f] %v557_v44  ;;  %v7023_v44 = vld [vmem:[#allocation8 + $0x6b] sm:$0xff] }
 0x16e   :  { %v558_v46 = vpack.c.bf16 %v7023_v44, %v7021_v21  ;;  %v7164_v21 = vld [vmem:[#allocation8 + $0x8c] sm:$0xff] }
 0x16f   :  { %1271 = vmatmul.mubr.bf16.gmra.mrb[12].mxu0 %v663_v20  ;;  %v5817_v20 = vld [vmem:[#allocation11 + $0x180] ss:$8 sps:$4 sm:$0xff]  }
 0x170   :  { %1280 = vmatprep.mubr.bf16.mxu0 %v428_v47  ;;  %1414 = vmatpush1.bf16.msra.mxu0 %v5811_v54  ;;  %v467_v47 = vld [vmem:[#allocation8 + $0x5a] sm:$0xf] }
 0x171   :  { %1415 = vmatprep.subr.bf16.mxu0 %v5816_v53  ;;  %v493_v54 = vpack.c.bf16 %v467_v47, %v466_v45  ;;  %v5823_v53 = vld [vmem:[#allocation11 + $0x1a0] ss:$8 sps:$4 sm:$0xff]   ;;  %v5834_v45 = vld [vmem:[#allocation11 + $0x1d4] ss:$8 sps:$4 sm:$0xff]  }
 0x172   :  { %v534_v47 = vld [vmem:[#allocation8 + $0x73] sm:$0xff] }
 0x173   :  { %509 = vst [vmem:[#allocation2 + $0xd8] sm:$0x3f] %v493_v54  ;;  %v535_v54 = vld [vmem:[#allocation8 + $0x7b] sm:$0xf] }
 0x174   :  { %1416 = vmatpush1.bf16.msra.mxu0 %v5814_v29  ;;  %v5828_v29 = vld [vmem:[#allocation11 + $0x1b4] ss:$8 sps:$4 sm:$0xff]   ;;  %v559_v58 = vpack.c.bf16 %v535_v54, %v534_v47  ;;  %v5838_v47 = vld [vmem:[#allocation11 + $0x1f0] ss:$8 sps:$4 sm:$0xff]   ;;  %v7039_v54 = vld [vmem:[#allocation8 + $0x83] sm:$0xff] }
 0x175   :  { %1417 = vmatprep.subr.bf16.mxu0 %v5819_v16  ;;  %v5831_v16 = vld [vmem:[#allocation11 + $0x1c4] ss:$8 sps:$4 sm:$0xff]  }
 0x176   :  { %575 = vst [vmem:[#allocation2 + $0x130] sm:$0x3f] %v559_v58  ;;  %v7041_v58 = vld [vmem:[#allocation8 + $0x8b] sm:$0xff] }
 0x177   :  { %1281 = vmatmul.mubr.bf16.gmra.mrb[16].mxu0 %v364_v50  ;;  %v7032_v50 = vld [vmem:[#allocation8 + $0x6a] sm:$0xff]  ;;  %v560_v60 = vpack.c.bf16 %v7041_v58, %v7039_v54 }
 0x178   :  { %1290 = vmatprep.mubr.bf16.mxu0 %v674_v25  ;;  %1418 = vmatpush1.bf16.msra.mxu0 %v5817_v20  ;;  %v494_v20 = vpack.c.bf16 %v7032_v50, %v7030_v48  ;;  %v5829_v25 = vld [vmem:[#allocation11 + $0x1c0] ss:$8 sps:$4 sm:$0xff]   ;;  %v7176_v54 = vld [vmem:[#allocation8 + $0xac] sm:$0xff] }
 0x179   :  { %1419 = vmatprep.subr.bf16.mxu0 %v5822_v37  ;;  %v684_v37 = vld [vmem:[#allocation2 + $0x120] sm:$0xff] }
 0x17a   :  { %v675_v30 = vld [vmem:[#allocation2 + $0xd8] sm:$0xff] }
 0x17c   :  { %1420 = vmatpush1.bf16.msra.mxu0 %v5820_v43 }
 0x17d   :  { %1421 = vmatprep.subr.bf16.mxu0 %v5825_v49  ;;  %v5832_v49 = vld [vmem:[#allocation11 + $0x1d0] ss:$8 sps:$4 sm:$0xff]  }
 0x17f   :  { %1291 = vmatmul.mubr.bf16.gmra.mrb[20].mxu0 %v673_v9  ;;  %v5837_v9 = vld [vmem:[#allocation11 + $0x1e4] ss:$8 sps:$4 sm:$0xff]  }
 0x180   :  { %1300 = vmatprep.mubr.bf16.mxu0 %v430_v62  ;;  %1422 = vmatpush1.bf16.msra.mxu0 %v5823_v53  ;;  %v471_v62 = vld [vmem:[#allocation8 + $0x7a] sm:$0xf]  ;;  %v683_v53 = vld [vmem:[#allocation2 + $0x118] sm:$0xff] }
 0x181   :  { %1423 = vmatprep.subr.bf16.mxu0 %v5828_v29  ;;  %v495_v43 = vpack.c.bf16 %v471_v62, %v470_v59  ;;  %v5835_v29 = vld [vmem:[#allocation11 + $0x1e0] ss:$8 sps:$4 sm:$0xff]   ;;  %v539_v59 = vld [vmem:[#allocation8 + $0x9b] sm:$0xf] }
 0x183   :  { %511 = vst [vmem:[#allocation2 + $0x128] sm:$0x3f] %v495_v43  ;;  %v474_v43 = vld [vmem:[#allocation8 + $0x92] sm:$0xff] }
 0x184   :  { %1424 = vmatpush1.bf16.msra.mxu0 %v5826_v40  ;;  %v5840_v40 = vld [vmem:[#allocation11 + $0x1f4] ss:$8 sps:$4 sm:$0xff]   ;;  %v497_v12 = vpack.c.bf16 %v475_v11, %v474_v43  ;;  %v7084_v43 = vld [vmem:[#allocation8 + $0xc2] sm:$0xff]  ;;  %v7086_v11 = vld [vmem:[#allocation8 + $0xca] sm:$0xff] }
 0x185   :  { %1425 = vmatprep.subr.bf16.mxu0 %v5831_v16  ;;  %v5843_v16 = vld [vmem:[#allocation11 + $0x204] ss:$8 sps:$4 sm:$0xff]   ;;  %v500_v36 = vpack.c.bf16 %v7086_v11, %v7084_v43 }
 0x186   :  { %513 = vst [vmem:[#allocation2 + $0x178] sm:$0x3f] %v497_v12  ;;  %v547_v12 = vld [vmem:[#allocation8 + $0xdb] sm:$0xf] }
 0x187   :  { %1301 = vmatmul.mubr.bf16.gmra.mrb[24].mxu0 %v366_v2  ;;  %v7050_v2 = vld [vmem:[#allocation8 + $0x8a] sm:$0xff] }
 0x188   :  { %1310 = vmatprep.mubr.bf16.mxu0 %v684_v37  ;;  %1426 = vmatpush1.bf16.msra.mxu0 %v5829_v25  ;;  %v496_v25 = vpack.c.bf16 %v7050_v2, %v7048_v63  ;;  %v694_v37 = vld [vmem:[#allocation2 + $0x170] sm:$0xff] }
 0x189   :  { %1427 = vmatprep.subr.bf16.mxu0 %v5834_v45  ;;  %v538_v45 = vld [vmem:[#allocation8 + $0x93] sm:$0xff] }
 0x18a   :  { %v561_v62 = vpack.c.bf16 %v539_v59, %v538_v45  ;;  %v479_v45 = vld [vmem:[#allocation8 + $0xba] sm:$0xf] }
 0x18b   :  { %v685_v35 = vld [vmem:[#allocation2 + $0x128] sm:$0xff] }
 0x18c   :  { %1428 = vmatpush1.bf16.msra.mxu0 %v5832_v49  ;;  %577 = vst [vmem:[#allocation2 + $0x180] sm:$0x3f] %v561_v62  ;;  %v7057_v49 = vld [vmem:[#allocation8 + $0xa3] sm:$0xff] }
 0x18d   :  { %1429 = vmatprep.subr.bf16.mxu0 %v5837_v9  ;;  %v7059_v9 = vld [vmem:[#allocation8 + $0xab] sm:$0xff] }
 0x18e   :  { %v695_v50 = vld [vmem:[#allocation2 + $0x178] sm:$0xff] }
 0x18f   :  { %1311 = vmatmul.mubr.bf16.gmra.mrb[28].mxu0 %v683_v53  ;;  %v562_v53 = vpack.c.bf16 %v7059_v9, %v7057_v49  ;;  %v7188_v49 = vld [vmem:[#allocation8 + $0xcc] sm:$0xff] }
 0x190   :  { %1320 = vmatprep.mubr.bf16.mxu0 %v432_v14  ;;  %1430 = vmatpush1.bf16.msra.mxu0 %v5835_v29  ;;  %v693_v14 = vld [vmem:[#allocation2 + $0x168] sm:$0xff]  ;;  %v7066_v29 = vld [vmem:[#allocation8 + $0xa2] sm:$0xff] }
 0x191   :  { %1431 = vmatprep.subr.bf16.mxu0 %v5840_v40  ;;  %v7068_v40 = vld [vmem:[#allocation8 + $0xaa] sm:$0xff] }
 0x192   :  { %v498_v13 = vpack.c.bf16 %v7068_v40, %v7066_v29 }
 0x194   :  { %1432 = vmatpush1.bf16.msra.mxu0 %v5838_v47  ;;  %v543_v47 = vld [vmem:[#allocation8 + $0xbb] sm:$0xf] }
 0x195   :  { %1594 = vmatprep.subr.bf16.mxu0 %v5843_v16 }
 0x197   :  { %1321 = vmatmul.mubr.bf16.gmra.mrb[32].mxu0 %v368_v19  ;;  %v542_v19 = vld [vmem:[#allocation8 + $0xb3] sm:$0xff] }
 0x198   :  { %1330 = vmatprep.mubr.bf16.mxu0 %v694_v37  ;;  %v563_v16 = vpack.c.bf16 %v543_v47, %v542_v19  ;;  %v478_v37 = vld [vmem:[#allocation8 + $0xb2] sm:$0xff]  ;;  %v483_v19 = vld [vmem:[#allocation8 + $0xda] sm:$0xf] }
 0x199   :  { %v499_v59 = vpack.c.bf16 %v479_v45, %v478_v37  ;;  %v7102_v37 = vld [vmem:[#allocation8 + $0xe2] sm:$0xff]  ;;  %v7104_v45 = vld [vmem:[#allocation8 + $0xea] sm:$0xff] }
 0x19a   :  { %579 = vst [vmem:[#allocation2 + $0x1d0] sm:$0x3f] %v563_v16  ;;  %v502_v61 = vpack.c.bf16 %v7104_v45, %v7102_v37  ;;  %v5874_v37 = vld [vmem:[#allocation14 + $0x34] ss:$8 sps:$4 sm:$0xff]   ;;  %v5876_v45 = vld [vmem:[#allocation14 + $0x30] ss:$8 sps:$4 sm:$0xff]  }
 0x19b   :  { %515 = vst [vmem:[#allocation2 + $0x1c8] sm:$0x3f] %v499_v59  ;;  %v551_v59 = vld [vmem:[#allocation8 + $0xfb] sm:$0xf] }
 0x19f   :  { %1331 = vmatmul.mubr.bf16.gmra.mrb[36].mxu0 %v693_v14 }
 0x1a0   :  { %1340 = vmatprep.mubr.bf16.mxu0 %v434_v38  ;;  %v7077_v38 = vld [vmem:[#allocation8 + $0xcb] sm:$0xff] }
 0x1a1   :  { %v564_v62 = vpack.c.bf16 %v7077_v38, %v7075_v33  ;;  %v7200_v33 = vld [vmem:[#allocation8 + $0xec] sm:$0xff] }
 0x1a2   :  { %v705_v2 = vld [vmem:[#allocation2 + $0x1c8] sm:$0xff] }
 0x1a7   :  { %1341 = vmatmul.mubr.bf16.gmra.mrb[40].mxu0 %v370_v41  ;;  %v546_v41 = vld [vmem:[#allocation8 + $0xd3] sm:$0xff] }
 0x1a8   :  { %1350 = vmatprep.mubr.bf16.mxu0 %v704_v15  ;;  %v565_v14 = vpack.c.bf16 %v547_v12, %v546_v41  ;;  %v482_v15 = vld [vmem:[#allocation8 + $0xd2] sm:$0xff]  ;;  %v487_v41 = vld [vmem:[#allocation8 + $0xfa] sm:$0xf] }
 0x1a9   :  { %v501_v47 = vpack.c.bf16 %v483_v19, %v482_v15  ;;  %v5841_v15 = vld [vmem:[#allocation11 + $0x200] ss:$8 sps:$4 sm:$0xff]   ;;  %v586_v19 = vld [vmem:[#allocation8 + $0x14] sm:$0xff] }
 0x1aa   :  { %581 = vst [vmem:[#allocation2 + $0x220] sm:$0x3f] %v565_v14 }
 0x1ab   :  { %517 = vst [vmem:[#allocation2 + $0x218] sm:$0x3f] %v501_v47  ;;  %v587_v47 = vld [vmem:[#allocation8 + $0x1c] sm:$0xf] }
 0x1af   :  { %1351 = vmatmul.mubr.bf16.gmra.mrb[44].mxu0 %v703_v28 }
 0x1b0   :  { %1360 = vmatprep.mubr.bf16.mxu0 %v436_v1  ;;  %v7095_v1 = vld [vmem:[#allocation8 + $0xeb] sm:$0xff] }
 0x1b1   :  { %v566_v16 = vpack.c.bf16 %v7095_v1, %v7093_v57  ;;  %v5867_v57 = vld [vmem:[#allocation14] ss:$8 sps:$4 sm:$0xff]   ;;  %v5868_v1 = vld [vmem:[#allocation14 + $0x14] ss:$8 sps:$4 sm:$0xff]  }
 0x1b2   :  { %v715_v40 = vld [vmem:[#allocation2 + $0x218] sm:$0xff] }
 0x1b7   :  { %1361 = vmatmul.mubr.bf16.gmra.mrb[48].mxu0 %v372_v5  ;;  %v550_v5 = vld [vmem:[#allocation8 + $0xf3] sm:$0xff] }
 0x1b8   :  { %1370 = vmatprep.mubr.bf16.mxu0 %v714_v39  ;;  %v567_v28 = vpack.c.bf16 %v551_v59, %v550_v5  ;;  %v486_v39 = vld [vmem:[#allocation8 + $0xf2] sm:$0xff]  ;;  %v7539_v5 = vpack.c.bf16 %v6987_v52, %v6985_v51  ;;  %v7540_v52 = vpack.c.bf16 %v6996_v4, %v6994_v55  ;;  %v7138_v55 = vld [vmem:[#allocation8 + $0x44] sm:$0xff] }
 0x1b9   :  { %v503_v12 = vpack.c.bf16 %v487_v41, %v486_v39  ;;  %v5850_v59 = vld [vmem:[#allocation11 + $0x230] ss:$8 sps:$4 sm:$0xff]   ;;  %v5853_v39 = vld [vmem:[#allocation11 + $0x240] ss:$8 sps:$4 sm:$0xff]  }
 0x1ba   :  { %583 = vst [vmem:[#allocation2 + $0x270] sm:$0x3f] %v567_v28  ;;  %v618_v28 = vpack.c.bf16 %v7128_v18, %v7126_v8  ;;  %v590_v41 = vld [vmem:[#allocation8 + $0x34] sm:$0xff]  ;;  %v7140_v4 = vld [vmem:[#allocation8 + $0x4c] sm:$0xff] }
 0x1bb   :  { %519 = vst [vmem:[#allocation2 + $0x268] sm:$0x3f] %v503_v12  ;;  %v591_v12 = vld [vmem:[#allocation8 + $0x3c] sm:$0xf] }
 0x1bc   :  { %v619_v51 = vpack.c.bf16 %v591_v12, %v590_v41  ;;  %v686_v41 = vld [vmem:[#allocation2 + $0x130] sm:$0xff] }
 0x1bd   :  { %v603_v12 = vld [vmem:[#allocation8 + $0x9c] sm:$0xf] }
 0x1be   :  { %635 = vst [vmem:[#allocation2 + $0x98] sm:$0x3f] %v619_v51  ;;  %v706_v51 = vld [vmem:[#allocation2 + $0x1d0] sm:$0xff] }
 0x1bf   :  { %1371 = vmatmul.mubr.bf16.gmra.mrb[52].mxu0 %v713_v56  ;;  %v5847_v56 = vld [vmem:[#allocation11 + $0x220] ss:$8 sps:$4 sm:$0xff]  }
 0x1c0   :  { %1380 = vmatprep.mubr.bf16.mxu0 %v438_v26  ;;  %v7116_v26 = vld [vmem:[#allocation8 + $0xc] sm:$0xff]  ;;  %v5880_v18 = vld [vmem:[#allocation14 + $0x54] ss:$8 sps:$4 sm:$0xff]  }
 0x1c1   :  { %v616_v14 = vpack.c.bf16 %v7116_v26, %v7114_v23 }
 0x1c2   :  { %v725_v11 = vld [vmem:[#allocation2 + $0x268] sm:$0xff] }
 0x1c5   :  { %v667_v23 = vld [vmem:[#allocation2 + $0x98] sm:$0xff] }
 0x1c7   :  { %1381 = vmatmul.mubr.bf16.gmra.mrb[56].mxu0 %v374_v42  ;;  %v617_v42 = vpack.c.bf16 %v587_v47, %v586_v19  ;;  %v5856_v19 = vld [vmem:[#allocation11 + $0x250] ss:$8 sps:$4 sm:$0xff]   ;;  %v5861_v47 = vld [vmem:[#allocation11 + $0x264] ss:$8 sps:$4 sm:$0xff]  }
 0x1c8   :  { %1390 = vmatprep.mubr.bf16.mxu0 %v724_v3  ;;  %v5852_v3 = vld [vmem:[#allocation11 + $0x234] ss:$8 sps:$4 sm:$0xff]  }
 0x1c9   :  { %633 = vst [vmem:[#allocation2 + $0x48] sm:$0x3f] %v617_v42  ;;  %v5864_v42 = vld [vmem:[#allocation11 + $0x274] ss:$8 sps:$4 sm:$0xff]  }
 0x1cf   :  { %1391 = vmatmul.mubr.bf16.gmra.mrb[60].mxu0 %v723_v22  ;;  %v666_v22 = vld [vmem:[#allocation2 + $0x90] sm:$0xff] }
 0x1d0   :  { %1433 = vmatprep.mubr.bf16.mxu0 %v552_v17  ;;  %v655_v17 = vld [vmem:[#allocation2 + $0x38] sm:$0xff] }
 0x1d7   :  { %1434 = vmatmul.mubr.bf16.vlgmr.msra.gmra.mrb[0].mxu0 %v488_v10  ;;  %v5855_v10 = vld [vmem:[#allocation11 + $0x244] ss:$8 sps:$4 sm:$0xff]  }
 0x1d8   :  { %1595 = vmatpush1.bf16.msra.mxu0 %v5841_v15  ;;  %1443 = vmatprep.mubr.bf16.mxu0 %v656_v24  ;;  %v5858_v15 = vld [vmem:[#allocation11 + $0x254] ss:$8 sps:$4 sm:$0xff]  }
 0x1d9   :  { %1596 = vmatprep.subr.bf16.mxu0 %v5846_v27  ;;  %v665_v24 = vld [vmem:[#allocation2 + $0x88] sm:$0xff]  ;;  %v5859_v27 = vld [vmem:[#allocation11 + $0x260] ss:$8 sps:$4 sm:$0xff]  }
 0x1dc   :  { %1597 = vmatpush1.bf16.msra.mxu0 %v5844_v6  ;;  %v5862_v6 = vld [vmem:[#allocation11 + $0x270] ss:$8 sps:$4 sm:$0xff]  }
 0x1dd   :  { %1598 = vmatprep.subr.bf16.mxu0 %v5849_v7  ;;  %v620_v7 = vpack.c.bf16 %v7140_v4, %v7138_v55  ;;  %v5882_v55 = vld [vmem:[#allocation14 + $0x50] ss:$8 sps:$4 sm:$0xff]   ;;  %v5883_v4 = vld [vmem:[#allocation14 + $0x64] ss:$8 sps:$4 sm:$0xff]  }
 0x1df   :  { %1444 = vmatmul.mubr.bf16.gmra.mrb[4].mxu0 %v655_v17  ;;  %v594_v17 = vld [vmem:[#allocation8 + $0x54] sm:$0xff] }
 0x1e0   :  { %1453 = vmatprep.mubr.bf16.mxu0 %v7539_v5  ;;  %1599 = vmatpush1.bf16.msra.mxu0 %v5847_v56  ;;  %v595_v56 = vld [vmem:[#allocation8 + $0x5c] sm:$0xf] }
 0x1e1   :  { %1600 = vmatprep.subr.bf16.mxu0 %v5852_v3  ;;  %v676_v3 = vld [vmem:[#allocation2 + $0xe0] sm:$0xff]  ;;  %v621_v5 = vpack.c.bf16 %v595_v56, %v594_v17  ;;  %v657_v17 = vld [vmem:[#allocation2 + $0x48] sm:$0xff] }
 0x1e2   :  { %v5879_v56 = vld [vmem:[#allocation14 + $0x40] ss:$8 sps:$4 sm:$0xff]  }
 0x1e3   :  { %637 = vst [vmem:[#allocation2 + $0xe8] sm:$0x3f] %v621_v5  ;;  %v5888_v5 = vld [vmem:[#allocation14 + $0x70] ss:$8 sps:$4 sm:$0xff]  }
 0x1e4   :  { %1601 = vmatpush1.bf16.msra.mxu0 %v5850_v59 }
 0x1e5   :  { %1602 = vmatprep.subr.bf16.mxu0 %v5855_v10  ;;  %v598_v10 = vld [vmem:[#allocation8 + $0x74] sm:$0xff] }
 0x1e7   :  { %1454 = vmatmul.mubr.bf16.gmra.mrb[8].mxu0 %v7540_v52  ;;  %v611_v52 = vld [vmem:[#allocation8 + $0xdc] sm:$0xf] }
 0x1e8   :  { %1463 = vmatprep.mubr.bf16.mxu0 %v666_v22  ;;  %1603 = vmatpush1.bf16.msra.mxu0 %v5853_v39  ;;  %v599_v39 = vld [vmem:[#allocation8 + $0x7c] sm:$0xf]  ;;  %v696_v22 = vld [vmem:[#allocation2 + $0x180] sm:$0xff] }
 0x1e9   :  { %1604 = vmatprep.subr.bf16.mxu0 %v5858_v15  ;;  %v623_v32 = vpack.c.bf16 %v599_v39, %v598_v10  ;;  %v607_v15 = vld [vmem:[#allocation8 + $0xbc] sm:$0xf]  ;;  %v5895_v39 = vld [vmem:[#allocation14 + $0xa4] ss:$8 sps:$4 sm:$0xff]  }
 0x1ea   :  { %v677_v26 = vld [vmem:[#allocation2 + $0xe8] sm:$0xff] }
 0x1eb   :  { %639 = vst [vmem:[#allocation2 + $0x138] sm:$0x3f] %v623_v32  ;;  %v5894_v10 = vld [vmem:[#allocation14 + $0x90] ss:$8 sps:$4 sm:$0xff]   ;;  %v5898_v32 = vld [vmem:[#allocation14 + $0xb4] ss:$8 sps:$4 sm:$0xff]  }
 0x1ec   :  { %1605 = vmatpush1.bf16.msra.mxu0 %v5856_v19  ;;  %v716_v19 = vld [vmem:[#allocation2 + $0x220] sm:$0xff] }
 0x1ed   :  { %1606 = vmatprep.subr.bf16.mxu0 %v5861_v47  ;;  %v615_v47 = vld [vmem:[#allocation8 + $0xfc] sm:$0xf] }
 0x1ef   :  { %1464 = vmatmul.mubr.bf16.gmra.mrb[12].mxu0 %v665_v24  ;;  %v726_v24 = vld [vmem:[#allocation2 + $0x270] sm:$0xff] }
 0x1f0   :  { %1473 = vmatprep.mubr.bf16.mxu0 %v556_v31  ;;  %1607 = vmatpush1.bf16.msra.mxu0 %v5859_v27  ;;  %v7152_v31 = vld [vmem:[#allocation8 + $0x6c] sm:$0xff] }
 0x1f1   :  { %1608 = vmatprep.subr.bf16.mxu0 %v5864_v42  ;;  %v622_v59 = vpack.c.bf16 %v7152_v31, %v7150_v34  ;;  %v5870_v27 = vld [vmem:[#allocation14 + $0x10] ss:$8 sps:$4 sm:$0xff]   ;;  %v5871_v42 = vld [vmem:[#allocation14 + $0x24] ss:$8 sps:$4 sm:$0xff]   ;;  %v5891_v34 = vld [vmem:[#allocation14 + $0x80] ss:$8 sps:$4 sm:$0xff]  }
 0x1f4   :  { %1609 = vmatpush1.bf16.msra.mxu0 %v5862_v6  ;;  %v5873_v6 = vld [vmem:[#allocation14 + $0x20] ss:$8 sps:$4 sm:$0xff]  }
 0x1f7   :  { %1474 = vmatmul.mubr.bf16.gmra.mrb[16].mxu0 %v492_v0  ;;  %v7162_v0 = vld [vmem:[#allocation8 + $0x84] sm:$0xff] }
 0x1f8   :  { %1483 = vmatprep.mubr.bf16.mxu0 %v676_v3  ;;  %v624_v44 = vpack.c.bf16 %v7164_v21, %v7162_v0  ;;  %v5886_v3 = vld [vmem:[#allocation14 + $0x74] ss:$8 sps:$4 sm:$0xff]   ;;  %v5900_v0 = vld [vmem:[#allocation14 + $0xb0] ss:$8 sps:$4 sm:$0xff]   ;;  %v5901_v21 = vld [vmem:[#allocation14 + $0xc4] ss:$8 sps:$4 sm:$0xff]  }
 0x1ff   :  { %1484 = vmatmul.mubr.bf16.gmra.mrb[20].mxu0 %v675_v30  ;;  %v5889_v30 = vld [vmem:[#allocation14 + $0x84] ss:$8 sps:$4 sm:$0xff]  }
 0x200   :  { %1493 = vmatprep.mubr.bf16.mxu0 %v558_v46  ;;  %v602_v46 = vld [vmem:[#allocation8 + $0x94] sm:$0xff] }
 0x201   :  { %v625_v48 = vpack.c.bf16 %v603_v12, %v602_v46  ;;  %v5904_v46 = vld [vmem:[#allocation14 + $0xd4] ss:$8 sps:$4 sm:$0xff]   ;;  %v5906_v12 = vld [vmem:[#allocation14 + $0xd0] ss:$8 sps:$4 sm:$0xff]  }
 0x203   :  { %641 = vst [vmem:[#allocation2 + $0x188] sm:$0x3f] %v625_v48  ;;  %v5909_v48 = vld [vmem:[#allocation14 + $0xe0] ss:$8 sps:$4 sm:$0xff]  }
 0x207   :  { %1494 = vmatmul.mubr.bf16.gmra.mrb[24].mxu0 %v494_v20  ;;  %v7174_v20 = vld [vmem:[#allocation8 + $0xa4] sm:$0xff] }
 0x208   :  { %1503 = vmatprep.mubr.bf16.mxu0 %v686_v41  ;;  %v626_v58 = vpack.c.bf16 %v7176_v54, %v7174_v20  ;;  %v5897_v41 = vld [vmem:[#allocation14 + $0xa0] ss:$8 sps:$4 sm:$0xff]   ;;  %v5912_v20 = vld [vmem:[#allocation14 + $0xf0] ss:$8 sps:$4 sm:$0xff]   ;;  %v1789_v54 = vlaneseq }
 0x20a   :  { %v697_v8 = vld [vmem:[#allocation2 + $0x188] sm:$0xff] }
 0x20f   :  { %1504 = vmatmul.mubr.bf16.gmra.mrb[28].mxu0 %v685_v35 }
 0x210   :  { %1513 = vmatprep.mubr.bf16.mxu0 %v560_v60  ;;  %v606_v60 = vld [vmem:[#allocation8 + $0xb4] sm:$0xff] }
 0x211   :  { %v627_v63 = vpack.c.bf16 %v607_v15, %v606_v60  ;;  %v5915_v60 = vld [vmem:[#allocation14 + $0x104] ss:$8 sps:$4 sm:$0xff]  }
 0x213   :  { %643 = vst [vmem:[#allocation2 + $0x1d8] sm:$0x3f] %v627_v63 }
 0x217   :  { %1514 = vmatmul.mubr.bf16.gmra.mrb[32].mxu0 %v496_v25  ;;  %v7186_v25 = vld [vmem:[#allocation8 + $0xc4] sm:$0xff] }
 0x218   :  { %1523 = vmatprep.mubr.bf16.mxu0 %v696_v22  ;;  %v628_v9 = vpack.c.bf16 %v7188_v49, %v7186_v25  ;;  %v5907_v22 = vld [vmem:[#allocation14 + $0xe4] ss:$8 sps:$4 sm:$0xff]  }
 0x21f   :  { %1524 = vmatmul.mubr.bf16.gmra.mrb[36].mxu0 %v695_v50  ;;  %v5910_v50 = vld [vmem:[#allocation14 + $0xf4] ss:$8 sps:$4 sm:$0xff]  }
 0x220   :  { %1533 = vmatprep.mubr.bf16.mxu0 %v562_v53  ;;  %v610_v53 = vld [vmem:[#allocation8 + $0xd4] sm:$0xff] }
 0x221   :  { %v629_v29 = vpack.c.bf16 %v611_v52, %v610_v53 }
 0x223   :  { %645 = vst [vmem:[#allocation2 + $0x228] sm:$0x3f] %v629_v29 }
 0x227   :  { %1534 = vmatmul.mubr.bf16.gmra.mrb[40].mxu0 %v498_v13  ;;  %v7198_v13 = vld [vmem:[#allocation8 + $0xe4] sm:$0xff] }
 0x228   :  { %1543 = vmatprep.mubr.bf16.mxu0 %v706_v51  ;;  %v630_v38 = vpack.c.bf16 %v7200_v33, %v7198_v13  ;;  %v1787_v51 = vld [vmem:[#allocation13] sm:$0x3] }
 0x22a   :  { %v717_v31 = vld [vmem:[#allocation2 + $0x228] sm:$0xff] }
 0x22f   :  { %1544 = vmatmul.mubr.bf16.gmra.mrb[44].mxu0 %v705_v2 }
 0x230   :  { %1553 = vmatprep.mubr.bf16.mxu0 %v564_v62  ;;  %v614_v62 = vld [vmem:[#allocation8 + $0xf4] sm:$0xff] }
 0x231   :  { %v631_v43 = vpack.c.bf16 %v615_v47, %v614_v62 }
 0x233   :  { %647 = vst [vmem:[#allocation2 + $0x278] sm:$0x3f] %v631_v43 }
 0x237   :  { %1554 = vmatmul.mubr.bf16.gmra.mrb[48].mxu0 %v500_v36  ;;  %v5865_v36 = vld [vmem:[#allocation14 + $0x4] ss:$8 sps:$4 sm:$0xff]  }
 0x238   :  { %1563 = vmatprep.mubr.bf16.mxu0 %v716_v19  ;;  %3119 = vmatprep.subr.bf16.mxu1 %v5865_v36 }
 0x239   :  { %3120 = vmatpush1.bf16.msra.mxu1 %v5867_v57 }
 0x23a   :  { %3121 = vmatprep.subr.bf16.mxu1 %v5868_v1  ;;  %v727_v35 = vld [vmem:[#allocation2 + $0x278] sm:$0xff] }
 0x23d   :  { %3122 = vmatpush1.bf16.msra.mxu1 %v5870_v27 }
 0x23e   :  { %3123 = vmatprep.subr.bf16.mxu1 %v5871_v42 }
 0x23f   :  { %1564 = vmatmul.mubr.bf16.gmra.mrb[52].mxu0 %v715_v40 }
 0x240   :  { %1573 = vmatprep.mubr.bf16.mxu0 %v566_v16  ;;  %v7541_v16 = vmov 0  }
 0x241   :  { %3124 = vmatpush1.bf16.msra.mxu1 %v5873_v6 }
 0x242   :  { %3125 = vmatprep.subr.bf16.mxu1 %v5874_v37 }
 0x245   :  { %3126 = vmatpush1.bf16.msra.mxu1 %v5876_v45 }
 0x247   :  { %1574 = vmatmul.mubr.bf16.gmra.mrb[56].mxu0 %v502_v61  ;;  %v5877_v61 = vld [vmem:[#allocation14 + $0x44] ss:$8 sps:$4 sm:$0xff]  }
 0x248   :  { %1583 = vmatprep.mubr.bf16.mxu0 %v726_v24  ;;  %3127 = vmatprep.subr.bf16.mxu1 %v5877_v61 }
 0x249   :  { %3128 = vmatpush1.bf16.msra.mxu1 %v5879_v56 }
 0x24a   :  { %3129 = vmatprep.subr.bf16.mxu1 %v5880_v18 }
 0x24d   :  { %3130 = vmatpush1.bf16.msra.mxu1 %v5882_v55 }
 0x24e   :  { %3131 = vmatprep.subr.bf16.mxu1 %v5883_v4 }
 0x24f   :  { %1584 = vmatmul.mubr.bf16.gmra.mrb[60].mxu0 %v725_v11 }
 0x250   :  { %1626 = vmatprep.mubr.bf16.mxu0 %v7541_v16 }
 0x257   :  { %1627 = vmatmul.mubr.bf16.vlgmr.msra.gmra.mrb[0].mxu0 %v616_v14  ;;  %v687_v14 = vld [vmem:[#allocation2 + $0x138] sm:$0xff] }
 0x258   :  { %1636 = vmatprep.mubr.bf16.mxu0 %v7541_v16 }
 0x25f   :  { %1637 = vmatmul.mubr.bf16.gmra.mrb[4].mxu0 %v657_v17 }
 0x260   :  { %1646 = vmatprep.mubr.bf16.mxu0 %v7541_v16 }
 0x267   :  { %1647 = vmatmul.mubr.bf16.gmra.mrb[8].mxu0 %v618_v28  ;;  %v707_v28 = vld [vmem:[#allocation2 + $0x1d8] sm:$0xff] }
 0x268   :  { %1656 = vmatprep.mubr.bf16.mxu0 %v7541_v16 }
 0x26f   :  { %1657 = vmatmul.mubr.bf16.gmra.mrb[12].mxu0 %v667_v23 }
 0x270   :  { %1666 = vmatprep.mubr.bf16.mxu0 %v7541_v16 }
 0x277   :  { %1667 = vmatmul.mubr.bf16.gmra.mrb[16].mxu0 %v620_v7  ;;  %v5885_v7 = vld [vmem:[#allocation14 + $0x60] ss:$8 sps:$4 sm:$0xff]  }
 0x278   :  { %1676 = vmatprep.mubr.bf16.mxu0 %v7541_v16  ;;  %3132 = vmatpush1.bf16.msra.mxu1 %v5885_v7 }
 0x279   :  { %3133 = vmatprep.subr.bf16.mxu1 %v5886_v3 }
 0x27c   :  { %3134 = vmatpush1.bf16.msra.mxu1 %v5888_v5 }
 0x27d   :  { %3135 = vmatprep.subr.bf16.mxu1 %v5889_v30 }
 0x27f   :  { %1677 = vmatmul.mubr.bf16.gmra.mrb[20].mxu0 %v677_v26 }
 0x280   :  { %1686 = vmatprep.mubr.bf16.mxu0 %v7541_v16  ;;  %3136 = vmatpush1.bf16.msra.mxu1 %v5891_v34 }
 0x287   :  { %1687 = vmatmul.mubr.bf16.gmra.mrb[24].mxu0 %v622_v59  ;;  %v5892_v59 = vld [vmem:[#allocation14 + $0x94] ss:$8 sps:$4 sm:$0xff]  }
 0x288   :  { %1696 = vmatprep.mubr.bf16.mxu0 %v7541_v16  ;;  %3137 = vmatprep.subr.bf16.mxu1 %v5892_v59 }
 0x289   :  { %3138 = vmatpush1.bf16.msra.mxu1 %v5894_v10 }
 0x28a   :  { %3139 = vmatprep.subr.bf16.mxu1 %v5895_v39 }
 0x28d   :  { %3140 = vmatpush1.bf16.msra.mxu1 %v5897_v41 }
 0x28e   :  { %3141 = vmatprep.subr.bf16.mxu1 %v5898_v32 }
 0x28f   :  { %1697 = vmatmul.mubr.bf16.gmra.mrb[28].mxu0 %v687_v14 }
 0x290   :  { %1706 = vmatprep.mubr.bf16.mxu0 %v7541_v16 }
 0x291   :  { %3142 = vmatpush1.bf16.msra.mxu1 %v5900_v0 }
 0x292   :  { %3143 = vmatprep.subr.bf16.mxu1 %v5901_v21 }
 0x297   :  { %1707 = vmatmul.mubr.bf16.gmra.mrb[32].mxu0 %v624_v44  ;;  %v5903_v44 = vld [vmem:[#allocation14 + $0xc0] ss:$8 sps:$4 sm:$0xff]  }
 0x298   :  { %1716 = vmatprep.mubr.bf16.mxu0 %v7541_v16  ;;  %3144 = vmatpush1.bf16.msra.mxu1 %v5903_v44 }
 0x299   :  { %3145 = vmatprep.subr.bf16.mxu1 %v5904_v46 }
 0x29c   :  { %3146 = vmatpush1.bf16.msra.mxu1 %v5906_v12 }
 0x29d   :  { %3147 = vmatprep.subr.bf16.mxu1 %v5907_v22 }
 0x29f   :  { %1717 = vmatmul.mubr.bf16.gmra.mrb[36].mxu0 %v697_v8 }
 0x2a0   :  { %1726 = vmatprep.mubr.bf16.mxu0 %v7541_v16  ;;  %3148 = vmatpush1.bf16.msra.mxu1 %v5909_v48 }
 0x2a1   :  { %3149 = vmatprep.subr.bf16.mxu1 %v5910_v50 }
 0x2a4   :  { %3150 = vmatpush1.bf16.msra.mxu1 %v5912_v20 }
 0x2a5   :  { %3232 = vmatprep.subr.bf16.mxu1 %v5915_v60 }
 0x2a7   :  { %1727 = vmatmul.mubr.bf16.gmra.mrb[40].mxu0 %v626_v58  ;;  %v1790_v58 = vshrl.u32 %v1789_v54, 7 }
 0x2a8   :  { %1736 = vmatprep.mubr.bf16.mxu0 %v7541_v16 }
 0x2a9   :  { %v7247_v15 = vsub.s32 0, %v1790_v58  ;;  %v7249_v63 = vsub.s32 1, %v1790_v58 }
 0x2ab   :  { %v7252_v2 = vrot.slane %v1787_v51, %v7247_v15  ;;  %v7255_v25 = vrot.slane %v1787_v51, %v7249_v63 }
 0x2af   :  { %1737 = vmatmul.mubr.bf16.gmra.mrb[44].mxu0 %v707_v28 }
 0x2b0   :  { %1746 = vmatprep.mubr.bf16.mxu0 %v7541_v16 }
 0x2b7   :  { %1747 = vmatmul.mubr.bf16.gmra.mrb[48].mxu0 %v628_v9 }
 0x2b8   :  { %1756 = vmatprep.mubr.bf16.mxu0 %v7541_v16 }
 0x2bf   :  { %1757 = vmatmul.mubr.bf16.gmra.mrb[52].mxu0 %v717_v31 }
 0x2c0   :  { %1766 = vmatprep.mubr.bf16.mxu0 %v7541_v16 }
 0x2c7   :  { %1767 = vmatmul.mubr.bf16.gmra.mrb[56].mxu0 %v630_v38 }
 0x2c8   :  { %1776 = vmatprep.mubr.bf16.mxu0 %v7541_v16 }
 0x2cf   :  { %1777 = vmatmul.mubr.bf16.gmra.mrb[60].mxu0 %v727_v35 }
 0x32a   :  { %v1628_v49 = vpop.f32.mrb[0].mxu0 }
 0x32b   :  { %v1799_v9 = vadd.f32 %v7252_v2, %v1628_v49  ;;  %v1630_v53 = vpop.f32.mrb[1].mxu0 }
 0x32c   :  { %v1800_v52 = vadd.f32 %v7255_v25, %v1630_v53  ;;  %v1632_v19 = vpop.f32.mrb[2].mxu0 }
 0x32d   :  { %v1863_v29 = vmax.f32 %v1799_v9, 0.0  ;;  %v1801_v40 = vadd.f32 %v7252_v2, %v1632_v19  ;;  %v1634_v13 = vpop.f32.mrb[3].mxu0 }
 0x32e   :  { %v1864_v33 = vmax.f32 %v1800_v52, 0.0  ;;  %v1802_v38 = vadd.f32 %v7255_v25, %v1634_v13 }
 0x32f   :  { %v1865_v62 = vmax.f32 %v1801_v40, 0.0 }
 0x330   :  { %v1927_v47 = vmax.f32 %v1863_v29, %v1864_v33  ;;  %v1866_v24 = vmax.f32 %v1802_v38, 0.0 }
 0x332   :  { %1959 = vst [vmem:[#allocation5] sm:$0xff] %v1927_v47  ;;  %v1928_v43 = vmax.f32 %v1865_v62, %v1866_v24  ;;  %v1638_v11 = vpop.f32.mrb[4].mxu0 }
 0x333   :  { %v1803_v36 = vadd.f32 %v7252_v2, %v1638_v11  ;;  %v1640_v57 = vpop.f32.mrb[5].mxu0 }
 0x334   :  { %1960 = vst [vmem:[#allocation5 + $0x8] sm:$0xff] %v1928_v43  ;;  %v1804_v1 = vadd.f32 %v7255_v25, %v1640_v57  ;;  %v1642_v27 = vpop.f32.mrb[6].mxu0 }
 0x335   :  { %v1867_v42 = vmax.f32 %v1803_v36, 0.0  ;;  %v1805_v6 = vadd.f32 %v7252_v2, %v1642_v27  ;;  %v1644_v37 = vpop.f32.mrb[7].mxu0 }
 0x336   :  { %v1868_v45 = vmax.f32 %v1804_v1, 0.0  ;;  %v1806_v61 = vadd.f32 %v7255_v25, %v1644_v37 }
 0x337   :  { %v1869_v17 = vmax.f32 %v1805_v6, 0.0 }
 0x338   :  { %v1929_v56 = vmax.f32 %v1867_v42, %v1868_v45  ;;  %v1870_v23 = vmax.f32 %v1806_v61, 0.0 }
 0x339   :  { %v1991_v26 = vld [vmem:[#allocation5] sm:$0x1]  ;;  %v1999_v14 = vld [vmem:[#allocation5 + $0x1] sm:$0x1]  ;;  %v2023_v8 = vld [vmem:[#allocation5 + $0x2] sm:$0x1] }
 0x33a   :  { %v2007_v18 = vmax.f32 %v1991_v26, %v1999_v14  ;;  %v2031_v28 = vld [vmem:[#allocation5 + $0x3] sm:$0x1]  ;;  %v2055_v55 = vld [vmem:[#allocation5 + $0x4] sm:$0x1]  ;;  %v2063_v4 = vld [vmem:[#allocation5 + $0x5] sm:$0x1]  ;;  %v1930_v7 = vmax.f32 %v1869_v17, %v1870_v23 }
 0x33b   :  { %1961 = vst [vmem:[#allocation5 + $0x10] sm:$0xff] %v1929_v56  ;;  %v2039_v3 = vmax.f32 %v2023_v8, %v2031_v28  ;;  %v2071_v5 = vmax.f32 %v2055_v55, %v2063_v4  ;;  %v2087_v30 = vld [vmem:[#allocation5 + $0x6] sm:$0x1]  ;;  %v2095_v34 = vld [vmem:[#allocation5 + $0x7] sm:$0x1]  ;;  %v1648_v22 = vpop.f32.mrb[8].mxu0 }
 0x33c   :  { %v2119_v31 = vld [vmem:[#allocation5 + $0x8] sm:$0x1]  ;;  %2015 = vst [vmem:[#allocation6] sm:$0x1] %v2007_v18  ;;  %v2103_v59 = vmax.f32 %v2087_v30, %v2095_v34  ;;  %v2127_v10 = vld [vmem:[#allocation5 + $0x9] sm:$0x1]  ;;  %v1807_v51 = vadd.f32 %v7252_v2, %v1648_v22 }
 0x33d   :  { %v2151_v39 = vld [vmem:[#allocation5 + $0xa] sm:$0x1]  ;;  %v2159_v41 = vld [vmem:[#allocation5 + $0xb] sm:$0x1]  ;;  %1962 = vst [vmem:[#allocation5 + $0x18] sm:$0xf] %v1930_v7  ;;  %v2135_v32 = vmax.f32 %v2119_v31, %v2127_v10 }
 0x33e   :  { %2047 = vst [vmem:[#allocation6 + $0x1] sm:$0x1] %v2039_v3  ;;  %2079 = vst [vmem:[#allocation6 + $0x2] sm:$0x1] %v2071_v5  ;;  %v2167_v35 = vmax.f32 %v2151_v39, %v2159_v41  ;;  %v2183_v0 = vld [vmem:[#allocation5 + $0xc] sm:$0x1] }
 0x33f   :  { %v2191_v21 = vld [vmem:[#allocation5 + $0xd] sm:$0x1]  ;;  %v2215_v44 = vld [vmem:[#allocation5 + $0xe] sm:$0x1]  ;;  %2111 = vst [vmem:[#allocation6 + $0x3] sm:$0x1] %v2103_v59 }
 0x340   :  { %v2199_v46 = vmax.f32 %v2183_v0, %v2191_v21  ;;  %v2223_v12 = vld [vmem:[#allocation5 + $0xf] sm:$0x1]  ;;  %2143 = vst [vmem:[#allocation6 + $0x4] sm:$0x1] %v2135_v32  ;;  %2175 = vst [vmem:[#allocation6 + $0x5] sm:$0x1] %v2167_v35 }
 0x341   :  { %v2231_v48 = vmax.f32 %v2215_v44, %v2223_v12  ;;  %v1650_v50 = vpop.f32.mrb[9].mxu0  ;;  %v1871_v1 = vmax.f32 %v1807_v51, 0.0 }
 0x342   :  { %2207 = vst [vmem:[#allocation6 + $0x6] sm:$0x1] %v2199_v46  ;;  %v1652_v20 = vpop.f32.mrb[10].mxu0  ;;  %v2247_v54 = vld [vmem:[#allocation5 + $0x10] sm:$0x1]  ;;  %v1808_v49 = vadd.f32 %v7255_v25, %v1650_v50 }
 0x343   :  { %2239 = vst [vmem:[#allocation6 + $0x7] sm:$0x1] %v2231_v48  ;;  %v2255_v58 = vld [vmem:[#allocation5 + $0x11] sm:$0x1]  ;;  %v2279_v60 = vld [vmem:[#allocation5 + $0x12] sm:$0x1]  ;;  %v1809_v29 = vadd.f32 %v7252_v2, %v1652_v20 }
 0x344   :  { %v2263_v9 = vmax.f32 %v2247_v54, %v2255_v58  ;;  %v2287_v53 = vld [vmem:[#allocation5 + $0x13] sm:$0x1]  ;;  %v2311_v52 = vld [vmem:[#allocation5 + $0x14] sm:$0x1]  ;;  %v2319_v19 = vld [vmem:[#allocation5 + $0x15] sm:$0x1] }
 0x345   :  { %v2295_v40 = vmax.f32 %v2279_v60, %v2287_v53  ;;  %v2327_v13 = vmax.f32 %v2311_v52, %v2319_v19  ;;  %v2343_v33 = vld [vmem:[#allocation5 + $0x16] sm:$0x1]  ;;  %v2351_v38 = vld [vmem:[#allocation5 + $0x17] sm:$0x1]  ;;  %v2375_v62 = vld [vmem:[#allocation5 + $0x18] sm:$0x1] }
 0x346   :  { %2271 = vst [vmem:[#allocation6 + $0x8] sm:$0x1] %v2263_v9  ;;  %v2359_v47 = vmax.f32 %v2343_v33, %v2351_v38  ;;  %v2383_v24 = vld [vmem:[#allocation5 + $0x19] sm:$0x1]  ;;  %v2407_v43 = vld [vmem:[#allocation5 + $0x1a] sm:$0x1] }
 0x347   :  { %v2415_v11 = vld [vmem:[#allocation5 + $0x1b] sm:$0x1]  ;;  %2303 = vst [vmem:[#allocation6 + $0x9] sm:$0x1] %v2295_v40  ;;  %2335 = vst [vmem:[#allocation6 + $0xa] sm:$0x1] %v2327_v13  ;;  %v2391_v36 = vmax.f32 %v2375_v62, %v2383_v24 }
 0x348   :  { %v2423_v57 = vmax.f32 %v2407_v43, %v2415_v11  ;;  %v1872_v27 = vmax.f32 %v1808_v49, 0.0  ;;  %v1654_v42 = vpop.f32.mrb[11].mxu0  ;;  %2367 = vst [vmem:[#allocation6 + $0xb] sm:$0x1] %v2359_v47  ;;  %v1873_v6 = vmax.f32 %v1809_v29, 0.0 }
 0x349   :  { %v1810_v37 = vadd.f32 %v7255_v25, %v1654_v42  ;;  %v1658_v45 = vpop.f32.mrb[12].mxu0  ;;  %2399 = vst [vmem:[#allocation6 + $0xc] sm:$0x1] %v2391_v36 }
 0x34a   :  { %2431 = vst [vmem:[#allocation6 + $0xd] sm:$0x1] %v2423_v57  ;;  %v1931_v61 = vmax.f32 %v1871_v1, %v1872_v27  ;;  %v1811_v17 = vadd.f32 %v7252_v2, %v1658_v45  ;;  %v1660_v56 = vpop.f32.mrb[13].mxu0  ;;  %v2439_v59 = vld [vmem:[#allocation6] sm:$0xff] }
 0x34b   :  { %v1874_v23 = vmax.f32 %v1810_v37, 0.0  ;;  %v1812_v26 = vadd.f32 %v7255_v25, %v1660_v56  ;;  %v1662_v14 = vpop.f32.mrb[14].mxu0 }
 0x34c   :  { %1963 = vst [vmem:[#allocation5 + $0x20] sm:$0xff] %v1931_v61  ;;  %v1875_v8 = vmax.f32 %v1811_v17, 0.0  ;;  %v1813_v18 = vadd.f32 %v7252_v2, %v1662_v14  ;;  %v1664_v28 = vpop.f32.mrb[15].mxu0 }
 0x34d   :  { %v1932_v55 = vmax.f32 %v1873_v6, %v1874_v23  ;;  %v1876_v4 = vmax.f32 %v1812_v26, 0.0  ;;  %v1814_v7 = vadd.f32 %v7255_v25, %v1664_v28  ;;  %v1668_v3 = vpop.f32.mrb[16].mxu0  ;;  %v2471_v31 = vld [vmem:[#allocation6 + $0x1] sm:$0xff] }
 0x34e   :  { %v1877_v5 = vmax.f32 %v1813_v18, 0.0  ;;  %v1815_v30 = vadd.f32 %v7252_v2, %v1668_v3  ;;  %v1670_v34 = vpop.f32.mrb[17].mxu0  ;;  %v2472_v35 = vld [vmem:[#allocation6 + $0x9] sm:$0x3] }
 0x34f   :  { %1964 = vst [vmem:[#allocation5 + $0x28] sm:$0xff] %v1932_v55  ;;  %v1933_v10 = vmax.f32 %v1875_v8, %v1876_v4  ;;  %v1878_v39 = vmax.f32 %v1814_v7, 0.0  ;;  %v1816_v41 = vadd.f32 %v7255_v25, %v1670_v34  ;;  %v1672_v32 = vpop.f32.mrb[18].mxu0  ;;  %v2440_v0 = vld [vmem:[#allocation6 + $0x8] sm:$0x3]  ;;  %v2487_v12 = vpack.c.bf16 %v2472_v35, %v2471_v31 }
 0x350   :  { %v1879_v21 = vmax.f32 %v1815_v30, 0.0  ;;  %v1817_v44 = vadd.f32 %v7252_v2, %v1672_v32  ;;  %v1674_v46 = vpop.f32.mrb[19].mxu0  ;;  %v2455_v22 = vpack.c.bf16 %v2440_v0, %v2439_v59  ;;  %v2503_v48 = vld [vmem:[#allocation6 + $0x2] sm:$0xff]  ;;  %v2536_v60 = vld [vmem:[#allocation6 + $0xb] sm:$0x3] }
 0x351   :  { %1965 = vst [vmem:[#allocation5 + $0x30] sm:$0xff] %v1933_v10  ;;  %v1934_v50 = vmax.f32 %v1877_v5, %v1878_v39  ;;  %v1880_v20 = vmax.f32 %v1816_v41, 0.0  ;;  %v1818_v54 = vadd.f32 %v7255_v25, %v1674_v46  ;;  %v2535_v58 = vld [vmem:[#allocation6 + $0x3] sm:$0xff]  ;;  %2495 = vst [vmem:[#allocation3 + $0x8] sm:$0x1f] %v2487_v12 }
 0x352   :  { %v2504_v51 = vld [vmem:[#allocation6 + $0xa] sm:$0x3]  ;;  %v1881_v49 = vmax.f32 %v1817_v44, 0.0  ;;  %2463 = vst [vmem:[#allocation3] sm:$0x1f] %v2455_v22  ;;  %v2551_v9 = vpack.c.bf16 %v2536_v60, %v2535_v58  ;;  %v1678_v42 = vpop.f32.mrb[20].mxu0 }
 0x353   :  { %v2519_v53 = vpack.c.bf16 %v2504_v51, %v2503_v48  ;;  %v2567_v52 = vld [vmem:[#allocation6 + $0x4] sm:$0xff]  ;;  %v2568_v19 = vld [vmem:[#allocation6 + $0xc] sm:$0x3]  ;;  %v1992_v29 = vld [vmem:[#allocation5 + $0x20] sm:$0x1]  ;;  %v1935_v33 = vmax.f32 %v1879_v21, %v1880_v20  ;;  %v1882_v27 = vmax.f32 %v1818_v54, 0.0  ;;  %v7278_v21 = vadd.f32 %v7252_v2, %v1678_v42 }
 0x354   :  { %v2000_v40 = vld [vmem:[#allocation5 + $0x21] sm:$0x1]  ;;  %v2024_v13 = vld [vmem:[#allocation5 + $0x22] sm:$0x1]  ;;  %1966 = vst [vmem:[#allocation5 + $0x38] sm:$0xf] %v1934_v50  ;;  %v2583_v38 = vpack.c.bf16 %v2568_v19, %v2567_v52 }
 0x355   :  { %v2008_v62 = vmax.f32 %v1992_v29, %v2000_v40  ;;  %v2032_v47 = vld [vmem:[#allocation5 + $0x23] sm:$0x1]  ;;  %v2056_v24 = vld [vmem:[#allocation5 + $0x24] sm:$0x1]  ;;  %v2064_v43 = vld [vmem:[#allocation5 + $0x25] sm:$0x1]  ;;  %v1936_v14 = vmax.f32 %v1881_v49, %v1882_v27 }
 0x356   :  { %2559 = vst [vmem:[#allocation3 + $0x18] sm:$0x1f] %v2551_v9  ;;  %2527 = vst [vmem:[#allocation3 + $0x10] sm:$0x1f] %v2519_v53  ;;  %v2040_v11 = vmax.f32 %v2024_v13, %v2032_v47  ;;  %v2072_v36 = vmax.f32 %v2056_v24, %v2064_v43  ;;  %v2088_v57 = vld [vmem:[#allocation5 + $0x26] sm:$0x1] }
 0x357   :  { %v2096_v1 = vld [vmem:[#allocation5 + $0x27] sm:$0x1]  ;;  %1967 = vst [vmem:[#allocation5 + $0x40] sm:$0xff] %v1935_v33  ;;  %2591 = vst [vmem:[#allocation3 + $0x20] sm:$0x1f] %v2583_v38  ;;  %v1883_v13 = vmax.f32 %v7278_v21, 0.0 }
 0x358   :  { %2016 = vst [vmem:[#allocation6 + $0x10] sm:$0x1] %v2008_v62  ;;  %v2104_v6 = vmax.f32 %v2088_v57, %v2096_v1  ;;  %v2120_v37 = vld [vmem:[#allocation5 + $0x28] sm:$0x1]  ;;  %v2128_v45 = vld [vmem:[#allocation5 + $0x29] sm:$0x1] }
 0x359   :  { %v2152_v61 = vld [vmem:[#allocation5 + $0x2a] sm:$0x1]  ;;  %2048 = vst [vmem:[#allocation6 + $0x11] sm:$0x1] %v2040_v11  ;;  %2080 = vst [vmem:[#allocation6 + $0x12] sm:$0x1] %v2072_v36  ;;  %v2136_v17 = vmax.f32 %v2120_v37, %v2128_v45 }
 0x35a   :  { %v2160_v56 = vld [vmem:[#allocation5 + $0x2b] sm:$0x1]  ;;  %v2184_v23 = vld [vmem:[#allocation5 + $0x2c] sm:$0x1]  ;;  %v2192_v26 = vld [vmem:[#allocation5 + $0x2d] sm:$0x1] }
 0x35b   :  { %2112 = vst [vmem:[#allocation6 + $0x13] sm:$0x1] %v2104_v6  ;;  %v2168_v8 = vmax.f32 %v2152_v61, %v2160_v56  ;;  %v2200_v18 = vmax.f32 %v2184_v23, %v2192_v26  ;;  %v2216_v28 = vld [vmem:[#allocation5 + $0x2e] sm:$0x1]  ;;  %v2224_v55 = vld [vmem:[#allocation5 + $0x2f] sm:$0x1] }
 0x35c   :  { %v2248_v4 = vld [vmem:[#allocation5 + $0x30] sm:$0x1]  ;;  %2144 = vst [vmem:[#allocation6 + $0x14] sm:$0x1] %v2136_v17  ;;  %v2232_v7 = vmax.f32 %v2216_v28, %v2224_v55  ;;  %v2256_v3 = vld [vmem:[#allocation5 + $0x31] sm:$0x1] }
 0x35d   :  { %v2280_v5 = vld [vmem:[#allocation5 + $0x32] sm:$0x1]  ;;  %v2288_v30 = vld [vmem:[#allocation5 + $0x33] sm:$0x1]  ;;  %1968 = vst [vmem:[#allocation5 + $0x48] sm:$0xff] %v1936_v14  ;;  %v2264_v34 = vmax.f32 %v2248_v4, %v2256_v3  ;;  %v1680_v33 = vpop.f32.mrb[21].mxu0 }
 0x35e   :  { %2176 = vst [vmem:[#allocation6 + $0x15] sm:$0x1] %v2168_v8  ;;  %2208 = vst [vmem:[#allocation6 + $0x16] sm:$0x1] %v2200_v18  ;;  %v2296_v31 = vmax.f32 %v2280_v5, %v2288_v30  ;;  %v2312_v59 = vld [vmem:[#allocation5 + $0x34] sm:$0x1]  ;;  %v1820_v36 = vadd.f32 %v7255_v25, %v1680_v33 }
 0x35f   :  { %v2320_v10 = vld [vmem:[#allocation5 + $0x35] sm:$0x1]  ;;  %v2344_v39 = vld [vmem:[#allocation5 + $0x36] sm:$0x1]  ;;  %2240 = vst [vmem:[#allocation6 + $0x17] sm:$0x1] %v2232_v7 }
 0x360   :  { %v2328_v41 = vmax.f32 %v2312_v59, %v2320_v10  ;;  %v2352_v32 = vld [vmem:[#allocation5 + $0x37] sm:$0x1]  ;;  %v2376_v35 = vld [vmem:[#allocation5 + $0x38] sm:$0x1]  ;;  %v2384_v0 = vld [vmem:[#allocation5 + $0x39] sm:$0x1] }
 0x361   :  { %2272 = vst [vmem:[#allocation6 + $0x18] sm:$0x1] %v2264_v34  ;;  %2304 = vst [vmem:[#allocation6 + $0x19] sm:$0x1] %v2296_v31  ;;  %v2360_v44 = vmax.f32 %v2344_v39, %v2352_v32  ;;  %v2392_v46 = vmax.f32 %v2376_v35, %v2384_v0  ;;  %v2408_v12 = vld [vmem:[#allocation5 + $0x3a] sm:$0x1] }
 0x362   :  { %v2416_v22 = vld [vmem:[#allocation5 + $0x3b] sm:$0x1]  ;;  %v1993_v48 = vld [vmem:[#allocation5 + $0x40] sm:$0x1]  ;;  %v5913_v50 = vld [vmem:[#allocation14 + $0x100] ss:$8 sps:$4 sm:$0xff]  }
 0x363   :  { %2336 = vst [vmem:[#allocation6 + $0x1a] sm:$0x1] %v2328_v41  ;;  %v2424_v20 = vmax.f32 %v2408_v12, %v2416_v22  ;;  %v2001_v54 = vld [vmem:[#allocation5 + $0x41] sm:$0x1]  ;;  %v2025_v58 = vld [vmem:[#allocation5 + $0x42] sm:$0x1] }
 0x364   :  { %v2033_v60 = vld [vmem:[#allocation5 + $0x43] sm:$0x1]  ;;  %v5918_v51 = vld [vmem:[#allocation14 + $0x114] ss:$8 sps:$4 sm:$0xff]   ;;  %2368 = vst [vmem:[#allocation6 + $0x1b] sm:$0x1] %v2360_v44  ;;  %v2009_v49 = vmax.f32 %v1993_v48, %v2001_v54 }
 0x365   :  { %2400 = vst [vmem:[#allocation6 + $0x1c] sm:$0x1] %v2392_v46  ;;  %v2041_v9 = vmax.f32 %v2025_v58, %v2033_v60  ;;  %v2057_v53 = vld [vmem:[#allocation5 + $0x44] sm:$0x1]  ;;  %v2065_v52 = vld [vmem:[#allocation5 + $0x45] sm:$0x1] }
 0x366   :  { %v2089_v19 = vld [vmem:[#allocation5 + $0x46] sm:$0x1]  ;;  %2432 = vst [vmem:[#allocation6 + $0x1d] sm:$0x1] %v2424_v20  ;;  %v2073_v29 = vmax.f32 %v2057_v53, %v2065_v52  ;;  %v2097_v40 = vld [vmem:[#allocation5 + $0x47] sm:$0x1] }
 0x367   :  { %v2600_v38 = vld [vmem:[#allocation3 + $0x8] sm:$0xff]  ;;  %v2599_v62 = vld [vmem:[#allocation3] sm:$0xff]  ;;  %2017 = vst [vmem:[#allocation6 + $0x20] sm:$0x1] %v2009_v49  ;;  %2049 = vst [vmem:[#allocation6 + $0x21] sm:$0x1] %v2041_v9  ;;  %v2105_v47 = vmax.f32 %v2089_v19, %v2097_v40 }
 0x368   :  { %v2121_v24 = vld [vmem:[#allocation5 + $0x48] sm:$0x1]  ;;  %v2129_v43 = vld [vmem:[#allocation5 + $0x49] sm:$0x1]  ;;  %v2153_v11 = vld [vmem:[#allocation5 + $0x4a] sm:$0x1]  ;;  %3151 = vmatprep.mubr.bf16.mxu1 %v2600_v38 }
 0x369   :  { %v5916_v57 = vld [vmem:[#allocation14 + $0x110] ss:$8 sps:$4 sm:$0xff]   ;;  %2081 = vst [vmem:[#allocation6 + $0x22] sm:$0x1] %v2073_v29  ;;  %v2137_v1 = vmax.f32 %v2121_v24, %v2129_v43  ;;  %v2161_v27 = vld [vmem:[#allocation5 + $0x4b] sm:$0x1]  ;;  %3152 = vmatmul.mubr.bf16.vlgmr.msra.gmra.mrb[0].mxu1 %v2599_v62 }
 0x36a   :  { %v2185_v42 = vld [vmem:[#allocation5 + $0x4c] sm:$0x1]  ;;  %v2193_v6 = vld [vmem:[#allocation5 + $0x4d] sm:$0x1]  ;;  %v5921_v37 = vld [vmem:[#allocation14 + $0x124] ss:$8 sps:$4 sm:$0xff]   ;;  %v2169_v45 = vmax.f32 %v2153_v11, %v2161_v27  ;;  %3233 = vmatpush1.bf16.msra.mxu1 %v5913_v50 }
 0x36b   :  { %2113 = vst [vmem:[#allocation6 + $0x23] sm:$0x1] %v2105_v47  ;;  %v2201_v61 = vmax.f32 %v2185_v42, %v2193_v6  ;;  %v2217_v17 = vld [vmem:[#allocation5 + $0x4e] sm:$0x1]  ;;  %v2225_v56 = vld [vmem:[#allocation5 + $0x4f] sm:$0x1]  ;;  %3234 = vmatprep.subr.bf16.mxu1 %v5918_v51 }
 0x36c   :  { %v1884_v23 = vmax.f32 %v1820_v36, 0.0  ;;  %v1682_v26 = vpop.f32.mrb[22].mxu0  ;;  %2145 = vst [vmem:[#allocation6 + $0x24] sm:$0x1] %v2137_v1  ;;  %v2233_v14 = vmax.f32 %v2217_v17, %v2225_v56  ;;  %v2473_v28 = vld [vmem:[#allocation6 + $0x11] sm:$0xff] }
 0x36d   :  { %v1821_v8 = vadd.f32 %v7252_v2, %v1682_v26  ;;  %v1684_v18 = vpop.f32.mrb[23].mxu0  ;;  %v2441_v55 = vld [vmem:[#allocation6 + $0x10] sm:$0xff]  ;;  %v2442_v4 = vld [vmem:[#allocation6 + $0x18] sm:$0x3]  ;;  %2177 = vst [vmem:[#allocation6 + $0x25] sm:$0x1] %v2169_v45 }
 0x36e   :  { %2209 = vst [vmem:[#allocation6 + $0x26] sm:$0x1] %v2201_v61  ;;  %v1937_v7 = vmax.f32 %v1883_v13, %v1884_v23  ;;  %v1822_v3 = vadd.f32 %v7255_v25, %v1684_v18  ;;  %v1688_v5 = vpop.f32.mrb[24].mxu0  ;;  %v2474_v30 = vld [vmem:[#allocation6 + $0x19] sm:$0x3]  ;;  %v2456_v34 = vpack.c.bf16 %v2442_v4, %v2441_v55  ;;  %3235 = vmatpush1.bf16.msra.mxu1 %v5916_v57 }
 0x36f   :  { %2241 = vst [vmem:[#allocation6 + $0x27] sm:$0x1] %v2233_v14  ;;  %v1885_v31 = vmax.f32 %v1821_v8, 0.0  ;;  %v1823_v59 = vadd.f32 %v7252_v2, %v1688_v5  ;;  %v1690_v10 = vpop.f32.mrb[25].mxu0  ;;  %v2488_v39 = vpack.c.bf16 %v2474_v30, %v2473_v28  ;;  %v5919_v0 = vld [vmem:[#allocation14 + $0x120] ss:$8 sps:$4 sm:$0xff]   ;;  %3236 = vmatprep.subr.bf16.mxu1 %v5921_v37 }
 0x370   :  { %1969 = vst [vmem:[#allocation5 + $0x50] sm:$0xff] %v1937_v7  ;;  %v1886_v41 = vmax.f32 %v1822_v3, 0.0  ;;  %v1824_v32 = vadd.f32 %v7255_v25, %v1690_v10  ;;  %v1692_v35 = vpop.f32.mrb[26].mxu0  ;;  %2464 = vst [vmem:[#allocation3 + $0x28] sm:$0x1f] %v2456_v34  ;;  %v2537_v54 = vld [vmem:[#allocation6 + $0x13] sm:$0xff] }
 0x371   :  { %v1887_v21 = vmax.f32 %v1823_v59, 0.0  ;;  %v1825_v44 = vadd.f32 %v7252_v2, %v1692_v35  ;;  %v1694_v46 = vpop.f32.mrb[27].mxu0  ;;  %2496 = vst [vmem:[#allocation3 + $0x30] sm:$0x1f] %v2488_v39  ;;  %v5924_v12 = vld [vmem:[#allocation14 + $0x134] ss:$8 sps:$4 sm:$0xff]  }
 0x372   :  { %v1938_v22 = vmax.f32 %v1885_v31, %v1886_v41  ;;  %v1888_v48 = vmax.f32 %v1824_v32, 0.0  ;;  %v1826_v50 = vadd.f32 %v7255_v25, %v1694_v46  ;;  %v1698_v20 = vpop.f32.mrb[28].mxu0  ;;  %v2538_v58 = vld [vmem:[#allocation6 + $0x1b] sm:$0x3]  ;;  %v2505_v60 = vld [vmem:[#allocation6 + $0x12] sm:$0xff]  ;;  %3237 = vmatpush1.bf16.msra.mxu1 %v5919_v0 }
 0x373   :  { %v1889_v51 = vmax.f32 %v1825_v44, 0.0  ;;  %v1827_v49 = vadd.f32 %v7252_v2, %v1698_v20  ;;  %v1700_v9 = vpop.f32.mrb[29].mxu0  ;;  %v2552_v53 = vpack.c.bf16 %v2538_v58, %v2537_v54  ;;  %v2506_v52 = vld [vmem:[#allocation6 + $0x1a] sm:$0x3]  ;;  %v5927_v38 = vld [vmem:[#allocation14 + $0x144] ss:$8 sps:$4 sm:$0xff]   ;;  %3238 = vmatprep.subr.bf16.mxu1 %v5924_v12 }
 0x374   :  { %1970 = vst [vmem:[#allocation5 + $0x58] sm:$0xf] %v1938_v22  ;;  %v1939_v19 = vmax.f32 %v1887_v21, %v1888_v48  ;;  %v1890_v29 = vmax.f32 %v1826_v50, 0.0  ;;  %v1828_v40 = vadd.f32 %v7255_v25, %v1700_v9  ;;  %v1702_v13 = vpop.f32.mrb[30].mxu0  ;;  %v5922_v33 = vld [vmem:[#allocation14 + $0x130] ss:$8 sps:$4 sm:$0xff]   ;;  %v2520_v62 = vpack.c.bf16 %v2506_v52, %v2505_v60 }
 0x375   :  { %v1891_v47 = vmax.f32 %v1827_v49, 0.0  ;;  %v1829_v24 = vadd.f32 %v7252_v2, %v1702_v13  ;;  %v1704_v43 = vpop.f32.mrb[31].mxu0  ;;  %2560 = vst [vmem:[#allocation3 + $0x40] sm:$0x1f] %v2552_v53  ;;  %v2569_v11 = vld [vmem:[#allocation6 + $0x14] sm:$0xff] }
 0x376   :  { %v2570_v36 = vld [vmem:[#allocation6 + $0x1c] sm:$0x3]  ;;  %1971 = vst [vmem:[#allocation5 + $0x60] sm:$0xff] %v1939_v19  ;;  %v1940_v57 = vmax.f32 %v1889_v51, %v1890_v29  ;;  %v1892_v1 = vmax.f32 %v1828_v40, 0.0  ;;  %v1830_v27 = vadd.f32 %v7255_v25, %v1704_v43  ;;  %2528 = vst [vmem:[#allocation3 + $0x38] sm:$0x1f] %v2520_v62  ;;  %3239 = vmatpush1.bf16.msra.mxu1 %v5922_v33 }
 0x377   :  { %v2584_v42 = vpack.c.bf16 %v2570_v36, %v2569_v11  ;;  %v2249_v6 = vld [vmem:[#allocation5 + $0x50] sm:$0x1]  ;;  %v2257_v37 = vld [vmem:[#allocation5 + $0x51] sm:$0x1]  ;;  %v2281_v45 = vld [vmem:[#allocation5 + $0x52] sm:$0x1]  ;;  %3240 = vmatprep.subr.bf16.mxu1 %v5927_v38 }
 0x378   :  { %v5925_v61 = vld [vmem:[#allocation14 + $0x140] ss:$8 sps:$4 sm:$0xff]   ;;  %v2265_v17 = vmax.f32 %v2249_v6, %v2257_v37  ;;  %v2289_v56 = vld [vmem:[#allocation5 + $0x53] sm:$0x1]  ;;  %v2313_v23 = vld [vmem:[#allocation5 + $0x54] sm:$0x1]  ;;  %v1941_v14 = vmax.f32 %v1891_v47, %v1892_v1 }
 0x379   :  { %v2321_v26 = vld [vmem:[#allocation5 + $0x55] sm:$0x1]  ;;  %1972 = vst [vmem:[#allocation5 + $0x68] sm:$0xff] %v1940_v57  ;;  %2592 = vst [vmem:[#allocation3 + $0x48] sm:$0x1f] %v2584_v42  ;;  %v2297_v8 = vmax.f32 %v2281_v45, %v2289_v56  ;;  %v1893_v4 = vmax.f32 %v1829_v24, 0.0 }
 0x37a   :  { %v2329_v18 = vmax.f32 %v2313_v23, %v2321_v26  ;;  %v2345_v28 = vld [vmem:[#allocation5 + $0x56] sm:$0x1]  ;;  %v2353_v55 = vld [vmem:[#allocation5 + $0x57] sm:$0x1]  ;;  %v1894_v7 = vmax.f32 %v1830_v27, 0.0  ;;  %1973 = vst [vmem:[#allocation5 + $0x70] sm:$0xff] %v1941_v14  ;;  %3241 = vmatpush1.bf16.msra.mxu1 %v5925_v61 }
 0x37b   :  { %2273 = vst [vmem:[#allocation6 + $0x28] sm:$0x1] %v2265_v17  ;;  %v2361_v3 = vmax.f32 %v2345_v28, %v2353_v55  ;;  %v2605_v5 = vld [vmem:[#allocation3 + $0x30] sm:$0xff]  ;;  %v2604_v30 = vld [vmem:[#allocation3 + $0x28] sm:$0xff]  ;;  %v1708_v34 = vpop.f32.mrb[32].mxu0 }
 0x37c   :  { %v5930_v31 = vld [vmem:[#allocation14 + $0x154] ss:$8 sps:$4 sm:$0xff]   ;;  %2305 = vst [vmem:[#allocation6 + $0x29] sm:$0x1] %v2297_v8  ;;  %2337 = vst [vmem:[#allocation6 + $0x2a] sm:$0x1] %v2329_v18  ;;  %v1942_v41 = vmax.f32 %v1893_v4, %v1894_v7  ;;  %3161 = vmatprep.mubr.bf16.mxu1 %v2605_v5  ;;  %v1831_v27 = vadd.f32 %v7252_v2, %v1708_v34 }
 0x37d   :  { %v2377_v59 = vld [vmem:[#allocation5 + $0x58] sm:$0x1]  ;;  %v2385_v10 = vld [vmem:[#allocation5 + $0x59] sm:$0x1]  ;;  %v2409_v39 = vld [vmem:[#allocation5 + $0x5a] sm:$0x1]  ;;  %3162 = vmatmul.mubr.bf16.gmra.mrb[4].mxu1 %v2604_v30  ;;  %3242 = vmatprep.subr.bf16.mxu1 %v5930_v31 }
 0x37e   :  { %v5928_v32 = vld [vmem:[#allocation14 + $0x150] ss:$8 sps:$4 sm:$0xff]   ;;  %2369 = vst [vmem:[#allocation6 + $0x2b] sm:$0x1] %v2361_v3  ;;  %v2393_v35 = vmax.f32 %v2377_v59, %v2385_v10  ;;  %v1710_v21 = vpop.f32.mrb[33].mxu0  ;;  %v1895_v34 = vmax.f32 %v1831_v27, 0.0 }
 0x37f   :  { %v2417_v0 = vld [vmem:[#allocation5 + $0x5b] sm:$0x1]  ;;  %v5933_v44 = vld [vmem:[#allocation14 + $0x164] ss:$8 sps:$4 sm:$0xff]   ;;  %v1994_v12 = vld [vmem:[#allocation5 + $0x60] sm:$0x1]  ;;  %3243 = vmatpush1.bf16.msra.mxu1 %v5928_v32  ;;  %v1832_v42 = vadd.f32 %v7255_v25, %v1710_v21 }
 0x380   :  { %v2425_v46 = vmax.f32 %v2409_v39, %v2417_v0  ;;  %v2002_v22 = vld [vmem:[#allocation5 + $0x61] sm:$0x1]  ;;  %v2026_v48 = vld [vmem:[#allocation5 + $0x62] sm:$0x1]  ;;  %1974 = vst [vmem:[#allocation5 + $0x78] sm:$0xf] %v1942_v41  ;;  %3244 = vmatprep.subr.bf16.mxu1 %v5933_v44 }
 0x381   :  { %2401 = vst [vmem:[#allocation6 + $0x2c] sm:$0x1] %v2393_v35  ;;  %v2010_v50 = vmax.f32 %v1994_v12, %v2002_v22  ;;  %v2034_v20 = vld [vmem:[#allocation5 + $0x63] sm:$0x1]  ;;  %v2058_v54 = vld [vmem:[#allocation5 + $0x64] sm:$0x1] }
 0x382   :  { %v2066_v58 = vld [vmem:[#allocation5 + $0x65] sm:$0x1]  ;;  %2433 = vst [vmem:[#allocation6 + $0x2d] sm:$0x1] %v2425_v46  ;;  %v2042_v60 = vmax.f32 %v2026_v48, %v2034_v20  ;;  %v2090_v49 = vld [vmem:[#allocation5 + $0x66] sm:$0x1] }
 0x383   :  { %v2074_v51 = vmax.f32 %v2058_v54, %v2066_v58  ;;  %v2098_v9 = vld [vmem:[#allocation5 + $0x67] sm:$0x1]  ;;  %v2122_v53 = vld [vmem:[#allocation5 + $0x68] sm:$0x1]  ;;  %v5931_v52 = vld [vmem:[#allocation14 + $0x160] ss:$8 sps:$4 sm:$0xff]  }
 0x384   :  { %2018 = vst [vmem:[#allocation6 + $0x30] sm:$0x1] %v2010_v50  ;;  %v2106_v19 = vmax.f32 %v2090_v49, %v2098_v9  ;;  %v2130_v29 = vld [vmem:[#allocation5 + $0x69] sm:$0x1]  ;;  %v2154_v40 = vld [vmem:[#allocation5 + $0x6a] sm:$0x1]  ;;  %3245 = vmatpush1.bf16.msra.mxu1 %v5931_v52 }
 0x385   :  { %v2162_v13 = vld [vmem:[#allocation5 + $0x6b] sm:$0x1]  ;;  %v5936_v33 = vld [vmem:[#allocation14 + $0x174] ss:$8 sps:$4 sm:$0xff]   ;;  %2050 = vst [vmem:[#allocation6 + $0x31] sm:$0x1] %v2042_v60  ;;  %v2138_v38 = vmax.f32 %v2122_v53, %v2130_v29 }
 0x386   :  { %2082 = vst [vmem:[#allocation6 + $0x32] sm:$0x1] %v2074_v51  ;;  %v2170_v62 = vmax.f32 %v2154_v40, %v2162_v13  ;;  %v2186_v47 = vld [vmem:[#allocation5 + $0x6c] sm:$0x1]  ;;  %v2194_v24 = vld [vmem:[#allocation5 + $0x6d] sm:$0x1]  ;;  %3246 = vmatprep.subr.bf16.mxu1 %v5936_v33 }
 0x387   :  { %v2218_v43 = vld [vmem:[#allocation5 + $0x6e] sm:$0x1]  ;;  %2114 = vst [vmem:[#allocation6 + $0x33] sm:$0x1] %v2106_v19  ;;  %v2202_v11 = vmax.f32 %v2186_v47, %v2194_v24  ;;  %v2226_v36 = vld [vmem:[#allocation5 + $0x6f] sm:$0x1] }
 0x388   :  { %v2250_v57 = vld [vmem:[#allocation5 + $0x70] sm:$0x1]  ;;  %v2258_v1 = vld [vmem:[#allocation5 + $0x71] sm:$0x1]  ;;  %2146 = vst [vmem:[#allocation6 + $0x34] sm:$0x1] %v2138_v38  ;;  %v2234_v6 = vmax.f32 %v2218_v43, %v2226_v36 }
 0x389   :  { %2178 = vst [vmem:[#allocation6 + $0x35] sm:$0x1] %v2170_v62  ;;  %v2266_v37 = vmax.f32 %v2250_v57, %v2258_v1  ;;  %v2282_v45 = vld [vmem:[#allocation5 + $0x72] sm:$0x1]  ;;  %v2290_v61 = vld [vmem:[#allocation5 + $0x73] sm:$0x1] }
 0x38a   :  { %v2314_v17 = vld [vmem:[#allocation5 + $0x74] sm:$0x1]  ;;  %2210 = vst [vmem:[#allocation6 + $0x36] sm:$0x1] %v2202_v11  ;;  %v2298_v23 = vmax.f32 %v2282_v45, %v2290_v61  ;;  %v2322_v26 = vld [vmem:[#allocation5 + $0x75] sm:$0x1] }
 0x38b   :  { %v5934_v56 = vld [vmem:[#allocation14 + $0x170] ss:$8 sps:$4 sm:$0xff]   ;;  %v2346_v14 = vld [vmem:[#allocation5 + $0x76] sm:$0x1]  ;;  %v2354_v8 = vld [vmem:[#allocation5 + $0x77] sm:$0x1]  ;;  %v2330_v28 = vmax.f32 %v2314_v17, %v2322_v26 }
 0x38c   :  { %v5939_v18 = vld [vmem:[#allocation14 + $0x184] ss:$8 sps:$4 sm:$0xff]   ;;  %2242 = vst [vmem:[#allocation6 + $0x37] sm:$0x1] %v2234_v6  ;;  %2274 = vst [vmem:[#allocation6 + $0x38] sm:$0x1] %v2266_v37  ;;  %v2362_v55 = vmax.f32 %v2346_v14, %v2354_v8  ;;  %3247 = vmatpush1.bf16.msra.mxu1 %v5934_v56 }
 0x38d   :  { %v2378_v4 = vld [vmem:[#allocation5 + $0x78] sm:$0x1]  ;;  %v2386_v7 = vld [vmem:[#allocation5 + $0x79] sm:$0x1]  ;;  %v2410_v3 = vld [vmem:[#allocation5 + $0x7a] sm:$0x1]  ;;  %3248 = vmatprep.subr.bf16.mxu1 %v5939_v18 }
 0x38e   :  { %2306 = vst [vmem:[#allocation6 + $0x39] sm:$0x1] %v2298_v23  ;;  %v2394_v5 = vmax.f32 %v2378_v4, %v2386_v7  ;;  %v2418_v30 = vld [vmem:[#allocation5 + $0x7b] sm:$0x1]  ;;  %v1896_v31 = vmax.f32 %v1832_v42, 0.0  ;;  %v1712_v59 = vpop.f32.mrb[34].mxu0 }
 0x38f   :  { %v2475_v10 = vld [vmem:[#allocation6 + $0x21] sm:$0xff]  ;;  %2338 = vst [vmem:[#allocation6 + $0x3a] sm:$0x1] %v2330_v28  ;;  %2370 = vst [vmem:[#allocation6 + $0x3b] sm:$0x1] %v2362_v55  ;;  %v2426_v39 = vmax.f32 %v2410_v3, %v2418_v30  ;;  %v1833_v41 = vadd.f32 %v7252_v2, %v1712_v59  ;;  %v1714_v32 = vpop.f32.mrb[35].mxu0 }
 0x390   :  { %v2476_v35 = vld [vmem:[#allocation6 + $0x29] sm:$0x3]  ;;  %v2443_v0 = vld [vmem:[#allocation6 + $0x20] sm:$0xff]  ;;  %2402 = vst [vmem:[#allocation6 + $0x3c] sm:$0x1] %v2394_v5  ;;  %v1943_v44 = vmax.f32 %v1895_v34, %v1896_v31  ;;  %v1834_v46 = vadd.f32 %v7255_v25, %v1714_v32  ;;  %v1718_v12 = vpop.f32.mrb[36].mxu0 }
 0x391   :  { %v2444_v21 = vld [vmem:[#allocation6 + $0x28] sm:$0x3]  ;;  %v2489_v22 = vpack.c.bf16 %v2476_v35, %v2475_v10  ;;  %v2540_v20 = vld [vmem:[#allocation6 + $0x2b] sm:$0x3]  ;;  %2434 = vst [vmem:[#allocation6 + $0x3d] sm:$0x1] %v2426_v39  ;;  %v1835_v60 = vadd.f32 %v7252_v2, %v1718_v12 }
 0x392   :  { %v2457_v48 = vpack.c.bf16 %v2444_v21, %v2443_v0  ;;  %v2539_v50 = vld [vmem:[#allocation6 + $0x23] sm:$0xff]  ;;  %v1897_v58 = vmax.f32 %v1833_v41, 0.0  ;;  %v1720_v51 = vpop.f32.mrb[37].mxu0  ;;  %1975 = vst [vmem:[#allocation5 + $0x80] sm:$0xff] %v1943_v44  ;;  %v1898_v52 = vmax.f32 %v1834_v46, 0.0 }
 0x393   :  { %v2507_v54 = vld [vmem:[#allocation6 + $0x22] sm:$0xff]  ;;  %v2553_v9 = vpack.c.bf16 %v2540_v20, %v2539_v50  ;;  %v2508_v53 = vld [vmem:[#allocation6 + $0x2a] sm:$0x3]  ;;  %v1836_v19 = vadd.f32 %v7255_v25, %v1720_v51  ;;  %v1722_v29 = vpop.f32.mrb[38].mxu0  ;;  %2497 = vst [vmem:[#allocation3 + $0x58] sm:$0x1f] %v2489_v22 }
 0x394   :  { %v5937_v49 = vld [vmem:[#allocation14 + $0x180] ss:$8 sps:$4 sm:$0xff]   ;;  %2465 = vst [vmem:[#allocation3 + $0x50] sm:$0x1f] %v2457_v48  ;;  %v5942_v40 = vld [vmem:[#allocation14 + $0x194] ss:$8 sps:$4 sm:$0xff]   ;;  %v2521_v13 = vpack.c.bf16 %v2508_v53, %v2507_v54  ;;  %v1837_v38 = vadd.f32 %v7252_v2, %v1722_v29  ;;  %v1944_v24 = vmax.f32 %v1897_v58, %v1898_v52 }
 0x395   :  { %v1899_v33 = vmax.f32 %v1835_v60, 0.0  ;;  %v1724_v62 = vpop.f32.mrb[39].mxu0  ;;  %v5940_v47 = vld [vmem:[#allocation14 + $0x190] ss:$8 sps:$4 sm:$0xff]   ;;  %2561 = vst [vmem:[#allocation3 + $0x68] sm:$0x1f] %v2553_v9  ;;  %3249 = vmatpush1.bf16.msra.mxu1 %v5937_v49 }
 0x396   :  { %v1900_v43 = vmax.f32 %v1836_v19, 0.0  ;;  %v1838_v11 = vadd.f32 %v7255_v25, %v1724_v62  ;;  %v1728_v36 = vpop.f32.mrb[40].mxu0  ;;  %v2477_v57 = vld [vmem:[#allocation6 + $0x31] sm:$0xff]  ;;  %2529 = vst [vmem:[#allocation3 + $0x60] sm:$0x1f] %v2521_v13  ;;  %v2571_v27 = vld [vmem:[#allocation6 + $0x24] sm:$0xff]  ;;  %3250 = vmatprep.subr.bf16.mxu1 %v5942_v40 }
 0x397   :  { %v5945_v1 = vld [vmem:[#allocation14 + $0x1a4] ss:$8 sps:$4 sm:$0xff]   ;;  %v2572_v42 = vld [vmem:[#allocation6 + $0x2c] sm:$0x3]  ;;  %v1901_v6 = vmax.f32 %v1837_v38, 0.0  ;;  %v1839_v37 = vadd.f32 %v7252_v2, %v1728_v36  ;;  %v1730_v45 = vpop.f32.mrb[41].mxu0 }
 0x398   :  { %v2445_v61 = vld [vmem:[#allocation6 + $0x30] sm:$0xff]  ;;  %v2446_v17 = vld [vmem:[#allocation6 + $0x38] sm:$0x3]  ;;  %v2585_v56 = vpack.c.bf16 %v2572_v42, %v2571_v27  ;;  %1976 = vst [vmem:[#allocation5 + $0x88] sm:$0xff] %v1944_v24  ;;  %v1945_v23 = vmax.f32 %v1899_v33, %v1900_v43  ;;  %v1902_v26 = vmax.f32 %v1838_v11, 0.0  ;;  %v1840_v14 = vadd.f32 %v7255_v25, %v1730_v45  ;;  %v1732_v8 = vpop.f32.mrb[42].mxu0 }
 0x399   :  { %v2478_v18 = vld [vmem:[#allocation6 + $0x39] sm:$0x3]  ;;  %v2458_v28 = vpack.c.bf16 %v2446_v17, %v2445_v61  ;;  %v1903_v7 = vmax.f32 %v1839_v37, 0.0  ;;  %v7303_v3 = vadd.f32 %v7252_v2, %v1732_v8  ;;  %v1734_v5 = vpop.f32.mrb[43].mxu0  ;;  %v2542_v34 = vld [vmem:[#allocation6 + $0x3b] sm:$0x3]  ;;  %3251 = vmatpush1.bf16.msra.mxu1 %v5940_v47 }
 0x39a   :  { %v2541_v55 = vld [vmem:[#allocation6 + $0x33] sm:$0xff]  ;;  %v2490_v30 = vpack.c.bf16 %v2478_v18, %v2477_v57  ;;  %2593 = vst [vmem:[#allocation3 + $0x70] sm:$0x1f] %v2585_v56  ;;  %1977 = vst [vmem:[#allocation5 + $0x90] sm:$0xff] %v1945_v23  ;;  %v1946_v59 = vmax.f32 %v1901_v6, %v1902_v26  ;;  %v1904_v10 = vmax.f32 %v1840_v14, 0.0  ;;  %v1842_v39 = vadd.f32 %v7255_v25, %v1734_v5  ;;  %v1738_v41 = vpop.f32.mrb[44].mxu0 }
 0x39b   :  { %v2509_v4 = vld [vmem:[#allocation6 + $0x32] sm:$0xff]  ;;  %v2510_v31 = vld [vmem:[#allocation6 + $0x3a] sm:$0x3]  ;;  %2466 = vst [vmem:[#allocation3 + $0x78] sm:$0x1f] %v2458_v28  ;;  %v2554_v35 = vpack.c.bf16 %v2542_v34, %v2541_v55  ;;  %v7307_v22 = vadd.f32 %v7252_v2, %v1738_v41  ;;  %3252 = vmatprep.subr.bf16.mxu1 %v5945_v1  ;;  %v2610_v29 = vld [vmem:[#allocation3 + $0x58] sm:$0xff] }
 0x39c   :  { %v5943_v32 = vld [vmem:[#allocation14 + $0x1a0] ss:$8 sps:$4 sm:$0xff]   ;;  %v2573_v0 = vld [vmem:[#allocation6 + $0x34] sm:$0xff]  ;;  %v2574_v21 = vld [vmem:[#allocation6 + $0x3c] sm:$0x3]  ;;  %v2522_v50 = vpack.c.bf16 %v2510_v31, %v2509_v4  ;;  %v1947_v49 = vmax.f32 %v1903_v7, %v1904_v10  ;;  %v1905_v40 = vmax.f32 %v7303_v3, 0.0  ;;  %3171 = vmatprep.mubr.bf16.mxu1 %v2610_v29 }
 0x39d   :  { %v1995_v44 = vld [vmem:[#allocation5 + $0x80] sm:$0x1]  ;;  %v2003_v46 = vld [vmem:[#allocation5 + $0x81] sm:$0x1]  ;;  %v2027_v12 = vld [vmem:[#allocation5 + $0x82] sm:$0x1]  ;;  %v2586_v20 = vpack.c.bf16 %v2574_v21, %v2573_v0  ;;  %3253 = vmatpush1.bf16.msra.mxu1 %v5943_v32 }
 0x39e   :  { %2498 = vst [vmem:[#allocation3 + $0x80] sm:$0x1f] %v2490_v30  ;;  %v5948_v48 = vld [vmem:[#allocation14 + $0x1b4] ss:$8 sps:$4 sm:$0xff]   ;;  %v2011_v54 = vmax.f32 %v1995_v44, %v2003_v46  ;;  %v2035_v58 = vld [vmem:[#allocation5 + $0x83] sm:$0x1] }
 0x39f   :  { %v2059_v60 = vld [vmem:[#allocation5 + $0x84] sm:$0x1]  ;;  %v2067_v51 = vld [vmem:[#allocation5 + $0x85] sm:$0x1]  ;;  %1978 = vst [vmem:[#allocation5 + $0x98] sm:$0xf] %v1946_v59  ;;  %v2043_v9 = vmax.f32 %v2027_v12, %v2035_v58  ;;  %3254 = vmatprep.subr.bf16.mxu1 %v5948_v48 }
 0x3a0   :  { %2562 = vst [vmem:[#allocation3 + $0x90] sm:$0x1f] %v2554_v35  ;;  %v2075_v53 = vmax.f32 %v2059_v60, %v2067_v51  ;;  %v2091_v52 = vld [vmem:[#allocation5 + $0x86] sm:$0x1]  ;;  %v2099_v19 = vld [vmem:[#allocation5 + $0x87] sm:$0x1] }
 0x3a1   :  { %2530 = vst [vmem:[#allocation3 + $0x88] sm:$0x1f] %v2522_v50  ;;  %2594 = vst [vmem:[#allocation3 + $0x98] sm:$0x1f] %v2586_v20  ;;  %v2107_v13 = vmax.f32 %v2091_v52, %v2099_v19  ;;  %v2609_v33 = vld [vmem:[#allocation3 + $0x50] sm:$0xff]  ;;  %v1906_v38 = vmax.f32 %v1842_v39, 0.0 }
 0x3a2   :  { %2019 = vst [vmem:[#allocation6 + $0x40] sm:$0x1] %v2011_v54  ;;  %1979 = vst [vmem:[#allocation5 + $0xa0] sm:$0xff] %v1947_v49  ;;  %v1907_v62 = vmax.f32 %v7307_v22, 0.0  ;;  %v1740_v47 = vpop.f32.mrb[45].mxu0  ;;  %3172 = vmatmul.mubr.bf16.gmra.mrb[8].mxu1 %v2609_v33 }
 0x3a3   :  { %v5946_v24 = vld [vmem:[#allocation14 + $0x1b0] ss:$8 sps:$4 sm:$0xff]   ;;  %2051 = vst [vmem:[#allocation6 + $0x41] sm:$0x1] %v2043_v9  ;;  %2083 = vst [vmem:[#allocation6 + $0x42] sm:$0x1] %v2075_v53  ;;  %v1948_v37 = vmax.f32 %v1905_v40, %v1906_v38  ;;  %v1844_v39 = vadd.f32 %v7255_v25, %v1740_v47 }
 0x3a4   :  { %v2123_v43 = vld [vmem:[#allocation5 + $0x88] sm:$0x1]  ;;  %v2131_v11 = vld [vmem:[#allocation5 + $0x89] sm:$0x1]  ;;  %v2155_v36 = vld [vmem:[#allocation5 + $0x8a] sm:$0x1]  ;;  %3255 = vmatpush1.bf16.msra.mxu1 %v5946_v24 }
 0x3a5   :  { %v5951_v57 = vld [vmem:[#allocation14 + $0x1c4] ss:$8 sps:$4 sm:$0xff]   ;;  %2115 = vst [vmem:[#allocation6 + $0x43] sm:$0x1] %v2107_v13  ;;  %v2139_v1 = vmax.f32 %v2123_v43, %v2131_v11  ;;  %v2163_v27 = vld [vmem:[#allocation5 + $0x8b] sm:$0x1] }
 0x3a6   :  { %v2187_v42 = vld [vmem:[#allocation5 + $0x8c] sm:$0x1]  ;;  %v2195_v6 = vld [vmem:[#allocation5 + $0x8d] sm:$0x1]  ;;  %v2171_v45 = vmax.f32 %v2155_v36, %v2163_v27  ;;  %v2219_v17 = vld [vmem:[#allocation5 + $0x8e] sm:$0x1]  ;;  %3256 = vmatprep.subr.bf16.mxu1 %v5951_v57 }
 0x3a7   :  { %v2203_v61 = vmax.f32 %v2187_v42, %v2195_v6  ;;  %v2227_v56 = vld [vmem:[#allocation5 + $0x8f] sm:$0x1]  ;;  %v2251_v23 = vld [vmem:[#allocation5 + $0x90] sm:$0x1]  ;;  %2147 = vst [vmem:[#allocation6 + $0x44] sm:$0x1] %v2139_v1 }
 0x3a8   :  { %v2235_v26 = vmax.f32 %v2219_v17, %v2227_v56  ;;  %v2259_v14 = vld [vmem:[#allocation5 + $0x91] sm:$0x1]  ;;  %v2283_v8 = vld [vmem:[#allocation5 + $0x92] sm:$0x1]  ;;  %v2291_v18 = vld [vmem:[#allocation5 + $0x93] sm:$0x1] }
 0x3a9   :  { %1980 = vst [vmem:[#allocation5 + $0xa8] sm:$0xff] %v1948_v37  ;;  %v5949_v28 = vld [vmem:[#allocation14 + $0x1c0] ss:$8 sps:$4 sm:$0xff]   ;;  %2179 = vst [vmem:[#allocation6 + $0x45] sm:$0x1] %v2171_v45  ;;  %v2267_v55 = vmax.f32 %v2251_v23, %v2259_v14  ;;  %v2299_v4 = vmax.f32 %v2283_v8, %v2291_v18  ;;  %v1908_v52 = vmax.f32 %v1844_v39, 0.0 }
 0x3aa   :  { %2211 = vst [vmem:[#allocation6 + $0x46] sm:$0x1] %v2203_v61  ;;  %v2315_v7 = vld [vmem:[#allocation5 + $0x94] sm:$0x1]  ;;  %v2323_v3 = vld [vmem:[#allocation5 + $0x95] sm:$0x1]  ;;  %3257 = vmatpush1.bf16.msra.mxu1 %v5949_v28 }
 0x3ab   :  { %v2347_v5 = vld [vmem:[#allocation5 + $0x96] sm:$0x1]  ;;  %2243 = vst [vmem:[#allocation6 + $0x47] sm:$0x1] %v2235_v26  ;;  %v2331_v34 = vmax.f32 %v2315_v7, %v2323_v3  ;;  %v2355_v31 = vld [vmem:[#allocation5 + $0x97] sm:$0x1]  ;;  %v1949_v1 = vmax.f32 %v1907_v62, %v1908_v52 }
 0x3ac   :  { %v5954_v30 = vld [vmem:[#allocation14 + $0x1d4] ss:$8 sps:$4 sm:$0xff]   ;;  %2275 = vst [vmem:[#allocation6 + $0x48] sm:$0x1] %v2267_v55  ;;  %2307 = vst [vmem:[#allocation6 + $0x49] sm:$0x1] %v2299_v4  ;;  %v2363_v41 = vmax.f32 %v2347_v5, %v2355_v31 }
 0x3ad   :  { %v2379_v59 = vld [vmem:[#allocation5 + $0x98] sm:$0x1]  ;;  %v2387_v10 = vld [vmem:[#allocation5 + $0x99] sm:$0x1]  ;;  %v2411_v35 = vld [vmem:[#allocation5 + $0x9a] sm:$0x1]  ;;  %3258 = vmatprep.subr.bf16.mxu1 %v5954_v30 }
 0x3ae   :  { %v2395_v32 = vmax.f32 %v2379_v59, %v2387_v10  ;;  %v2419_v0 = vld [vmem:[#allocation5 + $0x9b] sm:$0x1]  ;;  %v1996_v21 = vld [vmem:[#allocation5 + $0xa0] sm:$0x1]  ;;  %2339 = vst [vmem:[#allocation6 + $0x4a] sm:$0x1] %v2331_v34 }
 0x3af   :  { %v2427_v44 = vmax.f32 %v2411_v35, %v2419_v0  ;;  %v2004_v46 = vld [vmem:[#allocation5 + $0xa1] sm:$0x1]  ;;  %v2028_v12 = vld [vmem:[#allocation5 + $0xa2] sm:$0x1]  ;;  %v2036_v48 = vld [vmem:[#allocation5 + $0xa3] sm:$0x1] }
 0x3b0   :  { %v5952_v50 = vld [vmem:[#allocation14 + $0x1d0] ss:$8 sps:$4 sm:$0xff]   ;;  %2371 = vst [vmem:[#allocation6 + $0x4b] sm:$0x1] %v2363_v41  ;;  %2403 = vst [vmem:[#allocation6 + $0x4c] sm:$0x1] %v2395_v32  ;;  %v2012_v20 = vmax.f32 %v1996_v21, %v2004_v46  ;;  %v2044_v54 = vmax.f32 %v2028_v12, %v2036_v48 }
 0x3b1   :  { %v2060_v58 = vld [vmem:[#allocation5 + $0xa4] sm:$0x1]  ;;  %v2068_v60 = vld [vmem:[#allocation5 + $0xa5] sm:$0x1]  ;;  %v2092_v51 = vld [vmem:[#allocation5 + $0xa6] sm:$0x1]  ;;  %3259 = vmatpush1.bf16.msra.mxu1 %v5952_v50 }
 0x3b2   :  { %v5957_v49 = vld [vmem:[#allocation14 + $0x1e4] ss:$8 sps:$4 sm:$0xff]   ;;  %2435 = vst [vmem:[#allocation6 + $0x4d] sm:$0x1] %v2427_v44  ;;  %v2076_v9 = vmax.f32 %v2060_v58, %v2068_v60  ;;  %v1742_v19 = vpop.f32.mrb[46].mxu0  ;;  %1981 = vst [vmem:[#allocation5 + $0xb0] sm:$0xff] %v1949_v1 }
 0x3b3   :  { %v2100_v53 = vld [vmem:[#allocation5 + $0xa7] sm:$0x1]  ;;  %v2615_v29 = vld [vmem:[#allocation3 + $0x80] sm:$0xff]  ;;  %2020 = vst [vmem:[#allocation6 + $0x50] sm:$0x1] %v2012_v20  ;;  %v1845_v24 = vadd.f32 %v7252_v2, %v1742_v19  ;;  %v1744_v61 = vpop.f32.mrb[47].mxu0  ;;  %3260 = vmatprep.subr.bf16.mxu1 %v5957_v49 }
 0x3b4   :  { %v2614_v40 = vld [vmem:[#allocation3 + $0x78] sm:$0xff]  ;;  %2052 = vst [vmem:[#allocation6 + $0x51] sm:$0x1] %v2044_v54  ;;  %v2108_v13 = vmax.f32 %v2092_v51, %v2100_v53  ;;  %3181 = vmatprep.mubr.bf16.mxu1 %v2615_v29  ;;  %2084 = vst [vmem:[#allocation6 + $0x52] sm:$0x1] %v2076_v9  ;;  %v1846_v23 = vadd.f32 %v7255_v25, %v1744_v61  ;;  %v1748_v26 = vpop.f32.mrb[48].mxu0 }
 0x3b5   :  { %v2124_v33 = vld [vmem:[#allocation5 + $0xa8] sm:$0x1]  ;;  %v2132_v38 = vld [vmem:[#allocation5 + $0xa9] sm:$0x1]  ;;  %v2156_v47 = vld [vmem:[#allocation5 + $0xaa] sm:$0x1]  ;;  %3182 = vmatmul.mubr.bf16.gmra.mrb[12].mxu1 %v2614_v40  ;;  %v1847_v22 = vadd.f32 %v7252_v2, %v1748_v26 }
 0x3b6   :  { %v2140_v43 = vmax.f32 %v2124_v33, %v2132_v38  ;;  %v2164_v11 = vld [vmem:[#allocation5 + $0xab] sm:$0x1]  ;;  %v2188_v36 = vld [vmem:[#allocation5 + $0xac] sm:$0x1]  ;;  %v2196_v57 = vld [vmem:[#allocation5 + $0xad] sm:$0x1] }
 0x3b7   :  { %v5955_v27 = vld [vmem:[#allocation14 + $0x1e0] ss:$8 sps:$4 sm:$0xff]   ;;  %2116 = vst [vmem:[#allocation6 + $0x53] sm:$0x1] %v2108_v13  ;;  %v2172_v42 = vmax.f32 %v2156_v47, %v2164_v11  ;;  %v2204_v6 = vmax.f32 %v2188_v36, %v2196_v57  ;;  %v2220_v37 = vld [vmem:[#allocation5 + $0xae] sm:$0x1] }
 0x3b8   :  { %v2228_v45 = vld [vmem:[#allocation5 + $0xaf] sm:$0x1]  ;;  %2148 = vst [vmem:[#allocation6 + $0x54] sm:$0x1] %v2140_v43  ;;  %v1909_v56 = vmax.f32 %v1845_v24, 0.0  ;;  %v2479_v14 = vld [vmem:[#allocation6 + $0x41] sm:$0xff]  ;;  %3261 = vmatpush1.bf16.msra.mxu1 %v5955_v27 }
 0x3b9   :  { %v2236_v17 = vmax.f32 %v2220_v37, %v2228_v45  ;;  %v2447_v8 = vld [vmem:[#allocation6 + $0x40] sm:$0xff]  ;;  %v2448_v18 = vld [vmem:[#allocation6 + $0x48] sm:$0x3]  ;;  %2180 = vst [vmem:[#allocation6 + $0x55] sm:$0x1] %v2172_v42  ;;  %v1750_v62 = vpop.f32.mrb[49].mxu0 }
 0x3ba   :  { %2212 = vst [vmem:[#allocation6 + $0x56] sm:$0x1] %v2204_v6  ;;  %v2480_v28 = vld [vmem:[#allocation6 + $0x49] sm:$0x3]  ;;  %v2459_v55 = vpack.c.bf16 %v2448_v18, %v2447_v8  ;;  %v5960_v4 = vld [vmem:[#allocation14 + $0x1f4] ss:$8 sps:$4 sm:$0xff]   ;;  %v1848_v3 = vadd.f32 %v7255_v25, %v1750_v62 }
 0x3bb   :  { %2244 = vst [vmem:[#allocation6 + $0x57] sm:$0x1] %v2236_v17  ;;  %v1910_v7 = vmax.f32 %v1846_v23, 0.0  ;;  %v1752_v5 = vpop.f32.mrb[50].mxu0  ;;  %v2491_v30 = vpack.c.bf16 %v2480_v28, %v2479_v14  ;;  %v2543_v34 = vld [vmem:[#allocation6 + $0x43] sm:$0xff]  ;;  %v1911_v10 = vmax.f32 %v1847_v22, 0.0  ;;  %3262 = vmatprep.subr.bf16.mxu1 %v5960_v4 }
 0x3bc   :  { %v2544_v31 = vld [vmem:[#allocation6 + $0x4b] sm:$0x3]  ;;  %v2511_v59 = vld [vmem:[#allocation6 + $0x42] sm:$0xff]  ;;  %v1849_v39 = vadd.f32 %v7252_v2, %v1752_v5  ;;  %v1754_v41 = vpop.f32.mrb[51].mxu0  ;;  %2467 = vst [vmem:[#allocation3 + $0xa0] sm:$0x1f] %v2459_v55 }
 0x3bd   :  { %v2555_v32 = vpack.c.bf16 %v2544_v31, %v2543_v34  ;;  %v2512_v35 = vld [vmem:[#allocation6 + $0x4a] sm:$0x3]  ;;  %v1950_v0 = vmax.f32 %v1909_v56, %v1910_v7  ;;  %v1912_v21 = vmax.f32 %v1848_v3, 0.0  ;;  %v1850_v44 = vadd.f32 %v7255_v25, %v1754_v41  ;;  %v1758_v46 = vpop.f32.mrb[52].mxu0  ;;  %2499 = vst [vmem:[#allocation3 + $0xa8] sm:$0x1f] %v2491_v30 }
 0x3be   :  { %v5958_v12 = vld [vmem:[#allocation14 + $0x1f0] ss:$8 sps:$4 sm:$0xff]   ;;  %v2523_v48 = vpack.c.bf16 %v2512_v35, %v2511_v59  ;;  %v1913_v50 = vmax.f32 %v1849_v39, 0.0  ;;  %v1851_v20 = vadd.f32 %v7252_v2, %v1758_v46  ;;  %v1760_v54 = vpop.f32.mrb[53].mxu0  ;;  %v5963_v58 = vld [vmem:[#allocation14 + $0x204] ss:$8 sps:$4 sm:$0xff]  }
 0x3bf   :  { %2563 = vst [vmem:[#allocation3 + $0xb8] sm:$0x1f] %v2555_v32  ;;  %1982 = vst [vmem:[#allocation5 + $0xb8] sm:$0xf] %v1950_v0  ;;  %v1951_v60 = vmax.f32 %v1911_v10, %v1912_v21  ;;  %v1914_v51 = vmax.f32 %v1850_v44, 0.0  ;;  %v1852_v49 = vadd.f32 %v7255_v25, %v1760_v54  ;;  %v1762_v9 = vpop.f32.mrb[54].mxu0  ;;  %3263 = vmatpush1.bf16.msra.mxu1 %v5958_v12 }
 0x3c0   :  { %2531 = vst [vmem:[#allocation3 + $0xb0] sm:$0x1f] %v2523_v48  ;;  %v2252_v53 = vld [vmem:[#allocation5 + $0xb0] sm:$0x1]  ;;  %v2260_v52 = vld [vmem:[#allocation5 + $0xb1] sm:$0x1]  ;;  %v1853_v47 = vadd.f32 %v7252_v2, %v1762_v9  ;;  %3345 = vmatprep.subr.bf16.mxu1 %v5963_v58 }
 0x3c1   :  { %v2284_v19 = vld [vmem:[#allocation5 + $0xb2] sm:$0x1]  ;;  %v2268_v29 = vmax.f32 %v2252_v53, %v2260_v52  ;;  %v2292_v40 = vld [vmem:[#allocation5 + $0xb3] sm:$0x1]  ;;  %v2316_v13 = vld [vmem:[#allocation5 + $0xb4] sm:$0x1]  ;;  %v1952_v38 = vmax.f32 %v1913_v50, %v1914_v51 }
 0x3c2   :  { %v2324_v33 = vld [vmem:[#allocation5 + $0xb5] sm:$0x1]  ;;  %1983 = vst [vmem:[#allocation5 + $0xc0] sm:$0xff] %v1951_v60  ;;  %v2300_v24 = vmax.f32 %v2284_v19, %v2292_v40  ;;  %v2348_v11 = vld [vmem:[#allocation5 + $0xb6] sm:$0x1]  ;;  %v1915_v57 = vmax.f32 %v1851_v20, 0.0 }
 0x3c3   :  { %v2332_v43 = vmax.f32 %v2316_v13, %v2324_v33  ;;  %v2356_v36 = vld [vmem:[#allocation5 + $0xb7] sm:$0x1]  ;;  %v1916_v1 = vmax.f32 %v1852_v49, 0.0  ;;  %2276 = vst [vmem:[#allocation6 + $0x58] sm:$0x1] %v2268_v29  ;;  %1984 = vst [vmem:[#allocation5 + $0xc8] sm:$0xff] %v1952_v38 }
 0x3c4   :  { %v2364_v27 = vmax.f32 %v2348_v11, %v2356_v36  ;;  %v1764_v42 = vpop.f32.mrb[55].mxu0  ;;  %v2619_v6 = vld [vmem:[#allocation3 + $0xa0] sm:$0xff]  ;;  %2308 = vst [vmem:[#allocation6 + $0x59] sm:$0x1] %v2300_v24  ;;  %v2620_v61 = vld [vmem:[#allocation3 + $0xa8] sm:$0xff]  ;;  %v2575_v56 = vld [vmem:[#allocation6 + $0x44] sm:$0xff] }
 0x3c5   :  { %2340 = vst [vmem:[#allocation6 + $0x5a] sm:$0x1] %v2332_v43  ;;  %v1953_v37 = vmax.f32 %v1915_v57, %v1916_v1  ;;  %v1854_v45 = vadd.f32 %v7255_v25, %v1764_v42  ;;  %v1768_v17 = vpop.f32.mrb[56].mxu0  ;;  %v2576_v23 = vld [vmem:[#allocation6 + $0x4c] sm:$0x3]  ;;  %v1917_v26 = vmax.f32 %v1853_v47, 0.0  ;;  %3191 = vmatprep.mubr.bf16.mxu1 %v2620_v61 }
 0x3c6   :  { %2372 = vst [vmem:[#allocation6 + $0x5b] sm:$0x1] %v2364_v27  ;;  %v7325_v14 = vadd.f32 %v7252_v2, %v1768_v17  ;;  %v1770_v8 = vpop.f32.mrb[57].mxu0  ;;  %v2587_v18 = vpack.c.bf16 %v2576_v23, %v2575_v56  ;;  %v2380_v22 = vld [vmem:[#allocation5 + $0xb8] sm:$0x1]  ;;  %3192 = vmatmul.mubr.bf16.gmra.mrb[16].mxu1 %v2619_v6  ;;  %v2449_v27 = vld [vmem:[#allocation6 + $0x50] sm:$0xff] }
 0x3c7   :  { %v2388_v62 = vld [vmem:[#allocation5 + $0xb9] sm:$0x1]  ;;  %v2412_v28 = vld [vmem:[#allocation5 + $0xba] sm:$0x1]  ;;  %1985 = vst [vmem:[#allocation5 + $0xd0] sm:$0xff] %v1953_v37  ;;  %v1918_v7 = vmax.f32 %v1854_v45, 0.0  ;;  %v1856_v53 = vadd.f32 %v7255_v25, %v1770_v8 }
 0x3c8   :  { %v2396_v55 = vmax.f32 %v2380_v22, %v2388_v62  ;;  %v2420_v4 = vld [vmem:[#allocation5 + $0xbb] sm:$0x1]  ;;  %v1919_v3 = vmax.f32 %v7325_v14, 0.0  ;;  %v1772_v5 = vpop.f32.mrb[58].mxu0  ;;  %2595 = vst [vmem:[#allocation3 + $0xc0] sm:$0x1f] %v2587_v18 }
 0x3c9   :  { %v2428_v30 = vmax.f32 %v2412_v28, %v2420_v4  ;;  %v1997_v34 = vld [vmem:[#allocation5 + $0xc0] sm:$0x1]  ;;  %v2005_v31 = vld [vmem:[#allocation5 + $0xc1] sm:$0x1]  ;;  %v2029_v59 = vld [vmem:[#allocation5 + $0xc2] sm:$0x1]  ;;  %v1954_v35 = vmax.f32 %v1917_v26, %v1918_v7  ;;  %v1857_v52 = vadd.f32 %v7252_v2, %v1772_v5 }
 0x3ca   :  { %2404 = vst [vmem:[#allocation6 + $0x5c] sm:$0x1] %v2396_v55  ;;  %v2013_v10 = vmax.f32 %v1997_v34, %v2005_v31  ;;  %v2037_v39 = vld [vmem:[#allocation5 + $0xc3] sm:$0x1]  ;;  %v2061_v41 = vld [vmem:[#allocation5 + $0xc4] sm:$0x1] }
 0x3cb   :  { %v2069_v32 = vld [vmem:[#allocation5 + $0xc5] sm:$0x1]  ;;  %2436 = vst [vmem:[#allocation6 + $0x5d] sm:$0x1] %v2428_v30  ;;  %v2045_v0 = vmax.f32 %v2029_v59, %v2037_v39  ;;  %v2093_v44 = vld [vmem:[#allocation5 + $0xc6] sm:$0x1] }
 0x3cc   :  { %v2077_v21 = vmax.f32 %v2061_v41, %v2069_v32  ;;  %v2101_v46 = vld [vmem:[#allocation5 + $0xc7] sm:$0x1]  ;;  %v2125_v12 = vld [vmem:[#allocation5 + $0xc8] sm:$0x1]  ;;  %2021 = vst [vmem:[#allocation6 + $0x60] sm:$0x1] %v2013_v10 }
 0x3cd   :  { %v2109_v48 = vmax.f32 %v2093_v44, %v2101_v46  ;;  %v2133_v50 = vld [vmem:[#allocation5 + $0xc9] sm:$0x1]  ;;  %v2157_v20 = vld [vmem:[#allocation5 + $0xca] sm:$0x1]  ;;  %v2165_v54 = vld [vmem:[#allocation5 + $0xcb] sm:$0x1] }
 0x3ce   :  { %1986 = vst [vmem:[#allocation5 + $0xd8] sm:$0xf] %v1954_v35  ;;  %2053 = vst [vmem:[#allocation6 + $0x61] sm:$0x1] %v2045_v0  ;;  %v2141_v58 = vmax.f32 %v2125_v12, %v2133_v50  ;;  %v2173_v60 = vmax.f32 %v2157_v20, %v2165_v54  ;;  %v2189_v51 = vld [vmem:[#allocation5 + $0xcc] sm:$0x1] }
 0x3cf   :  { %2085 = vst [vmem:[#allocation6 + $0x62] sm:$0x1] %v2077_v21  ;;  %v2197_v49 = vld [vmem:[#allocation5 + $0xcd] sm:$0x1]  ;;  %v2221_v9 = vld [vmem:[#allocation5 + $0xce] sm:$0x1] }
 0x3d0   :  { %2117 = vst [vmem:[#allocation6 + $0x63] sm:$0x1] %v2109_v48  ;;  %v2205_v19 = vmax.f32 %v2189_v51, %v2197_v49  ;;  %v2229_v29 = vld [vmem:[#allocation5 + $0xcf] sm:$0x1]  ;;  %v2253_v40 = vld [vmem:[#allocation5 + $0xd0] sm:$0x1] }
 0x3d1   :  { %v2261_v13 = vld [vmem:[#allocation5 + $0xd1] sm:$0x1]  ;;  %2149 = vst [vmem:[#allocation6 + $0x64] sm:$0x1] %v2141_v58  ;;  %2181 = vst [vmem:[#allocation6 + $0x65] sm:$0x1] %v2173_v60  ;;  %v2237_v33 = vmax.f32 %v2221_v9, %v2229_v29 }
 0x3d2   :  { %v2269_v38 = vmax.f32 %v2253_v40, %v2261_v13  ;;  %v2285_v47 = vld [vmem:[#allocation5 + $0xd2] sm:$0x1]  ;;  %v2293_v24 = vld [vmem:[#allocation5 + $0xd3] sm:$0x1]  ;;  %v2317_v43 = vld [vmem:[#allocation5 + $0xd4] sm:$0x1] }
 0x3d3   :  { %2213 = vst [vmem:[#allocation6 + $0x66] sm:$0x1] %v2205_v19  ;;  %v2301_v11 = vmax.f32 %v2285_v47, %v2293_v24  ;;  %v2325_v36 = vld [vmem:[#allocation5 + $0xd5] sm:$0x1]  ;;  %v2349_v57 = vld [vmem:[#allocation5 + $0xd6] sm:$0x1] }
 0x3d4   :  { %v2357_v1 = vld [vmem:[#allocation5 + $0xd7] sm:$0x1]  ;;  %2245 = vst [vmem:[#allocation6 + $0x67] sm:$0x1] %v2237_v33  ;;  %2277 = vst [vmem:[#allocation6 + $0x68] sm:$0x1] %v2269_v38  ;;  %v2333_v42 = vmax.f32 %v2317_v43, %v2325_v36 }
 0x3d5   :  { %v2365_v6 = vmax.f32 %v2349_v57, %v2357_v1  ;;  %v1920_v37 = vmax.f32 %v1856_v53, 0.0  ;;  %v1921_v45 = vmax.f32 %v1857_v52, 0.0  ;;  %v1774_v61 = vpop.f32.mrb[59].mxu0  ;;  %v2481_v17 = vld [vmem:[#allocation6 + $0x51] sm:$0xff]  ;;  %v2482_v56 = vld [vmem:[#allocation6 + $0x59] sm:$0x3] }
 0x3d6   :  { %2309 = vst [vmem:[#allocation6 + $0x69] sm:$0x1] %v2301_v11  ;;  %v1858_v23 = vadd.f32 %v7255_v25, %v1774_v61  ;;  %v1778_v26 = vpop.f32.mrb[60].mxu0  ;;  %v2492_v8 = vpack.c.bf16 %v2482_v56, %v2481_v17  ;;  %v2450_v18 = vld [vmem:[#allocation6 + $0x58] sm:$0x3] }
 0x3d7   :  { %v2545_v22 = vld [vmem:[#allocation6 + $0x53] sm:$0xff]  ;;  %v2546_v62 = vld [vmem:[#allocation6 + $0x5b] sm:$0x3]  ;;  %2341 = vst [vmem:[#allocation6 + $0x6a] sm:$0x1] %v2333_v42  ;;  %v1955_v7 = vmax.f32 %v1919_v3, %v1920_v37  ;;  %v1859_v5 = vadd.f32 %v7252_v2, %v1778_v26  ;;  %v2460_v30 = vpack.c.bf16 %v2450_v18, %v2449_v27  ;;  %v1780_v39 = vpop.f32.mrb[61].mxu0 }
 0x3d8   :  { %2373 = vst [vmem:[#allocation6 + $0x6b] sm:$0x1] %v2365_v6  ;;  %v2381_v28 = vld [vmem:[#allocation5 + $0xd8] sm:$0x1]  ;;  %v2389_v55 = vld [vmem:[#allocation5 + $0xd9] sm:$0x1]  ;;  %v2556_v34 = vpack.c.bf16 %v2546_v62, %v2545_v22  ;;  %v1860_v0 = vadd.f32 %v7255_v25, %v1780_v39 }
 0x3d9   :  { %v2413_v4 = vld [vmem:[#allocation5 + $0xda] sm:$0x1]  ;;  %v2397_v31 = vmax.f32 %v2381_v28, %v2389_v55  ;;  %v2421_v59 = vld [vmem:[#allocation5 + $0xdb] sm:$0x1]  ;;  %v1922_v10 = vmax.f32 %v1858_v23, 0.0  ;;  %v2513_v41 = vld [vmem:[#allocation6 + $0x52] sm:$0xff] }
 0x3da   :  { %2500 = vst [vmem:[#allocation3 + $0xd0] sm:$0x1f] %v2492_v8  ;;  %v2429_v32 = vmax.f32 %v2413_v4, %v2421_v59  ;;  %1987 = vst [vmem:[#allocation5 + $0xe0] sm:$0xff] %v1955_v7  ;;  %v1923_v35 = vmax.f32 %v1859_v5, 0.0  ;;  %v1782_v21 = vpop.f32.mrb[62].mxu0  ;;  %v2577_v48 = vld [vmem:[#allocation6 + $0x54] sm:$0xff] }
 0x3db   :  { %2468 = vst [vmem:[#allocation3 + $0xc8] sm:$0x1f] %v2460_v30  ;;  %2564 = vst [vmem:[#allocation3 + $0xe0] sm:$0x1f] %v2556_v34  ;;  %v2514_v14 = vld [vmem:[#allocation6 + $0x5a] sm:$0x3]  ;;  %v1956_v3 = vmax.f32 %v1921_v45, %v1922_v10  ;;  %v1861_v44 = vadd.f32 %v7252_v2, %v1782_v21 }
 0x3dc   :  { %2405 = vst [vmem:[#allocation6 + $0x6c] sm:$0x1] %v2397_v31  ;;  %v1784_v46 = vpop.f32.mrb[63].mxu0  ;;  %v2524_v12 = vpack.c.bf16 %v2514_v14, %v2513_v41  ;;  %v2578_v50 = vld [vmem:[#allocation6 + $0x5c] sm:$0x3]  ;;  %v1924_v20 = vmax.f32 %v1860_v0, 0.0 }
 0x3dd   :  { %2437 = vst [vmem:[#allocation6 + $0x6d] sm:$0x1] %v2429_v32  ;;  %v1862_v54 = vadd.f32 %v7255_v25, %v1784_v46  ;;  %v2588_v58 = vpack.c.bf16 %v2578_v50, %v2577_v48  ;;  %1988 = vst [vmem:[#allocation5 + $0xe8] sm:$0xff] %v1956_v3  ;;  %v1925_v60 = vmax.f32 %v1861_v44, 0.0  ;;  %v2483_v51 = vld [vmem:[#allocation6 + $0x61] sm:$0xff] }
 0x3de   :  { %2532 = vst [vmem:[#allocation3 + $0xd8] sm:$0x1f] %v2524_v12  ;;  %v1957_v49 = vmax.f32 %v1923_v35, %v1924_v20  ;;  %v2451_v53 = vld [vmem:[#allocation6 + $0x60] sm:$0xff]  ;;  %v2452_v52 = vld [vmem:[#allocation6 + $0x68] sm:$0x3] }
 0x3df   :  { %v1926_v9 = vmax.f32 %v1862_v54, 0.0  ;;  %v2515_v19 = vld [vmem:[#allocation6 + $0x62] sm:$0xff]  ;;  %2596 = vst [vmem:[#allocation3 + $0xe8] sm:$0x1f] %v2588_v58  ;;  %v2461_v29 = vpack.c.bf16 %v2452_v52, %v2451_v53  ;;  %v2516_v40 = vld [vmem:[#allocation6 + $0x6a] sm:$0x3] }
 0x3e0   :  { %v2484_v2 = vld [vmem:[#allocation6 + $0x69] sm:$0x3]  ;;  %1989 = vst [vmem:[#allocation5 + $0xf0] sm:$0xff] %v1957_v49  ;;  %v2525_v47 = vpack.c.bf16 %v2516_v40, %v2515_v19 }
 0x3e1   :  { %v1958_v13 = vmax.f32 %v1925_v60, %v1926_v9  ;;  %v2625_v33 = vld [vmem:[#allocation3 + $0xd0] sm:$0xff]  ;;  %v2493_v38 = vpack.c.bf16 %v2484_v2, %v2483_v51  ;;  %2469 = vst [vmem:[#allocation3 + $0xf0] sm:$0x1f] %v2461_v29  ;;  %v2062_v57 = vld [vmem:[#allocation5 + $0xe4] sm:$0x1] }
 0x3e2   :  { %v1998_v25 = vld [vmem:[#allocation5 + $0xe0] sm:$0x1]  ;;  %v2006_v24 = vld [vmem:[#allocation5 + $0xe1] sm:$0x1]  ;;  %v2030_v43 = vld [vmem:[#allocation5 + $0xe2] sm:$0x1]  ;;  %3201 = vmatprep.mubr.bf16.mxu1 %v2625_v33 }
 0x3e3   :  { %v2014_v11 = vmax.f32 %v1998_v25, %v2006_v24  ;;  %v2038_v36 = vld [vmem:[#allocation5 + $0xe3] sm:$0x1]  ;;  %v2070_v1 = vld [vmem:[#allocation5 + $0xe5] sm:$0x1]  ;;  %1990 = vst [vmem:[#allocation5 + $0xf8] sm:$0xf] %v1958_v13 }
 0x3e4   :  { %2501 = vst [vmem:[#allocation3 + $0xf8] sm:$0x1f] %v2493_v38  ;;  %2533 = vst [vmem:[#allocation3 + $0x100] sm:$0x1f] %v2525_v47  ;;  %v2046_v27 = vmax.f32 %v2030_v43, %v2038_v36  ;;  %v2078_v42 = vmax.f32 %v2062_v57, %v2070_v1  ;;  %v2094_v6 = vld [vmem:[#allocation5 + $0xe6] sm:$0x1] }
 0x3e5   :  { %v2102_v37 = vld [vmem:[#allocation5 + $0xe7] sm:$0x1]  ;;  %v2624_v45 = vld [vmem:[#allocation3 + $0xc8] sm:$0xff]  ;;  %2022 = vst [vmem:[#allocation6 + $0x70] sm:$0x1] %v2014_v11 }
 0x3e6   :  { %v2110_v61 = vmax.f32 %v2094_v6, %v2102_v37  ;;  %v2126_v17 = vld [vmem:[#allocation5 + $0xe8] sm:$0x1]  ;;  %v2134_v56 = vld [vmem:[#allocation5 + $0xe9] sm:$0x1]  ;;  %v2158_v23 = vld [vmem:[#allocation5 + $0xea] sm:$0x1]  ;;  %3202 = vmatmul.mubr.bf16.gmra.mrb[20].mxu1 %v2624_v45 }
 0x3e7   :  { %2054 = vst [vmem:[#allocation6 + $0x71] sm:$0x1] %v2046_v27  ;;  %2086 = vst [vmem:[#allocation6 + $0x72] sm:$0x1] %v2078_v42  ;;  %v2142_v26 = vmax.f32 %v2126_v17, %v2134_v56  ;;  %v2166_v8 = vld [vmem:[#allocation5 + $0xeb] sm:$0x1] }
 0x3e8   :  { %v2190_v18 = vld [vmem:[#allocation5 + $0xec] sm:$0x1]  ;;  %v2198_v22 = vld [vmem:[#allocation5 + $0xed] sm:$0x1]  ;;  %2118 = vst [vmem:[#allocation6 + $0x73] sm:$0x1] %v2110_v61  ;;  %v2174_v62 = vmax.f32 %v2158_v23, %v2166_v8 }
 0x3e9   :  { %v2206_v28 = vmax.f32 %v2190_v18, %v2198_v22  ;;  %v2222_v55 = vld [vmem:[#allocation5 + $0xee] sm:$0x1]  ;;  %v2230_v4 = vld [vmem:[#allocation5 + $0xef] sm:$0x1]  ;;  %2150 = vst [vmem:[#allocation6 + $0x74] sm:$0x1] %v2142_v26 }
 0x3ea   :  { %v2238_v7 = vmax.f32 %v2222_v55, %v2230_v4  ;;  %v2254_v5 = vld [vmem:[#allocation5 + $0xf0] sm:$0x1]  ;;  %v2262_v30 = vld [vmem:[#allocation5 + $0xf1] sm:$0x1]  ;;  %v2286_v34 = vld [vmem:[#allocation5 + $0xf2] sm:$0x1] }
 0x3eb   :  { %2182 = vst [vmem:[#allocation6 + $0x75] sm:$0x1] %v2174_v62  ;;  %2214 = vst [vmem:[#allocation6 + $0x76] sm:$0x1] %v2206_v28  ;;  %v2270_v31 = vmax.f32 %v2254_v5, %v2262_v30  ;;  %v2294_v59 = vld [vmem:[#allocation5 + $0xf3] sm:$0x1] }
 0x3ec   :  { %v2318_v10 = vld [vmem:[#allocation5 + $0xf4] sm:$0x1]  ;;  %v2326_v39 = vld [vmem:[#allocation5 + $0xf5] sm:$0x1]  ;;  %2246 = vst [vmem:[#allocation6 + $0x77] sm:$0x1] %v2238_v7  ;;  %v2302_v41 = vmax.f32 %v2286_v34, %v2294_v59 }
 0x3ed   :  { %v2334_v32 = vmax.f32 %v2318_v10, %v2326_v39  ;;  %v2350_v35 = vld [vmem:[#allocation5 + $0xf6] sm:$0x1]  ;;  %v2358_v0 = vld [vmem:[#allocation5 + $0xf7] sm:$0x1]  ;;  %v2382_v21 = vld [vmem:[#allocation5 + $0xf8] sm:$0x1] }
 0x3ee   :  { %2278 = vst [vmem:[#allocation6 + $0x78] sm:$0x1] %v2270_v31  ;;  %v2366_v14 = vmax.f32 %v2350_v35, %v2358_v0  ;;  %v2390_v3 = vld [vmem:[#allocation5 + $0xf9] sm:$0x1]  ;;  %v2414_v44 = vld [vmem:[#allocation5 + $0xfa] sm:$0x1] }
 0x3ef   :  { %v2422_v46 = vld [vmem:[#allocation5 + $0xfb] sm:$0x1]  ;;  %2310 = vst [vmem:[#allocation6 + $0x79] sm:$0x1] %v2302_v41  ;;  %2342 = vst [vmem:[#allocation6 + $0x7a] sm:$0x1] %v2334_v32  ;;  %v2398_v12 = vmax.f32 %v2382_v21, %v2390_v3 }
 0x3f0   :  { %v2430_v48 = vmax.f32 %v2414_v44, %v2422_v46  ;;  %v2630_v50 = vld [vmem:[#allocation3 + $0xf8] sm:$0xff]  ;;  %v2629_v20 = vld [vmem:[#allocation3 + $0xf0] sm:$0xff]  ;;  %2374 = vst [vmem:[#allocation6 + $0x7b] sm:$0x1] %v2366_v14  ;;  %v2580_v49 = vld [vmem:[#allocation6 + $0x6c] sm:$0x3] }
 0x3f1   :  { %3211 = vmatprep.mubr.bf16.mxu1 %v2630_v50  ;;  %v2547_v54 = vld [vmem:[#allocation6 + $0x63] sm:$0xff]  ;;  %v2548_v58 = vld [vmem:[#allocation6 + $0x6b] sm:$0x3]  ;;  %2406 = vst [vmem:[#allocation6 + $0x7c] sm:$0x1] %v2398_v12  ;;  %v2612_v8 = vld [vmem:[#allocation3 + $0x68] sm:$0xff] }
 0x3f2   :  { %2438 = vst [vmem:[#allocation6 + $0x7d] sm:$0x1] %v2430_v48  ;;  %3212 = vmatmul.mubr.bf16.gmra.mrb[24].mxu1 %v2629_v20  ;;  %v2557_v60 = vpack.c.bf16 %v2548_v58, %v2547_v54  ;;  %v2579_v51 = vld [vmem:[#allocation6 + $0x64] sm:$0xff]  ;;  %v5966_v6 = vld [vmem:[#allocation14 + $0x214] ss:$8 sps:$4 sm:$0xff]   ;;  %v2607_v45 = vld [vmem:[#allocation3 + $0x40] sm:$0xff] }
 0x3f3   :  { %v2589_v9 = vpack.c.bf16 %v2580_v49, %v2579_v51  ;;  %v2453_v19 = vld [vmem:[#allocation6 + $0x70] sm:$0xff]  ;;  %v2602_v27 = vld [vmem:[#allocation3 + $0x18] sm:$0xff]  ;;  %v2601_v37 = vld [vmem:[#allocation3 + $0x10] sm:$0xff] }
 0x3f4   :  { %2565 = vst [vmem:[#allocation3 + $0x108] sm:$0x1f] %v2557_v60  ;;  %v5961_v42 = vld [vmem:[#allocation14 + $0x200] ss:$8 sps:$4 sm:$0xff]   ;;  %v5964_v61 = vld [vmem:[#allocation14 + $0x210] ss:$8 sps:$4 sm:$0xff]  }
 0x3f5   :  { %2597 = vst [vmem:[#allocation3 + $0x110] sm:$0x1f] %v2589_v9  ;;  %v2485_v53 = vld [vmem:[#allocation6 + $0x71] sm:$0xff]  ;;  %v5967_v56 = vld [vmem:[#allocation14 + $0x220] ss:$8 sps:$4 sm:$0xff]  }
 0x3f6   :  { %v2486_v52 = vld [vmem:[#allocation6 + $0x79] sm:$0x3]  ;;  %v5969_v17 = vld [vmem:[#allocation14 + $0x224] ss:$8 sps:$4 sm:$0xff]   ;;  %v5973_v62 = vld [vmem:[#allocation14 + $0x240] ss:$8 sps:$4 sm:$0xff]  }
 0x3f7   :  { %v2454_v2 = vld [vmem:[#allocation6 + $0x78] sm:$0x3]  ;;  %v2494_v29 = vpack.c.bf16 %v2486_v52, %v2485_v53  ;;  %v2518_v38 = vld [vmem:[#allocation6 + $0x7a] sm:$0x3]  ;;  %v2606_v26 = vld [vmem:[#allocation3 + $0x38] sm:$0xff] }
 0x3f8   :  { %v2462_v40 = vpack.c.bf16 %v2454_v2, %v2453_v19  ;;  %v2549_v13 = vld [vmem:[#allocation6 + $0x73] sm:$0xff]  ;;  %v2550_v47 = vld [vmem:[#allocation6 + $0x7b] sm:$0x3]  ;;  %v5975_v22 = vld [vmem:[#allocation14 + $0x244] ss:$8 sps:$4 sm:$0xff]  }
 0x3f9   :  { %v2517_v33 = vld [vmem:[#allocation6 + $0x72] sm:$0xff]  ;;  %v2582_v43 = vld [vmem:[#allocation6 + $0x7c] sm:$0x3]  ;;  %2502 = vst [vmem:[#allocation3 + $0x120] sm:$0x1f] %v2494_v29  ;;  %v2558_v11 = vpack.c.bf16 %v2550_v47, %v2549_v13  ;;  %v2622_v59 = vld [vmem:[#allocation3 + $0xb8] sm:$0xff] }
 0x3fa   :  { %v2526_v25 = vpack.c.bf16 %v2518_v38, %v2517_v33  ;;  %v2581_v24 = vld [vmem:[#allocation6 + $0x74] sm:$0xff]  ;;  %2470 = vst [vmem:[#allocation3 + $0x118] sm:$0x1f] %v2462_v40  ;;  %v2611_v55 = vld [vmem:[#allocation3 + $0x60] sm:$0xff]  ;;  %v2617_v4 = vld [vmem:[#allocation3 + $0x90] sm:$0xff] }
 0x3fb   :  { %v2590_v36 = vpack.c.bf16 %v2582_v43, %v2581_v24  ;;  %2566 = vst [vmem:[#allocation3 + $0x130] sm:$0x1f] %v2558_v11  ;;  %v5972_v23 = vld [vmem:[#allocation14 + $0x234] ss:$8 sps:$4 sm:$0xff]   ;;  %v5970_v18 = vld [vmem:[#allocation14 + $0x230] ss:$8 sps:$4 sm:$0xff]  }
 0x3fc   :  { %2534 = vst [vmem:[#allocation3 + $0x128] sm:$0x1f] %v2526_v25  ;;  %v5978_v28 = vld [vmem:[#allocation14 + $0x254] ss:$8 sps:$4 sm:$0xff]   ;;  %v5976_v7 = vld [vmem:[#allocation14 + $0x250] ss:$8 sps:$4 sm:$0xff]  }
 0x3fd   :  { %2598 = vst [vmem:[#allocation3 + $0x138] sm:$0x1f] %v2590_v36  ;;  %v5981_v5 = vld [vmem:[#allocation14 + $0x264] ss:$8 sps:$4 sm:$0xff]   ;;  %v5979_v30 = vld [vmem:[#allocation14 + $0x260] ss:$8 sps:$4 sm:$0xff]  }
 0x3fe   :  { %v5984_v34 = vld [vmem:[#allocation14 + $0x274] ss:$8 sps:$4 sm:$0xff]   ;;  %v5982_v10 = vld [vmem:[#allocation14 + $0x270] ss:$8 sps:$4 sm:$0xff]   ;;  %v2626_v32 = vld [vmem:[#allocation3 + $0xd8] sm:$0xff] }
 0x3ff   :  { %v2616_v31 = vld [vmem:[#allocation3 + $0x88] sm:$0xff]  ;;  %v2621_v39 = vld [vmem:[#allocation3 + $0xb0] sm:$0xff]  ;;  %v2627_v41 = vld [vmem:[#allocation3 + $0xe0] sm:$0xff] }
 0x400   :  { %v2635_v57 = vld [vmem:[#allocation3 + $0x120] sm:$0xff]  ;;  %v2632_v35 = vld [vmem:[#allocation3 + $0x108] sm:$0xff]  ;;  %v2613_v46 = vld [vmem:[#allocation3 + $0x70] sm:$0xff] }
 0x401   :  { %v2634_v1 = vld [vmem:[#allocation3 + $0x118] sm:$0xff]  ;;  %3221 = vmatprep.mubr.bf16.mxu1 %v2635_v57  ;;  %v2631_v0 = vld [vmem:[#allocation3 + $0x100] sm:$0xff]  ;;  %v2608_v44 = vld [vmem:[#allocation3 + $0x48] sm:$0xff] }
 0x402   :  { %3222 = vmatmul.mubr.bf16.gmra.mrb[28].mxu1 %v2634_v1  ;;  %v2637_v21 = vld [vmem:[#allocation3 + $0x130] sm:$0xff]  ;;  %v2603_v3 = vld [vmem:[#allocation3 + $0x20] sm:$0xff]  ;;  %v2618_v12 = vld [vmem:[#allocation3 + $0x98] sm:$0xff] }
 0x403   :  { %3264 = vmatprep.mubr.bf16.mxu1 %v2602_v27  ;;  %v2636_v14 = vld [vmem:[#allocation3 + $0x128] sm:$0xff]  ;;  %v2623_v48 = vld [vmem:[#allocation3 + $0xc0] sm:$0xff]  ;;  %v2633_v20 = vld [vmem:[#allocation3 + $0x110] sm:$0xff] }
 0x404   :  { %v2628_v50 = vld [vmem:[#allocation3 + $0xe8] sm:$0xff]  ;;  %v2638_v54 = vld [vmem:[#allocation3 + $0x138] sm:$0xff]  ;;  %v5987_v51 = vld [vmem:[#allocation17 + $0x48] sm:$0xff]  }
 0x405   :  { %v5985_v58 = vld [vmem:[#allocation17 + $0x40] sm:$0xff]   ;;  %v5988_v49 = vld [vmem:[#allocation17 + $0x8] sm:$0xff]   ;;  %v5989_v9 = vld [vmem:[#allocation17 + $0x50] sm:$0xff]  }
 0x406   :  { %v5986_v60 = vld [vmem:[#allocation17] sm:$0xff]   ;;  %v5990_v53 = vld [vmem:[#allocation17 + $0x10] sm:$0xff]   ;;  %v5991_v52 = vld [vmem:[#allocation17 + $0x58] sm:$0xff]  }
 0x407   :  { %v5992_v19 = vld [vmem:[#allocation17 + $0x18] sm:$0xff]   ;;  %v5993_v2 = vld [vmem:[#allocation17 + $0x60] sm:$0xff]   ;;  %v5995_v40 = vld [vmem:[#allocation17 + $0x68] sm:$0xff]  }
 0x408   :  { %v5994_v29 = vld [vmem:[#allocation17 + $0x20] sm:$0xff]   ;;  %v5996_v13 = vld [vmem:[#allocation17 + $0x28] sm:$0xff]   ;;  %v5997_v33 = vld [vmem:[#allocation17 + $0x70] sm:$0xff]  }
 0x409   :  { %v5998_v38 = vld [vmem:[#allocation17 + $0x30] sm:$0xff]   ;;  %v5999_v47 = vld [vmem:[#allocation17 + $0x78] sm:$0xff]   ;;  %v6003_v24 = vld [vmem:[#allocation17 + $0xc0] sm:$0xff]  }
 0x40a   :  { %3265 = vmatmul.mubr.bf16.vlgmr.msra.gmra.mrb[0].mxu1 %v2601_v37  ;;  %v6000_v25 = vld [vmem:[#allocation17 + $0x38] sm:$0xff]  }
 0x40b   :  { %3274 = vmatprep.mubr.bf16.mxu1 %v2607_v45  ;;  %3346 = vmatpush1.bf16.msra.mxu1 %v5961_v42  ;;  %v3458_v43 = vld [vmem:[#allocation16] sm:$0x3] }
 0x40c   :  { %3347 = vmatprep.subr.bf16.mxu1 %v5966_v6  ;;  %v7346_v11 = vrot.slane %v3458_v43, %v7247_v15  ;;  %v7349_v36 = vrot.slane %v3458_v43, %v7249_v63 }
 0x40f   :  { %3348 = vmatpush1.bf16.msra.mxu1 %v5964_v61 }
 0x410   :  { %3349 = vmatprep.subr.bf16.mxu1 %v5969_v17 }
 0x412   :  { %3275 = vmatmul.mubr.bf16.gmra.mrb[4].mxu1 %v2606_v26 }
 0x413   :  { %3284 = vmatprep.mubr.bf16.mxu1 %v2612_v8  ;;  %3350 = vmatpush1.bf16.msra.mxu1 %v5967_v56 }
 0x414   :  { %3351 = vmatprep.subr.bf16.mxu1 %v5972_v23 }
 0x417   :  { %3352 = vmatpush1.bf16.msra.mxu1 %v5970_v18 }
 0x418   :  { %3353 = vmatprep.subr.bf16.mxu1 %v5975_v22 }
 0x41a   :  { %3285 = vmatmul.mubr.bf16.gmra.mrb[8].mxu1 %v2611_v55 }
 0x41b   :  { %3294 = vmatprep.mubr.bf16.mxu1 %v2617_v4  ;;  %3354 = vmatpush1.bf16.msra.mxu1 %v5973_v62 }
 0x41c   :  { %3355 = vmatprep.subr.bf16.mxu1 %v5978_v28 }
 0x41f   :  { %3356 = vmatpush1.bf16.msra.mxu1 %v5976_v7 }
 0x420   :  { %3357 = vmatprep.subr.bf16.mxu1 %v5981_v5 }
 0x422   :  { %3295 = vmatmul.mubr.bf16.gmra.mrb[12].mxu1 %v2616_v31 }
 0x423   :  { %3304 = vmatprep.mubr.bf16.mxu1 %v2622_v59  ;;  %3358 = vmatpush1.bf16.msra.mxu1 %v5979_v30 }
 0x424   :  { %3359 = vmatprep.subr.bf16.mxu1 %v5984_v34 }
 0x427   :  { %3360 = vmatpush1.bf16.msra.mxu1 %v5982_v10 }
 0x428   :  { %5376 = vmatprep.subr.bf16.mxu1 %v5985_v58 }
 0x42a   :  { %3305 = vmatmul.mubr.bf16.gmra.mrb[16].mxu1 %v2621_v39 }
 0x42b   :  { %3314 = vmatprep.mubr.bf16.mxu1 %v2627_v41 }
 0x432   :  { %3315 = vmatmul.mubr.bf16.gmra.mrb[20].mxu1 %v2626_v32 }
 0x433   :  { %3324 = vmatprep.mubr.bf16.mxu1 %v2632_v35 }
 0x43a   :  { %3325 = vmatmul.mubr.bf16.gmra.mrb[24].mxu1 %v2631_v0 }
 0x43b   :  { %3334 = vmatprep.mubr.bf16.mxu1 %v2637_v21 }
 0x442   :  { %3335 = vmatmul.mubr.bf16.gmra.mrb[28].mxu1 %v2636_v14 }
 0x443   :  { %3377 = vmatprep.mubr.bf16.mxu1 %v7541_v16 }
 0x44a   :  { %3378 = vmatmul.mubr.bf16.vlgmr.msra.gmra.mrb[0].mxu1 %v2603_v3 }
 0x44b   :  { %3387 = vmatprep.mubr.bf16.mxu1 %v7541_v16  ;;  %5377 = vmatpush3.bf16.msra.mxu1 %v5986_v60 }
 0x44c   :  { %5378 = vmatprep.subr.bf16.mxu1 %v5987_v51 }
 0x44f   :  { %5379 = vmatpush3.bf16.msra.mxu1 %v5988_v49 }
 0x450   :  { %5380 = vmatprep.subr.bf16.mxu1 %v5989_v9 }
 0x452   :  { %3388 = vmatmul.mubr.bf16.gmra.mrb[4].mxu1 %v2608_v44 }
 0x453   :  { %3397 = vmatprep.mubr.bf16.mxu1 %v7541_v16  ;;  %5381 = vmatpush3.bf16.msra.mxu1 %v5990_v53 }
 0x454   :  { %5382 = vmatprep.subr.bf16.mxu1 %v5991_v52 }
 0x457   :  { %5383 = vmatpush3.bf16.msra.mxu1 %v5992_v19 }
 0x458   :  { %5384 = vmatprep.subr.bf16.mxu1 %v5993_v2 }
 0x45a   :  { %3398 = vmatmul.mubr.bf16.gmra.mrb[8].mxu1 %v2613_v46 }
 0x45b   :  { %3407 = vmatprep.mubr.bf16.mxu1 %v7541_v16  ;;  %5385 = vmatpush3.bf16.msra.mxu1 %v5994_v29 }
 0x45c   :  { %5386 = vmatprep.subr.bf16.mxu1 %v5995_v40 }
 0x45f   :  { %5387 = vmatpush3.bf16.msra.mxu1 %v5996_v13 }
 0x460   :  { %5388 = vmatprep.subr.bf16.mxu1 %v5997_v33 }
 0x462   :  { %3408 = vmatmul.mubr.bf16.gmra.mrb[12].mxu1 %v2618_v12 }
 0x463   :  { %3417 = vmatprep.mubr.bf16.mxu1 %v7541_v16  ;;  %5389 = vmatpush3.bf16.msra.mxu1 %v5998_v38 }
 0x464   :  { %5390 = vmatprep.subr.bf16.mxu1 %v5999_v47 }
 0x467   :  { %5391 = vmatpush3.bf16.msra.mxu1 %v6000_v25 }
 0x468   :  { %5398 = vmatprep.subr.bf16.mxu1 %v6003_v24 }
 0x46a   :  { %3418 = vmatmul.mubr.bf16.gmra.mrb[16].mxu1 %v2623_v48 }
 0x46b   :  { %3427 = vmatprep.mubr.bf16.mxu1 %v7541_v16 }
 0x472   :  { %3428 = vmatmul.mubr.bf16.gmra.mrb[20].mxu1 %v2628_v50 }
 0x473   :  { %3437 = vmatprep.mubr.bf16.mxu1 %v7541_v16 }
 0x47a   :  { %3438 = vmatmul.mubr.bf16.gmra.mrb[24].mxu1 %v2633_v20 }
 0x47b   :  { %3447 = vmatprep.mubr.bf16.mxu1 %v7541_v16 }
 0x482   :  { %3448 = vmatmul.mubr.bf16.gmra.mrb[28].mxu1 %v2638_v54 }
 0x51d   :  { %v3379_v57 = vpop.f32.mrb[0].mxu1 }
 0x51e   :  { %v3470_v1 = vadd.f32 %v7346_v11, %v3379_v57  ;;  %v3381_v27 = vpop.f32.mrb[1].mxu1 }
 0x51f   :  { %v3471_v42 = vadd.f32 %v7349_v36, %v3381_v27  ;;  %v3383_v6 = vpop.f32.mrb[2].mxu1 }
 0x520   :  { %v3502_v37 = vmax.f32 %v3470_v1, 0.0  ;;  %v3472_v45 = vadd.f32 %v7346_v11, %v3383_v6  ;;  %v3385_v61 = vpop.f32.mrb[3].mxu1 }
 0x521   :  { %v3503_v17 = vmax.f32 %v3471_v42, 0.0  ;;  %v3473_v56 = vadd.f32 %v7349_v36, %v3385_v61 }
 0x522   :  { %v3504_v23 = vmax.f32 %v3472_v45, 0.0 }
 0x523   :  { %v3534_v26 = vmax.f32 %v3502_v37, %v3503_v17  ;;  %v3505_v8 = vmax.f32 %v3473_v56, 0.0 }
 0x525   :  { %3550 = vst [vmem:[#allocation7] sm:$0xff] %v3534_v26  ;;  %v3535_v18 = vmax.f32 %v3504_v23, %v3505_v8  ;;  %v3389_v22 = vpop.f32.mrb[4].mxu1 }
 0x526   :  { %v3474_v62 = vadd.f32 %v7346_v11, %v3389_v22  ;;  %v3391_v28 = vpop.f32.mrb[5].mxu1 }
 0x527   :  { %3551 = vst [vmem:[#allocation7 + $0x8] sm:$0x3] %v3535_v18  ;;  %v3475_v55 = vadd.f32 %v7349_v36, %v3391_v28  ;;  %v3393_v4 = vpop.f32.mrb[6].mxu1 }
 0x528   :  { %v3506_v7 = vmax.f32 %v3474_v62, 0.0  ;;  %v3476_v5 = vadd.f32 %v7346_v11, %v3393_v4  ;;  %v3395_v30 = vpop.f32.mrb[7].mxu1 }
 0x529   :  { %v3507_v34 = vmax.f32 %v3475_v55, 0.0  ;;  %v3477_v31 = vadd.f32 %v7349_v36, %v3395_v30 }
 0x52a   :  { %v3508_v59 = vmax.f32 %v3476_v5, 0.0 }
 0x52b   :  { %v3536_v10 = vmax.f32 %v3506_v7, %v3507_v34  ;;  %v3509_v39 = vmax.f32 %v3477_v31, 0.0 }
 0x52c   :  { %v3566_v3 = vld [vmem:[#allocation7] sm:$0x1]  ;;  %v3574_v44 = vld [vmem:[#allocation7 + $0x1] sm:$0x1]  ;;  %v3654_v48 = vld [vmem:[#allocation7 + $0x2] sm:$0x1] }
 0x52d   :  { %3552 = vst [vmem:[#allocation7 + $0x10] sm:$0xff] %v3536_v10  ;;  %v3537_v41 = vmax.f32 %v3508_v59, %v3509_v39  ;;  %v3399_v32 = vpop.f32.mrb[8].mxu1  ;;  %v3662_v50 = vld [vmem:[#allocation7 + $0x3] sm:$0x1]  ;;  %v3735_v60 = vld [vmem:[#allocation7 + $0x4] sm:$0x1]  ;;  %v3582_v40 = vmax.f32 %v3566_v3, %v3574_v44 }
 0x52e   :  { %v3478_v35 = vadd.f32 %v7346_v11, %v3399_v32  ;;  %v3401_v0 = vpop.f32.mrb[9].mxu1  ;;  %v3743_v51 = vld [vmem:[#allocation7 + $0x5] sm:$0x1]  ;;  %v3816_v9 = vld [vmem:[#allocation7 + $0x6] sm:$0x1]  ;;  %v3670_v57 = vmax.f32 %v3654_v48, %v3662_v50 }
 0x52f   :  { %3553 = vst [vmem:[#allocation7 + $0x18] sm:$0x3] %v3537_v41  ;;  %v3479_v21 = vadd.f32 %v7349_v36, %v3401_v0  ;;  %v3403_v14 = vpop.f32.mrb[10].mxu1  ;;  %v3824_v53 = vld [vmem:[#allocation7 + $0x7] sm:$0x1]  ;;  %v3751_v1 = vmax.f32 %v3735_v60, %v3743_v51  ;;  %v5336_v8 = vpack.c.bf16 %v3582_v40, %v3582_v40 }
 0x530   :  { %v3510_v46 = vmax.f32 %v3478_v35, 0.0  ;;  %v3405_v12 = vpop.f32.mrb[11].mxu1  ;;  %v3480_v54 = vadd.f32 %v7346_v11, %v3403_v14  ;;  %v3832_v18 = vmax.f32 %v3816_v9, %v3824_v53  ;;  %v3897_v28 = vld [vmem:[#allocation7 + $0x8] sm:$0x1]  ;;  %v3905_v55 = vld [vmem:[#allocation7 + $0x9] sm:$0x1]  ;;  %v5344_v34 = vpack.c.bf16 %v3670_v57, %v3670_v57 }
 0x531   :  { %v3511_v20 = vmax.f32 %v3479_v21, 0.0  ;;  %v3481_v58 = vadd.f32 %v7349_v36, %v3405_v12  ;;  %v5352_v31 = vpack.c.bf16 %v3751_v1, %v3751_v1  ;;  %v7367_v21 = vunpack.c.l.b16 %v5336_v8 }
 0x532   :  { %v3512_v25 = vmax.f32 %v3480_v54, 0.0  ;;  %v5360_v14 = vpack.c.bf16 %v3832_v18, %v3832_v18  ;;  %v3913_v3 = vmax.f32 %v3897_v28, %v3905_v55 }
 0x533   :  { %v3538_v29 = vmax.f32 %v3510_v46, %v3511_v20  ;;  %v3513_v24 = vmax.f32 %v3481_v58, 0.0  ;;  %v7370_v9 = vunpack.c.l.b16 %v5352_v31 }
 0x534   :  { %v3567_v49 = vld [vmem:[#allocation7 + $0x10] sm:$0x1]  ;;  %v3575_v52 = vld [vmem:[#allocation7 + $0x11] sm:$0x1]  ;;  %v3655_v19 = vld [vmem:[#allocation7 + $0x12] sm:$0x1] }
 0x535   :  { %v3663_v2 = vld [vmem:[#allocation7 + $0x13] sm:$0x1]  ;;  %v3736_v13 = vld [vmem:[#allocation7 + $0x14] sm:$0x1]  ;;  %v3744_v33 = vld [vmem:[#allocation7 + $0x15] sm:$0x1]  ;;  %v3583_v27 = vmax.f32 %v3567_v49, %v3575_v52  ;;  %v3539_v56 = vmax.f32 %v3512_v25, %v3513_v24  ;;  %v3710_v49 = vunpack.c.l.b16 %v5344_v34  ;;  %v5368_v25 = vpack.c.bf16 %v3913_v3, %v3913_v3 }
 0x536   :  { %v3817_v38 = vld [vmem:[#allocation7 + $0x16] sm:$0x1]  ;;  %v3825_v47 = vld [vmem:[#allocation7 + $0x17] sm:$0x1]  ;;  %3554 = vst [vmem:[#allocation7 + $0x20] sm:$0xff] %v3538_v29  ;;  %v3409_v43 = vpop.f32.mrb[12].mxu1  ;;  %v3671_v61 = vmax.f32 %v3655_v19, %v3663_v2  ;;  %v3752_v17 = vmax.f32 %v3736_v13, %v3744_v33 }
 0x537   :  { %v3898_v42 = vld [vmem:[#allocation7 + $0x18] sm:$0x1]  ;;  %v3906_v6 = vld [vmem:[#allocation7 + $0x19] sm:$0x1]  ;;  %v3482_v37 = vadd.f32 %v7346_v11, %v3409_v43  ;;  %v3411_v45 = vpop.f32.mrb[13].mxu1  ;;  %v3833_v4 = vmax.f32 %v3817_v38, %v3825_v47  ;;  %v5337_v59 = vpack.c.bf16 %v3583_v27, %v3583_v27 }
 0x538   :  { %v3483_v23 = vadd.f32 %v7349_v36, %v3411_v45  ;;  %v3413_v26 = vpop.f32.mrb[14].mxu1  ;;  %v3914_v7 = vmax.f32 %v3898_v42, %v3906_v6  ;;  %3555 = vst [vmem:[#allocation7 + $0x28] sm:$0x3] %v3539_v56  ;;  %v5345_v39 = vpack.c.bf16 %v3671_v61, %v3671_v61  ;;  %v5353_v41 = vpack.c.bf16 %v3752_v17, %v3752_v17 }
 0x539   :  { %v3514_v22 = vmax.f32 %v3482_v37, 0.0  ;;  %v3415_v62 = vpop.f32.mrb[15].mxu1  ;;  %v3484_v30 = vadd.f32 %v7346_v11, %v3413_v26  ;;  %v5361_v48 = vpack.c.bf16 %v3833_v4, %v3833_v4  ;;  %v3623_v40 = vunpack.c.l.b16 %v5337_v59 }
 0x53a   :  { %v3515_v5 = vmax.f32 %v3483_v23, 0.0  ;;  %v3485_v10 = vadd.f32 %v7349_v36, %v3415_v62  ;;  %v5369_v50 = vpack.c.bf16 %v3914_v7, %v3914_v7  ;;  %v3711_v13 = vunpack.c.l.b16 %v5345_v39 }
 0x53b   :  { %v3516_v35 = vmax.f32 %v3484_v30, 0.0  ;;  %v3792_v33 = vunpack.c.l.b16 %v5353_v41  ;;  %v3873_v6 = vunpack.c.l.b16 %v5361_v48  ;;  %v3872_v56 = vunpack.c.l.b16 %v5360_v14 }
 0x53c   :  { %v3540_v32 = vmax.f32 %v3514_v22, %v3515_v5  ;;  %v3517_v12 = vmax.f32 %v3485_v10, 0.0  ;;  %v3954_v37 = vunpack.c.l.b16 %v5369_v50  ;;  %v3630_v18 = vrot.slane %v3623_v40, 7 }
 0x53d   :  { %v3419_v0 = vpop.f32.mrb[16].mxu1  ;;  %v3568_v44 = vld [vmem:[#allocation7 + $0x20] sm:$0x1]  ;;  %v3576_v46 = vld [vmem:[#allocation7 + $0x21] sm:$0x1]  ;;  %v3718_v22 = vrot.slane %v3711_v13, 7  ;;  %v3953_v59 = vunpack.c.l.b16 %v5368_v25 }
 0x53e   :  { %v3584_v20 = vmax.f32 %v3568_v44, %v3576_v46  ;;  %v3656_v54 = vld [vmem:[#allocation7 + $0x22] sm:$0x1]  ;;  %v3664_v58 = vld [vmem:[#allocation7 + $0x23] sm:$0x1]  ;;  %v3737_v60 = vld [vmem:[#allocation7 + $0x24] sm:$0x1]  ;;  %v3486_v51 = vadd.f32 %v7346_v11, %v3419_v0  ;;  %v3541_v29 = vmax.f32 %v3516_v35, %v3517_v12  ;;  %v3632_v48 = vsel %vm3631_vm0, %v3630_v18, %v7367_v21 }
 0x53f   :  { %3556 = vst [vmem:[#allocation7 + $0x30] sm:$0xff] %v3540_v32  ;;  %v3672_v53 = vmax.f32 %v3656_v54, %v3664_v58  ;;  %v3745_v52 = vld [vmem:[#allocation7 + $0x25] sm:$0x1]  ;;  %v3818_v19 = vld [vmem:[#allocation7 + $0x26] sm:$0x1]  ;;  %v3421_v47 = vpop.f32.mrb[17].mxu1  ;;  %v3719_v50 = vsel %vm3631_vm0, %v3718_v22, %v3710_v49 }
 0x540   :  { %v3826_v2 = vld [vmem:[#allocation7 + $0x27] sm:$0x1]  ;;  %v3753_v38 = vmax.f32 %v3737_v60, %v3745_v52  ;;  %v3899_v43 = vld [vmem:[#allocation7 + $0x28] sm:$0x1]  ;;  %v3907_v57 = vld [vmem:[#allocation7 + $0x29] sm:$0x1]  ;;  %v3487_v27 = vadd.f32 %v7349_v36, %v3421_v47  ;;  %v5338_v45 = vpack.c.bf16 %v3584_v20, %v3584_v20 }
 0x541   :  { %v3834_v24 = vmax.f32 %v3818_v19, %v3826_v2  ;;  %3557 = vst [vmem:[#allocation7 + $0x38] sm:$0x3] %v3541_v29  ;;  %v3518_v1 = vmax.f32 %v3486_v51, 0.0  ;;  %v3423_v42 = vpop.f32.mrb[18].mxu1  ;;  %v3915_v61 = vmax.f32 %v3899_v43, %v3907_v57  ;;  %v5346_v23 = vpack.c.bf16 %v3672_v53, %v3672_v53 }
 0x542   :  { %v3425_v17 = vpop.f32.mrb[19].mxu1  ;;  %v3519_v26 = vmax.f32 %v3487_v27, 0.0  ;;  %v3488_v8 = vadd.f32 %v7346_v11, %v3423_v42  ;;  %v3799_v62 = vrot.slane %v3792_v33, 7  ;;  %v5354_v28 = vpack.c.bf16 %v3753_v38, %v3753_v38 }
 0x543   :  { %v5362_v4 = vpack.c.bf16 %v3834_v24, %v3834_v24  ;;  %v5370_v7 = vpack.c.bf16 %v3915_v61, %v3915_v61  ;;  %v3489_v31 = vadd.f32 %v7349_v36, %v3425_v17  ;;  %v3880_v10 = vrot.slane %v3873_v6, 7 }
 0x544   :  { %v3542_v34 = vmax.f32 %v3518_v1, %v3519_v26  ;;  %v3961_v39 = vrot.slane %v3954_v37, 7  ;;  %v3624_v41 = vunpack.c.l.b16 %v5338_v45  ;;  %v3712_v0 = vunpack.c.l.b16 %v5346_v23 }
 0x545   :  { %v3429_v55 = vpop.f32.mrb[20].mxu1  ;;  %v3520_v12 = vmax.f32 %v3488_v8, 0.0  ;;  %v3793_v20 = vunpack.c.l.b16 %v5354_v28  ;;  %v3874_v60 = vunpack.c.l.b16 %v5362_v4  ;;  %v3955_v51 = vunpack.c.l.b16 %v5370_v7 }
 0x546   :  { %v3569_v5 = vld [vmem:[#allocation7 + $0x30] sm:$0x1]  ;;  %v3577_v30 = vld [vmem:[#allocation7 + $0x31] sm:$0x1]  ;;  %v3657_v32 = vld [vmem:[#allocation7 + $0x32] sm:$0x1]  ;;  %v3490_v54 = vadd.f32 %v7346_v11, %v3429_v55  ;;  %v3800_v40 = vsel %vm3631_vm0, %v3799_v62, %v7370_v9  ;;  %v3881_v13 = vsel %vm3631_vm0, %v3880_v10, %v3872_v56  ;;  %v3962_v21 = vsel %vm3631_vm0, %v3961_v39, %v3953_v59 }
 0x547   :  { %v3665_v35 = vld [vmem:[#allocation7 + $0x33] sm:$0x1]  ;;  %v3585_v14 = vmax.f32 %v3569_v5, %v3577_v30  ;;  %v3738_v44 = vld [vmem:[#allocation7 + $0x34] sm:$0x1]  ;;  %v3746_v46 = vld [vmem:[#allocation7 + $0x35] sm:$0x1] }
 0x548   :  { %v3673_v3 = vmax.f32 %v3657_v32, %v3665_v35  ;;  %3558 = vst [vmem:[#allocation7 + $0x40] sm:$0xff] %v3542_v34  ;;  %v3431_v58 = vpop.f32.mrb[21].mxu1  ;;  %v3754_v53 = vmax.f32 %v3738_v44, %v3746_v46  ;;  %v3819_v52 = vld [vmem:[#allocation7 + $0x36] sm:$0x1]  ;;  %v3827_v19 = vld [vmem:[#allocation7 + $0x37] sm:$0x1] }
 0x549   :  { %v3521_v2 = vmax.f32 %v3489_v31, 0.0  ;;  %v3433_v29 = vpop.f32.mrb[22].mxu1  ;;  %v5339_v33 = vpack.c.bf16 %v3585_v14, %v3585_v14  ;;  %v3633_v38 = vrot.slane %v3624_v41, 6  ;;  %v3720_v47 = vrot.slane %v3712_v0, 6  ;;  %v3900_v24 = vld [vmem:[#allocation7 + $0x38] sm:$0x1] }
 0x54a   :  { %v3435_v49 = vpop.f32.mrb[23].mxu1  ;;  %v5347_v25 = vpack.c.bf16 %v3673_v3, %v3673_v3  ;;  %v3908_v43 = vld [vmem:[#allocation7 + $0x39] sm:$0x1]  ;;  %v3801_v1 = vrot.slane %v3793_v20, 6  ;;  %v3835_v27 = vmax.f32 %v3819_v52, %v3827_v19  ;;  %v3522_v42 = vmax.f32 %v3490_v54, 0.0 }
 0x54b   :  { %v3543_v57 = vmax.f32 %v3520_v12, %v3521_v2  ;;  %v3491_v6 = vadd.f32 %v7349_v36, %v3431_v58  ;;  %v3882_v9 = vrot.slane %v3874_v60, 6  ;;  %v3963_v45 = vrot.slane %v3955_v51, 6 }
 0x54c   :  { %v5355_v61 = vpack.c.bf16 %v3754_v53, %v3754_v53  ;;  %v3492_v17 = vadd.f32 %v7346_v11, %v3433_v29  ;;  %v3625_v23 = vunpack.c.l.b16 %v5339_v33  ;;  %v3916_v26 = vmax.f32 %v3900_v24, %v3908_v43 }
 0x54d   :  { %v3439_v37 = vpop.f32.mrb[24].mxu1  ;;  %3559 = vst [vmem:[#allocation7 + $0x48] sm:$0x3] %v3543_v57  ;;  %v3523_v22 = vmax.f32 %v3491_v6, 0.0  ;;  %v3493_v62 = vadd.f32 %v7349_v36, %v3435_v49  ;;  %v3635_v28 = vsel %vm3634_vm1, %v3633_v38, %v3632_v48  ;;  %v3721_v55 = vsel %vm3634_vm1, %v3720_v47, %v3719_v50 }
 0x54e   :  { %v3441_v56 = vpop.f32.mrb[25].mxu1  ;;  %v3713_v4 = vunpack.c.l.b16 %v5347_v25  ;;  %v3494_v30 = vadd.f32 %v7346_v11, %v3439_v37  ;;  %v7390_v31 = vsel %vm3634_vm1, %v3801_v1, %v3800_v40  ;;  %v5363_v59 = vpack.c.bf16 %v3835_v27, %v3835_v27 }
 0x54f   :  { %v3570_v8 = vld [vmem:[#allocation7 + $0x40] sm:$0x1]  ;;  %v3578_v18 = vld [vmem:[#allocation7 + $0x41] sm:$0x1]  ;;  %v3658_v7 = vld [vmem:[#allocation7 + $0x42] sm:$0x1]  ;;  %v3544_v32 = vmax.f32 %v3522_v42, %v3523_v22  ;;  %v7393_v0 = vsel %vm3634_vm1, %v3882_v9, %v3881_v13  ;;  %v7395_v14 = vunpack.c.l.b16 %v5355_v61  ;;  %v7398_v46 = vsel %vm3634_vm1, %v3963_v45, %v3962_v21 }
 0x550   :  { %v3666_v5 = vld [vmem:[#allocation7 + $0x43] sm:$0x1]  ;;  %v3443_v34 = vpop.f32.mrb[26].mxu1  ;;  %v3586_v10 = vmax.f32 %v3570_v8, %v3578_v18  ;;  %v3739_v39 = vld [vmem:[#allocation7 + $0x44] sm:$0x1]  ;;  %v3524_v44 = vmax.f32 %v3492_v17, 0.0  ;;  %v5371_v48 = vpack.c.bf16 %v3916_v26, %v3916_v26  ;;  %v3495_v53 = vadd.f32 %v7349_v36, %v3441_v56 }
 0x551   :  { %v3747_v41 = vld [vmem:[#allocation7 + $0x45] sm:$0x1]  ;;  %v3445_v35 = vpop.f32.mrb[27].mxu1  ;;  %v3674_v3 = vmax.f32 %v3658_v7, %v3666_v5  ;;  %v3636_v12 = vrot.slane %v3625_v23, 5  ;;  %v3820_v50 = vld [vmem:[#allocation7 + $0x46] sm:$0x1]  ;;  %v7401_v52 = vunpack.c.l.b16 %v5363_v59  ;;  %v3496_v13 = vadd.f32 %v7346_v11, %v3443_v34 }
 0x552   :  { %v3828_v20 = vld [vmem:[#allocation7 + $0x47] sm:$0x1]  ;;  %3560 = vst [vmem:[#allocation7 + $0x50] sm:$0xff] %v3544_v32  ;;  %v3525_v54 = vmax.f32 %v3493_v62, 0.0  ;;  %v3722_v58 = vrot.slane %v3713_v4, 5  ;;  %v3755_v60 = vmax.f32 %v3739_v39, %v3747_v41  ;;  %v3526_v51 = vmax.f32 %v3494_v30, 0.0 }
 0x553   :  { %v5340_v19 = vpack.c.bf16 %v3586_v10, %v3586_v10  ;;  %v3803_v33 = vrot.slane %v7395_v14, 5  ;;  %v5348_v49 = vpack.c.bf16 %v3674_v3, %v3674_v3  ;;  %v3836_v38 = vmax.f32 %v3820_v50, %v3828_v20 }
 0x554   :  { %v3901_v2 = vld [vmem:[#allocation7 + $0x48] sm:$0x1]  ;;  %v3909_v29 = vld [vmem:[#allocation7 + $0x49] sm:$0x1]  ;;  %v3545_v40 = vmax.f32 %v3524_v44, %v3525_v54  ;;  %v3527_v47 = vmax.f32 %v3495_v53, 0.0  ;;  %v7405_v24 = vunpack.c.l.b16 %v5371_v48  ;;  %v3528_v57 = vmax.f32 %v3496_v13, 0.0 }
 0x555   :  { %v3449_v21 = vpop.f32.mrb[28].mxu1  ;;  %v3917_v43 = vmax.f32 %v3901_v2, %v3909_v29  ;;  %v3497_v1 = vadd.f32 %v7349_v36, %v3445_v35  ;;  %v7409_v42 = vsel %vm3637_vm2, %v3636_v12, %v3635_v28  ;;  %v7412_v6 = vsel %vm3637_vm2, %v3722_v58, %v3721_v55 }
 0x556   :  { %v3451_v25 = vpop.f32.mrb[29].mxu1  ;;  %3561 = vst [vmem:[#allocation7 + $0x58] sm:$0x3] %v3545_v40  ;;  %v5356_v37 = vpack.c.bf16 %v3755_v60, %v3755_v60  ;;  %v3546_v9 = vmax.f32 %v3526_v51, %v3527_v47  ;;  %v3884_v61 = vrot.slane %v7401_v52, 5  ;;  %v7415_v17 = vunpack.c.l.b16 %v5340_v19 }
 0x557   :  { %v3453_v27 = vpop.f32.mrb[30].mxu1  ;;  %v3529_v56 = vmax.f32 %v3497_v1, 0.0  ;;  %v3498_v23 = vadd.f32 %v7346_v11, %v3449_v21  ;;  %v7418_v26 = vunpack.c.l.b16 %v5348_v49  ;;  %v5364_v8 = vpack.c.bf16 %v3836_v38, %v3836_v38 }
 0x558   :  { %v3455_v45 = vpop.f32.mrb[31].mxu1  ;;  %3562 = vst [vmem:[#allocation7 + $0x60] sm:$0xff] %v3546_v9  ;;  %v3499_v28 = vadd.f32 %v7349_v36, %v3451_v25  ;;  %v3500_v55 = vadd.f32 %v7346_v11, %v3453_v27  ;;  %v5372_v4 = vpack.c.bf16 %v3917_v43, %v3917_v43  ;;  %v7423_v39 = vunpack.c.l.b16 %v5356_v37 }
 0x559   :  { %v3571_v18 = vld [vmem:[#allocation7 + $0x50] sm:$0x1]  ;;  %v3579_v22 = vld [vmem:[#allocation7 + $0x51] sm:$0x1]  ;;  %v3659_v62 = vld [vmem:[#allocation7 + $0x52] sm:$0x1]  ;;  %v3547_v59 = vmax.f32 %v3528_v57, %v3529_v56  ;;  %v3501_v10 = vadd.f32 %v7349_v36, %v3455_v45  ;;  %v3876_v50 = vunpack.c.l.b16 %v5364_v8  ;;  %v3804_v2 = vsel %vm3637_vm2, %v3803_v33, %v7390_v31 }
 0x55a   :  { %v3587_v7 = vmax.f32 %v3571_v18, %v3579_v22  ;;  %v3667_v5 = vld [vmem:[#allocation7 + $0x53] sm:$0x1]  ;;  %v3740_v30 = vld [vmem:[#allocation7 + $0x54] sm:$0x1]  ;;  %v3748_v34 = vld [vmem:[#allocation7 + $0x55] sm:$0x1]  ;;  %v3957_v36 = vunpack.c.l.b16 %v5372_v4  ;;  %v3885_v21 = vsel %vm3637_vm2, %v3884_v61, %v7393_v0 }
 0x55b   :  { %v3675_v41 = vmax.f32 %v3659_v62, %v3667_v5  ;;  %v3756_v32 = vmax.f32 %v3740_v30, %v3748_v34  ;;  %v3821_v35 = vld [vmem:[#allocation7 + $0x56] sm:$0x1]  ;;  %v3829_v14 = vld [vmem:[#allocation7 + $0x57] sm:$0x1]  ;;  %v3530_v3 = vmax.f32 %v3498_v23, 0.0  ;;  %v3531_v48 = vmax.f32 %v3499_v28, 0.0 }
 0x55c   :  { %v5341_v44 = vpack.c.bf16 %v3587_v7, %v3587_v7  ;;  %v3837_v12 = vmax.f32 %v3821_v35, %v3829_v14  ;;  %3563 = vst [vmem:[#allocation7 + $0x68] sm:$0x3] %v3547_v59  ;;  %v3532_v11 = vmax.f32 %v3500_v55, 0.0  ;;  %v3533_v51 = vmax.f32 %v3501_v10, 0.0 }
 0x55d   :  { %v5349_v20 = vpack.c.bf16 %v3675_v41, %v3675_v41  ;;  %v5357_v54 = vpack.c.bf16 %v3756_v32, %v3756_v32  ;;  %v3902_v58 = vld [vmem:[#allocation7 + $0x58] sm:$0x1]  ;;  %v3910_v60 = vld [vmem:[#allocation7 + $0x59] sm:$0x1]  ;;  %v3548_v19 = vmax.f32 %v3530_v3, %v3531_v48  ;;  %v3965_v29 = vrot.slane %v7405_v24, 5 }
 0x55e   :  { %v5365_v53 = vpack.c.bf16 %v3837_v12, %v3837_v12  ;;  %v3918_v52 = vmax.f32 %v3902_v58, %v3910_v60  ;;  %v3639_v40 = vrot.slane %v7415_v17, 4  ;;  %v3549_v13 = vmax.f32 %v3532_v11, %v3533_v51 }
 0x55f   :  { %v3724_v49 = vrot.slane %v7418_v26, 4  ;;  %v3627_v38 = vunpack.c.l.b16 %v5341_v44  ;;  %v3715_v47 = vunpack.c.l.b16 %v5349_v20  ;;  %v3572_v25 = vld [vmem:[#allocation7 + $0x60] sm:$0x1]  ;;  %v3580_v43 = vld [vmem:[#allocation7 + $0x61] sm:$0x1]  ;;  %3564 = vst [vmem:[#allocation7 + $0x70] sm:$0xff] %v3548_v19  ;;  %v3796_v1 = vunpack.c.l.b16 %v5357_v54 }
 0x560   :  { %v3805_v57 = vrot.slane %v7423_v39, 4  ;;  %v5373_v27 = vpack.c.bf16 %v3918_v52, %v3918_v52  ;;  %v3588_v31 = vmax.f32 %v3572_v25, %v3580_v43  ;;  %v3660_v33 = vld [vmem:[#allocation7 + $0x62] sm:$0x1]  ;;  %v3668_v24 = vld [vmem:[#allocation7 + $0x63] sm:$0x1]  ;;  %v3886_v37 = vrot.slane %v3876_v50, 4 }
 0x561   :  { %3565 = vst [vmem:[#allocation7 + $0x78] sm:$0x3] %v3549_v13  ;;  %v3967_v9 = vrot.slane %v3957_v36, 4  ;;  %v3877_v45 = vunpack.c.l.b16 %v5365_v53  ;;  %v3676_v17 = vmax.f32 %v3660_v33, %v3668_v24  ;;  %v3741_v0 = vld [vmem:[#allocation7 + $0x64] sm:$0x1]  ;;  %v3966_v56 = vsel %vm3637_vm2, %v3965_v29, %v7398_v46 }
 0x562   :  { %v3749_v61 = vld [vmem:[#allocation7 + $0x65] sm:$0x1]  ;;  %v3641_v23 = vsel %vm3640_vm3, %v3639_v40, %v7409_v42  ;;  %v5342_v26 = vpack.c.bf16 %v3588_v31, %v3588_v31  ;;  %v3822_v18 = vld [vmem:[#allocation7 + $0x66] sm:$0x1]  ;;  %v3830_v22 = vld [vmem:[#allocation7 + $0x67] sm:$0x1]  ;;  %v3958_v34 = vunpack.c.l.b16 %v5373_v27  ;;  %v3725_v46 = vsel %vm3640_vm3, %v3724_v49, %v7412_v6 }
 0x563   :  { %v3757_v8 = vmax.f32 %v3741_v0, %v3749_v61  ;;  %v3903_v62 = vld [vmem:[#allocation7 + $0x68] sm:$0x1]  ;;  %v3642_v28 = vrot.slane %v3627_v38, 3  ;;  %v3726_v55 = vrot.slane %v3715_v47, 3  ;;  %v5350_v4 = vpack.c.bf16 %v3676_v17, %v3676_v17  ;;  %v3911_v5 = vld [vmem:[#allocation7 + $0x69] sm:$0x1] }
 0x564   :  { %v3838_v7 = vmax.f32 %v3822_v18, %v3830_v22  ;;  %v3807_v30 = vrot.slane %v3796_v1, 3  ;;  %v3919_v10 = vmax.f32 %v3903_v62, %v3911_v5  ;;  %v3806_v42 = vsel %vm3640_vm3, %v3805_v57, %v3804_v2 }
 0x565   :  { %v5358_v59 = vpack.c.bf16 %v3757_v8, %v3757_v8  ;;  %v3888_v39 = vrot.slane %v3877_v45, 3  ;;  %v3887_v32 = vsel %vm3640_vm3, %v3886_v37, %v3885_v21  ;;  %v3968_v35 = vsel %vm3640_vm3, %v3967_v9, %v3966_v56 }
 0x566   :  { %v5366_v41 = vpack.c.bf16 %v3838_v7, %v3838_v7  ;;  %v3628_v14 = vunpack.c.l.b16 %v5342_v26  ;;  %v5374_v3 = vpack.c.bf16 %v3919_v10, %v3919_v10  ;;  %v3573_v44 = vld [vmem:[#allocation7 + $0x70] sm:$0x1]  ;;  %v3581_v12 = vld [vmem:[#allocation7 + $0x71] sm:$0x1]  ;;  %v3716_v48 = vunpack.c.l.b16 %v5350_v4  ;;  %v3661_v50 = vld [vmem:[#allocation7 + $0x72] sm:$0x1] }
 0x567   :  { %v3589_v11 = vmax.f32 %v3573_v44, %v3581_v12  ;;  %v3669_v20 = vld [vmem:[#allocation7 + $0x73] sm:$0x1]  ;;  %v3644_v54 = vsel %vm3643_vm4, %v3642_v28, %v3641_v23  ;;  %v3727_v6 = vsel %vm3643_vm4, %v3726_v55, %v3725_v46  ;;  %v3969_v58 = vrot.slane %v3958_v34, 3  ;;  %v3742_v36 = vld [vmem:[#allocation7 + $0x74] sm:$0x1] }
 0x568   :  { %v3797_v60 = vunpack.c.l.b16 %v5358_v59  ;;  %v3677_v51 = vmax.f32 %v3661_v50, %v3669_v20  ;;  %v3750_v53 = vld [vmem:[#allocation7 + $0x75] sm:$0x1]  ;;  %v3808_v52 = vsel %vm3643_vm4, %v3807_v30, %v3806_v42  ;;  %v3878_v19 = vunpack.c.l.b16 %v5366_v41  ;;  %v3823_v40 = vld [vmem:[#allocation7 + $0x76] sm:$0x1]  ;;  %v3831_v13 = vld [vmem:[#allocation7 + $0x77] sm:$0x1] }
 0x569   :  { %v5343_v2 = vpack.c.bf16 %v3589_v11, %v3589_v11  ;;  %v3758_v29 = vmax.f32 %v3742_v36, %v3750_v53  ;;  %v3889_v21 = vsel %vm3643_vm4, %v3888_v39, %v3887_v32  ;;  %v3645_v49 = vrot.slane %v3628_v14, 2  ;;  %v3904_v43 = vld [vmem:[#allocation7 + $0x78] sm:$0x1]  ;;  %v3912_v57 = vld [vmem:[#allocation7 + $0x79] sm:$0x1]  ;;  %v6007_v50 = vld [vmem:[#allocation17 + $0xc8] sm:$0xff]  }
 0x56a   :  { %v3959_v38 = vunpack.c.l.b16 %v5374_v3  ;;  %v5351_v47 = vpack.c.bf16 %v3677_v51, %v3677_v51  ;;  %v3839_v25 = vmax.f32 %v3823_v40, %v3831_v13  ;;  %v3728_v1 = vrot.slane %v3716_v48, 2  ;;  %v6004_v48 = vld [vmem:[#allocation17 + $0x80] sm:$0xff]   ;;  %v6012_v51 = vld [vmem:[#allocation17 + $0x98] sm:$0xff]  }
 0x56b   :  { %v3629_v27 = vunpack.c.l.b16 %v5343_v2  ;;  %v5359_v31 = vpack.c.bf16 %v3758_v29, %v3758_v29  ;;  %v3920_v33 = vmax.f32 %v3904_v43, %v3912_v57  ;;  %v3970_v24 = vsel %vm3643_vm4, %v3969_v58, %v3968_v35  ;;  %v6010_v58 = vld [vmem:[#allocation17 + $0x90] sm:$0xff]   ;;  %v6013_v36 = vld [vmem:[#allocation17 + $0xe0] sm:$0xff]   ;;  %v6019_v40 = vld [vmem:[#allocation17 + $0xf8] sm:$0xff]  }
 0x56c   :  { %v3809_v37 = vrot.slane %v3797_v60, 2  ;;  %v3717_v9 = vunpack.c.l.b16 %v5351_v47  ;;  %v5367_v45 = vpack.c.bf16 %v3839_v25, %v3839_v25  ;;  %v3890_v17 = vrot.slane %v3878_v19, 2  ;;  %v6011_v60 = vld [vmem:[#allocation17 + $0xd8] sm:$0xff]   ;;  %v6014_v53 = vld [vmem:[#allocation17 + $0xa0] sm:$0xff]   ;;  %v6016_v19 = vld [vmem:[#allocation17 + $0xa8] sm:$0xff]  }
 0x56d   :  { %v3648_v0 = vrot.slane %v3629_v27, 1  ;;  %v3798_v61 = vunpack.c.l.b16 %v5359_v31  ;;  %v5375_v56 = vpack.c.bf16 %v3920_v33, %v3920_v33  ;;  %v3971_v23 = vrot.slane %v3959_v38, 2  ;;  %v6017_v2 = vld [vmem:[#allocation17 + $0xf0] sm:$0xff]   ;;  %v6020_v13 = vld [vmem:[#allocation17 + $0xb8] sm:$0xff]   ;;  %v6022_v47 = vld [vmem:[#allocation17 + $0x108] sm:$0xff]  }
 0x56e   :  { %v3730_v26 = vrot.slane %v3717_v9, 1  ;;  %v3879_v8 = vunpack.c.l.b16 %v5367_v45  ;;  %v3647_v18 = vsel %vm3646_vm5, %v3645_v49, %v3644_v54  ;;  %v3729_v55 = vsel %vm3646_vm5, %v3728_v1, %v3727_v6  ;;  %v6008_v54 = vld [vmem:[#allocation17 + $0x88] sm:$0xff]   ;;  %v6009_v6 = vld [vmem:[#allocation17 + $0xd0] sm:$0xff]   ;;  %v6024_v43 = vld [vmem:[#allocation17 + $0x118] sm:$0xff]  }
 0x56f   :  { %v3811_v22 = vrot.slane %v3798_v61, 1  ;;  %v3960_v62 = vunpack.c.l.b16 %v5375_v56  ;;  %v3650_v28 = vsel %vm3649_vm6, %v3648_v0, %v3647_v18  ;;  %v3810_v30 = vsel %vm3646_vm5, %v3809_v37, %v3808_v52  ;;  %v6015_v52 = vld [vmem:[#allocation17 + $0xe8] sm:$0xff]   ;;  %v6018_v29 = vld [vmem:[#allocation17 + $0xb0] sm:$0xff]   ;;  %v6025_v57 = vld [vmem:[#allocation17 + $0x120] sm:$0xff]  }
 0x570   :  { %v3892_v4 = vrot.slane %v3879_v8, 1  ;;  %v3651_v7 = vpack.c.b16 %v3650_v28, %v3650_v28  ;;  %v3731_v5 = vsel %vm3649_vm6, %v3730_v26, %v3729_v55  ;;  %v3891_v46 = vsel %vm3646_vm5, %v3890_v17, %v3889_v21  ;;  %v6021_v21 = vld [vmem:[#allocation17 + $0x100] sm:$0xff]   ;;  %v6023_v25 = vld [vmem:[#allocation17 + $0x110] sm:$0xff]   ;;  %v6026_v1 = vld [vmem:[#allocation17 + $0x128] sm:$0xff]  }
 0x571   :  { %v3973_v34 = vrot.slane %v3960_v62, 1  ;;  %v3732_v59 = vpack.c.b16 %v3731_v5, %v3731_v5  ;;  %v3812_v10 = vsel %vm3649_vm6, %v3811_v22, %v3810_v30  ;;  %v3972_v42 = vsel %vm3646_vm5, %v3971_v23, %v3970_v24  ;;  %v6027_v27 = vld [vmem:[#allocation17 + $0x130] sm:$0xff]   ;;  %v6028_v31 = vld [vmem:[#allocation17 + $0x138] sm:$0xff]   ;;  %v6030_v24 = vld [vmem:[#allocation20] sm:$0xff]  }
 0x572   :  { %3653 = vst [vmem:[#allocation4] sm:$0xf] %v3651_v7  ;;  %v3813_v39 = vpack.c.b16 %v3812_v10, %v3812_v10  ;;  %v3893_v41 = vsel %vm3649_vm6, %v3892_v4, %v3891_v46  ;;  %v6500_v38 = vmov 0.0   ;;  %v6031_v37 = vld [vmem:[#allocation20 + $0x8] sm:$0xff]   ;;  %v6032_v9 = vld [vmem:[#allocation20 + $0x10] sm:$0xff]   ;;  %v6033_v45 = vld [vmem:[#allocation20 + $0x18] sm:$0xff]  }
 0x573   :  { %3734 = vst [vmem:[#allocation4 + $0x4] sm:$0xf] %v3732_v59  ;;  %v3894_v32 = vpack.c.b16 %v3893_v41, %v3893_v41  ;;  %v3974_v35 = vsel %vm3649_vm6, %v3973_v34, %v3972_v42  ;;  %v6034_v17 = vld [vmem:[#allocation20 + $0x20] sm:$0xff]   ;;  %v6035_v0 = vld [vmem:[#allocation20 + $0x28] sm:$0xff]   ;;  %v6036_v61 = vld [vmem:[#allocation20 + $0x30] sm:$0xff]  }
 0x574   :  { %3815 = vst [vmem:[#allocation4 + $0x8] sm:$0xf] %v3813_v39  ;;  %v3975_v14 = vpack.c.b16 %v3974_v35, %v3974_v35  ;;  %v6037_v56 = vld [vmem:[#allocation20 + $0x38] sm:$0xff]  }
 0x575   :  { %3896 = vst [vmem:[#allocation4 + $0xc] sm:$0xf] %v3894_v32  ;;  %v5239_v62 = vld [vmem:[#allocation19] ss:$0 sm:$0xff]  ;;  %v6038_v32 = vld [vmem:[#allocation23] sm:$0xff]  }
 0x576   :  { %3977 = vst [vmem:[#allocation4 + $0x10] sm:$0xf] %v3975_v14  ;;  %v6039_v14 = vld [vmem:[#allocation23 + $0x8] sm:$0xff]  }
 0x57a   :  { %v3978_v3 = vld [vmem:[#allocation4] sm:$0xff] }
 0x57b   :  { %v5240_v44 = vcombine.low %v3978_v3, %v3978_v3  ;;  %v5241_v12 = vcombine.high %v3978_v3, %v3978_v3  ;;  %v6040_v3 = vld [vmem:[#allocation23 + $0x10] sm:$0xff]  }
 0x57c   :  { %v3979_v11 = vld [vmem:[#allocation4 + $0x8] sm:$0xff] }
 0x57d   :  { %4358 = vmatprep.mubr.bf16.mxu1 %v5241_v12  ;;  %v5243_v20 = vcombine.high %v3979_v11, %v3979_v11  ;;  %v5242_v49 = vcombine.low %v3979_v11, %v3979_v11  ;;  %v6029_v33 = vld [vmem:[#allocation4 + $0x10] ss:$0 sps:$4 sm:$0xff]   ;;  %v6042_v12 = vld [vmem:[#allocation23 + $0x20] sm:$0xff]  }
 0x57e   :  { %4359 = vmatmul.mubr.bf16.vlgmr.msra.gmra.mrb[32].mxu1 %v5240_v44  ;;  %v6041_v44 = vld [vmem:[#allocation23 + $0x18] sm:$0xff]   ;;  %v6044_v11 = vld [vmem:[#allocation23 + $0x30] sm:$0xff]  }
 0x57f   :  { %5399 = vmatpush3.bf16.msra.mxu1 %v6004_v48  ;;  %4398 = vmatprep.mubr.bf16.mxu1 %v5243_v20  ;;  %v6043_v48 = vld [vmem:[#allocation23 + $0x28] sm:$0xff]  }
 0x580   :  { %5400 = vmatprep.subr.bf16.mxu1 %v6007_v50  ;;  %v6045_v50 = vld [vmem:[#allocation23 + $0x38] sm:$0xff]   ;;  %v6048_v20 = vld [vmem:[#allocation26 + $0x4] ss:$8 sps:$4 sm:$0xff]  }
 0x583   :  { %5401 = vmatpush3.bf16.msra.mxu1 %v6008_v54  ;;  %v5285_v54 = vld [vmem:[#allocation22] ss:$0 sm:$0xff] }
 0x584   :  { %5402 = vmatprep.subr.bf16.mxu1 %v6009_v6 }
 0x587   :  { %5403 = vmatpush3.bf16.msra.mxu1 %v6010_v58 }
 0x588   :  { %5404 = vmatprep.subr.bf16.mxu1 %v6011_v60 }
 0x58b   :  { %5405 = vmatpush3.bf16.msra.mxu1 %v6012_v51 }
 0x58c   :  { %5406 = vmatprep.subr.bf16.mxu1 %v6013_v36 }
 0x58f   :  { %5407 = vmatpush3.bf16.msra.mxu1 %v6014_v53 }
 0x590   :  { %5408 = vmatprep.subr.bf16.mxu1 %v6015_v52  ;;  %v6046_v52 = vld [vmem:[#allocation26] ss:$8 sps:$4 sm:$0xff]  }
 0x593   :  { %5409 = vmatpush3.bf16.msra.mxu1 %v6016_v19 }
 0x594   :  { %5410 = vmatprep.subr.bf16.mxu1 %v6017_v2  ;;  %v6051_v2 = vld [vmem:[#allocation26 + $0x14] ss:$8 sps:$4 sm:$0xff]  }
 0x597   :  { %5411 = vmatpush3.bf16.msra.mxu1 %v6018_v29  ;;  %v6049_v29 = vld [vmem:[#allocation26 + $0x10] ss:$8 sps:$4 sm:$0xff]  }
 0x598   :  { %5412 = vmatprep.subr.bf16.mxu1 %v6019_v40  ;;  %v6054_v40 = vld [vmem:[#allocation26 + $0x24] ss:$8 sps:$4 sm:$0xff]  }
 0x59b   :  { %5413 = vmatpush3.bf16.msra.mxu1 %v6020_v13  ;;  %v6052_v13 = vld [vmem:[#allocation26 + $0x20] ss:$8 sps:$4 sm:$0xff]  }
 0x59c   :  { %5469 = vmatprep.subr.bf16.mxu1 %v6500_v38 }
 0x59e   :  { %4399 = vmatmul.mubr.bf16.vlgmr.msra.gmra.mrb[36].mxu1 %v5242_v49  ;;  %v6055_v49 = vld [vmem:[#allocation26 + $0x30] ss:$8 sps:$4 sm:$0xff]  }
 0x59f   :  { %5470 = vmatpush3.bf16.msra.mxu1 %v6021_v21  ;;  %5485 = vmatprep.mubr.msk.bf16.mxu1 %vm6501_vm7, %v6500_v38  ;;  %v6057_v21 = vld [vmem:[#allocation26 + $0x34] ss:$8 sps:$4 sm:$0xff]  }
 0x5a0   :  { %5471 = vmatprep.subr.bf16.mxu1 %v6500_v38 }
 0x5a3   :  { %5472 = vmatpush3.bf16.msra.mxu1 %v6022_v47  ;;  %v6058_v47 = vld [vmem:[#allocation26 + $0x40] ss:$8 sps:$4 sm:$0xff]  }
 0x5a4   :  { %5473 = vmatprep.subr.bf16.mxu1 %v6500_v38 }
 0x5a7   :  { %5474 = vmatpush3.bf16.msra.mxu1 %v6023_v25  ;;  %v6063_v25 = vld [vmem:[#allocation26 + $0x54] ss:$8 sps:$4 sm:$0xff]  }
 0x5a8   :  { %5475 = vmatprep.subr.bf16.mxu1 %v6500_v38 }
 0x5ab   :  { %5476 = vmatpush3.bf16.msra.mxu1 %v6024_v43  ;;  %v6061_v43 = vld [vmem:[#allocation26 + $0x50] ss:$8 sps:$4 sm:$0xff]  }
 0x5ac   :  { %5477 = vmatprep.subr.bf16.mxu1 %v6500_v38 }
 0x5af   :  { %5478 = vmatpush3.bf16.msra.mxu1 %v6025_v57  ;;  %v6066_v57 = vld [vmem:[#allocation26 + $0x64] ss:$8 sps:$4 sm:$0xff]  }
 0x5b0   :  { %5479 = vmatprep.subr.bf16.mxu1 %v6500_v38 }
 0x5b3   :  { %5480 = vmatpush3.bf16.msra.mxu1 %v6026_v1  ;;  %v6067_v1 = vld [vmem:[#allocation26 + $0x70] ss:$8 sps:$4 sm:$0xff]  }
 0x5b4   :  { %5481 = vmatprep.subr.bf16.mxu1 %v6500_v38 }
 0x5b7   :  { %5482 = vmatpush3.bf16.msra.mxu1 %v6027_v27  ;;  %v6069_v27 = vld [vmem:[#allocation26 + $0x74] ss:$8 sps:$4 sm:$0xff]  }
 0x5b8   :  { %5483 = vmatprep.subr.bf16.mxu1 %v6500_v38 }
 0x5bb   :  { %5484 = vmatpush3.bf16.msra.mxu1 %v6028_v31  ;;  %v6070_v31 = vld [vmem:[#allocation29 + $0x40] sm:$0xff]  }
 0x5bc   :  { %5489 = vmatprep.subr.bf16.mxu1 %v6500_v38  ;;  %5447 = vmatprep.subr.bf16.mxu0 %v6070_v31 }
 0x5be   :  { %5486 = vmatmul.mubr.bf16.vlgmr.msra.gmra.mrb[40].mxu1 %v6029_v33  ;;  %v6071_v33 = vld [vmem:[#allocation29] sm:$0xff]  }
 0x5bf   :  { %5505 = vmatprep.mubr.msk.bf16.mxu1 %vm6501_vm7, %v6500_v38  ;;  %5490 = vmatpush3.bf16.msra.mxu1 %v6030_v24  ;;  %v6072_v24 = vld [vmem:[#allocation29 + $0x48] sm:$0xff]  }
 0x5c0   :  { %5491 = vmatprep.subr.bf16.mxu1 %v6500_v38  ;;  %5448 = vmatpush3.bf16.msra.mxu0 %v6071_v33 }
 0x5c1   :  { %5449 = vmatprep.subr.bf16.mxu0 %v6072_v24 }
 0x5c3   :  { %5492 = vmatpush3.bf16.msra.mxu1 %v6031_v37  ;;  %v6073_v37 = vld [vmem:[#allocation29 + $0x8] sm:$0xff]  }
 0x5c4   :  { %5493 = vmatprep.subr.bf16.mxu1 %v6500_v38  ;;  %5450 = vmatpush3.bf16.msra.mxu0 %v6073_v37 }
 0x5c7   :  { %5494 = vmatpush3.bf16.msra.mxu1 %v6032_v9  ;;  %v6074_v9 = vld [vmem:[#allocation29 + $0x50] sm:$0xff]  }
 0x5c8   :  { %5495 = vmatprep.subr.bf16.mxu1 %v6500_v38  ;;  %5451 = vmatprep.subr.bf16.mxu0 %v6074_v9 }
 0x5cb   :  { %5496 = vmatpush3.bf16.msra.mxu1 %v6033_v45  ;;  %v6075_v45 = vld [vmem:[#allocation29 + $0x10] sm:$0xff]  }
 0x5cc   :  { %5497 = vmatprep.subr.bf16.mxu1 %v6500_v38  ;;  %5452 = vmatpush3.bf16.msra.mxu0 %v6075_v45 }
 0x5cf   :  { %5498 = vmatpush3.bf16.msra.mxu1 %v6034_v17  ;;  %v6076_v17 = vld [vmem:[#allocation29 + $0x58] sm:$0xff]  }
 0x5d0   :  { %5499 = vmatprep.subr.bf16.mxu1 %v6500_v38  ;;  %5453 = vmatprep.subr.bf16.mxu0 %v6076_v17 }
 0x5d3   :  { %5500 = vmatpush3.bf16.msra.mxu1 %v6035_v0  ;;  %v6077_v0 = vld [vmem:[#allocation29 + $0x18] sm:$0xff]  }
 0x5d4   :  { %5501 = vmatprep.subr.bf16.mxu1 %v6500_v38  ;;  %5454 = vmatpush3.bf16.msra.mxu0 %v6077_v0 }
 0x5d7   :  { %5502 = vmatpush3.bf16.msra.mxu1 %v6036_v61  ;;  %v6078_v61 = vld [vmem:[#allocation29 + $0x60] sm:$0xff]  }
 0x5d8   :  { %5503 = vmatprep.subr.bf16.mxu1 %v6500_v38  ;;  %5455 = vmatprep.subr.bf16.mxu0 %v6078_v61 }
 0x5db   :  { %5504 = vmatpush3.bf16.msra.mxu1 %v6037_v56  ;;  %v6079_v56 = vld [vmem:[#allocation29 + $0x20] sm:$0xff]  }
 0x5dc   :  { %5509 = vmatprep.subr.bf16.mxu1 %v6500_v38  ;;  %5456 = vmatpush3.bf16.msra.mxu0 %v6079_v56 }
 0x651   :  { %v5392_v23 = vpop.f32.mrb[32].mxu1 }
 0x652   :  { %v5393_v26 = vpop.f32.mrb[33].mxu1 }
 0x653   :  { %v5394_v8 = vadd.f32 %v5393_v26, %v5392_v23  ;;  %v5395_v18 = vpop.f32.mrb[34].mxu1  ;;  %v6080_v23 = vld [vmem:[#allocation29 + $0x68] sm:$0xff]  }
 0x654   :  { %v5396_v22 = vpop.f32.mrb[35].mxu1  ;;  %v6081_v26 = vld [vmem:[#allocation29 + $0x28] sm:$0xff]   ;;  %5457 = vmatprep.subr.bf16.mxu0 %v6080_v23  ;;  %v6083_v18 = vld [vmem:[#allocation29 + $0x30] sm:$0xff]  }
 0x655   :  { %v4361_v4 = vadd.f32 %v5394_v8, %v5239_v62  ;;  %v6082_v8 = vld [vmem:[#allocation29 + $0x70] sm:$0xff]   ;;  %5458 = vmatpush3.bf16.msra.mxu0 %v6081_v26  ;;  %v6084_v22 = vld [vmem:[#allocation29 + $0x78] sm:$0xff]  }
 0x656   :  { %5459 = vmatprep.subr.bf16.mxu0 %v6082_v8  ;;  %v6085_v62 = vld [vmem:[#allocation29 + $0x38] sm:$0xff]  }
 0x659   :  { %5460 = vmatpush3.bf16.msra.mxu0 %v6083_v18 }
 0x65a   :  { %5461 = vmatprep.subr.bf16.mxu0 %v6084_v22 }
 0x65d   :  { %5462 = vmatpush3.bf16.msra.mxu0 %v6085_v62 }
 0x671   :  { %v5414_v28 = vpop.f32.mrb[36].mxu1 }
 0x672   :  { %v5415_v55 = vpop.f32.mrb[37].mxu1 }
 0x673   :  { %v5416_v7 = vadd.f32 %v5415_v55, %v5414_v28  ;;  %v5417_v5 = vpop.f32.mrb[38].mxu1  ;;  %v5294_v28 = vld [vmem:[#allocation25] ss:$0 sm:$0xff] }
 0x674   :  { %v5418_v30 = vpop.f32.mrb[39].mxu1 }
 0x675   :  { %v4401_v34 = vadd.f32 %v5416_v7, %v4361_v4 }
 0x691   :  { %v4440_v59 = vpop.f32.mrb[40].mxu1 }
 0x692   :  { %v4441_v10 = vadd.f32 %v4440_v59, %v4401_v34  ;;  %v5487_v46 = vpop.f32.mrb[41].mxu1 }
 0x693   :  { %v4443_v42 = vpop.f32.mrb[42].mxu1 }
 0x694   :  { %v4446_v39 = vmax.f32 %v4441_v10, 0.0  ;;  %v5488_v41 = vpop.f32.mrb[43].mxu1  ;;  %v4690_v10 = vld [vmem:[#allocation28] sm:$0x3] }
 0x695   :  { %v4695_v46 = vrot.slane %v4690_v10, %v7247_v15  ;;  %v4699_v42 = vrot.slane %v4690_v10, %v7249_v63 }
 0x696   :  { %v4447_v35 = vpack.c.bf16 %v4446_v39, %v4446_v39 }
 0x698   :  { %5506 = vmatmul.mubr.bf16.vlgmr.msra.gmra.mrb[44].mxu1 %v4447_v35 }
 0x699   :  { %5510 = vmatpush3.bf16.msra.mxu1 %v6038_v32  ;;  %5525 = vmatprep.mubr.msk.bf16.mxu1 %vm6501_vm7, %v6500_v38 }
 0x69a   :  { %5511 = vmatprep.subr.bf16.mxu1 %v6500_v38 }
 0x69d   :  { %5512 = vmatpush3.bf16.msra.mxu1 %v6039_v14 }
 0x69e   :  { %5513 = vmatprep.subr.bf16.mxu1 %v6500_v38 }
 0x6a1   :  { %5514 = vmatpush3.bf16.msra.mxu1 %v6040_v3 }
 0x6a2   :  { %5515 = vmatprep.subr.bf16.mxu1 %v6500_v38 }
 0x6a5   :  { %5516 = vmatpush3.bf16.msra.mxu1 %v6041_v44 }
 0x6a6   :  { %5517 = vmatprep.subr.bf16.mxu1 %v6500_v38 }
 0x6a9   :  { %5518 = vmatpush3.bf16.msra.mxu1 %v6042_v12 }
 0x6aa   :  { %5519 = vmatprep.subr.bf16.mxu1 %v6500_v38 }
 0x6ad   :  { %5520 = vmatpush3.bf16.msra.mxu1 %v6043_v48 }
 0x6ae   :  { %5521 = vmatprep.subr.bf16.mxu1 %v6500_v38 }
 0x6b1   :  { %5522 = vmatpush3.bf16.msra.mxu1 %v6044_v11 }
 0x6b2   :  { %5523 = vmatprep.subr.bf16.mxu1 %v6500_v38  ;;  %v6060_v38 = vld [vmem:[#allocation26 + $0x44] ss:$8 sps:$4 sm:$0xff]  }
 0x6b5   :  { %5524 = vmatpush3.bf16.msra.mxu1 %v6045_v50 }
 0x6b6   :  { %4782 = vmatprep.subr.bf16.mxu1 %v6048_v20 }
 0x76b   :  { %v4553_v6 = vpop.f32.mrb[44].mxu1 }
 0x76c   :  { %v4554_v58 = vadd.f32 %v5285_v54, %v4553_v6  ;;  %v5507_v60 = vpop.f32.mrb[45].mxu1 }
 0x76d   :  { %v4556_v51 = vpop.f32.mrb[46].mxu1 }
 0x76e   :  { %v4559_v36 = vmax.f32 %v4554_v58, 0.0  ;;  %v5508_v53 = vpop.f32.mrb[47].mxu1 }
 0x770   :  { %v4560_v19 = vpack.c.bf16 %v4559_v36, %v4559_v36 }
 0x772   :  { %5526 = vmatmul.mubr.bf16.vlgmr.msra.gmra.mrb[48].mxu1 %v4560_v19 }
 0x773   :  { %4783 = vmatpush1.bf16.msra.mxu1 %v6046_v52  ;;  %4814 = vmatprep.mubr.bf16.mxu1 %v7541_v16  ;;  %v6064_v16 = vld [vmem:[#allocation26 + $0x60] ss:$8 sps:$4 sm:$0xff]  }
 0x774   :  { %4784 = vmatprep.subr.bf16.mxu1 %v6051_v2 }
 0x777   :  { %4785 = vmatpush1.bf16.msra.mxu1 %v6049_v29 }
 0x778   :  { %4786 = vmatprep.subr.bf16.mxu1 %v6054_v40 }
 0x77b   :  { %4787 = vmatpush1.bf16.msra.mxu1 %v6052_v13 }
 0x77c   :  { %4788 = vmatprep.subr.bf16.mxu1 %v6057_v21 }
 0x77f   :  { %4789 = vmatpush1.bf16.msra.mxu1 %v6055_v49 }
 0x780   :  { %4790 = vmatprep.subr.bf16.mxu1 %v6060_v38 }
 0x783   :  { %4791 = vmatpush1.bf16.msra.mxu1 %v6058_v47 }
 0x784   :  { %4792 = vmatprep.subr.bf16.mxu1 %v6063_v25 }
 0x787   :  { %4793 = vmatpush1.bf16.msra.mxu1 %v6061_v43 }
 0x788   :  { %4794 = vmatprep.subr.bf16.mxu1 %v6066_v57 }
 0x78b   :  { %4795 = vmatpush1.bf16.msra.mxu1 %v6064_v16 }
 0x78c   :  { %4796 = vmatprep.subr.bf16.mxu1 %v6069_v27 }
 0x78f   :  { %4797 = vmatpush1.bf16.msra.mxu1 %v6067_v1 }
 0x845   :  { %v4666_v55 = vpop.f32.mrb[48].mxu1 }
 0x846   :  { %v4667_v4 = vadd.f32 %v5294_v28, %v4666_v55  ;;  %v5527_v7 = vpop.f32.mrb[49].mxu1 }
 0x847   :  { %v4669_v5 = vpop.f32.mrb[50].mxu1 }
 0x848   :  { %v4672_v30 = vmax.f32 %v4667_v4, 0.0  ;;  %v5528_v34 = vpop.f32.mrb[51].mxu1 }
 0x84a   :  { %v4673_v59 = vpack.c.bf16 %v4672_v30, %v4672_v30 }
 0x84c   :  { %4815 = vmatmul.mubr.bf16.vlgmr.msra.gmra.mrb[52].mxu1 %v4673_v59 }
 0x91f   :  { %v4816_v39 = vpop.f32.mrb[52].mxu1 }
 0x920   :  { %v4817_v41 = vadd.f32 %v4816_v39, %v4695_v46  ;;  %v4818_v32 = vpop.f32.mrb[53].mxu1 }
 0x921   :  { %v4819_v35 = vadd.f32 %v4818_v32, %v4699_v42  ;;  %v4820_v14 = vpop.f32.mrb[54].mxu1 }
 0x922   :  { %5000 = vst [vmem:[#allocation33] sm:$0xff] %v4817_v41  ;;  %v4821_v3 = vpop.f32.mrb[55].mxu1  ;;  %v4823_v12 = vpack.c.bf16 %v4817_v41, %v4817_v41 }
 0x923   :  { %v4824_v44 = vpack.c.bf16 %v4819_v35, %v4819_v35  ;;  %5001 = vst [vmem:[#allocation33 + $0x8] sm:$0xff] %v4819_v35 }
 0x925   :  { %4992 = vmatprep.mubr.bf16.mxu0 %v4824_v44 }
 0x926   :  { %4993 = vmatmul.mubr.bf16.vlgmr.msra.gmra.mrb[64].mxu0 %v4823_v12 }
 0x927   :  { %6427 = shalt.err (!%p6424_p12)
}
 0x928   :  { %s6428_s7 = scalar_lea.hbm %s7530_s16, 256 }
 0x929   :  { %p6429_p13 = scmp.ne.s32.totalorder %s7530_s16, %s6428_s7  ;;  %p6432_p0 = scmp.lt.u32.totalorder %s6428_s7, %s7530_s16 }
 0x92b   :  { %p6434_p1 = pnand %p6432_p0, %p6429_p13 }
 0x92d   :  { %6437 = shalt.err (!%p6434_p1)
}
 0x92e   :  { %5022 = dma.vmem_to_hbm [thread:$0]  %s5020_s4, 256, %s7530_s16, [#allocation34]   ;;  %v5319_v63 = vld [vmem:[#allocation31] ss:$0 sm:$0xff] }
 0x92f   :  { %s6503_s2 = smov [#allocation32]  }
 0x930   :  { %s5009_s9 = sshll.u32 %s6503_s2, 4  ;;  %s5010_s9 = int_to_ptr.vmem [resolvable:$true] %s5009_s9 }
 0x931   :  { %s6438_s6 = scalar_lea.vmem %s5010_s9, 128  ;;  %p6443_p3 = scmp.lt.s32.totalorder %s5010_s9, %s5010_s9 }
 0x932   :  { %p6439_p2 = scmp.ne.s32.totalorder %s5010_s9, %s6438_s6  ;;  %p6444_p4 = scmp.lt.s32.totalorder %s6438_s6, %s6438_s6 }
 0x934   :  { %p6445_p5 = por %p6444_p4, %p6443_p3 }
 0x936   :  { %p6446_p6 = pnand %p6445_p5, %p6439_p2 }
 0x9f9   :  { %v5463_v15 = vpop.f32.mrb[64].mxu0 }
 0x9fa   :  { %v5464_v48 = vpop.f32.mrb[65].mxu0 }
 0x9fb   :  { %v5465_v11 = vadd.f32 %v5464_v48, %v5463_v15  ;;  %v5466_v50 = vpop.f32.mrb[66].mxu0 }
 0x9fc   :  { %v5467_v20 = vpop.f32.mrb[67].mxu0 }
 0x9fd   :  { %v4995_v54 = vadd.f32 %v5465_v11, %v5319_v63 }
 0x9ff   :  { %5002 = vst [vmem:[#allocation32] sm:$0xff] %v4995_v54 }
 0xa00   :  { %6449 = shalt.err (!%p6446_p6)
}
 0xa01   :  { %s6450_s5 = scalar_lea.hbm %s7529_s15, 128 }
 0xa02   :  { %p6451_p7 = scmp.ne.s32.totalorder %s7529_s15, %s6450_s5  ;;  %p6454_p8 = scmp.lt.u32.totalorder %s6450_s5, %s7529_s15 }
 0xa04   :  { %p6456_p9 = pnand %p6454_p8, %p6451_p7 }
 0xa06   :  { %6459 = shalt.err (!%p6456_p9)
}
 0xa07   :  { %5012 = dma.vmem_to_hbm [thread:$0]  %s5010_s9, 128, %s7529_s15, [#allocation10]  }
 0xa08   :  { %6476 = dma.done.wait [#allocation10], 128  }
 0xa09   :  { %6477 = vsyncadd [#allocation10], 4294967168 }
 0xa0a   :  { %6478 = dma.done.wait [#allocation34], 256  }
 0xa0b   :  { %6479 = vsyncadd [#allocation34], 4294967040 }
 0xa0c   :  { %5029 = vsyncpa [#allocation9], 1 }
 0xa0d   :  { %5030 = vsyncpa [#allocation12], 1 }
 0xa0e   :  { %5031 = vsyncpa [#allocation15], 1 }
 0xa0f   :  { %5032 = vsyncpa [#allocation18], 1 }
 0xa10   :  { %5033 = vsyncpa [#allocation21], 1 }
 0xa11   :  { %5034 = vsyncpa [#allocation24], 1 }
 0xa12   :  { %5035 = vsyncpa [#allocation27], 1 }
 0xa13   :  { %5036 = vsyncpa [#allocation30], 1 }
 0xa14   :  { %5037 = vsyncpa [#allocation10], 1 }
 0xa15   :  { %5038 = vsyncpa [#allocation34], 1 }

</bundles_post_ra>
